<compile_context>
chip_gen: v5e
topology: v5e:2x2
jax: 0.10.0
libtpu: 0.0.40
codegen_flags: <defaults>
</compile_context>

<pallas_src>
import functools

import jax
import jax.numpy as jnp
from jax.experimental import pallas as pl
from jax.experimental.pallas import tpu as pltpu


LANE = 128                          # pad K / Cout to multiples of the lane width
_VMEM_BUDGET = 20 * 1024 * 1024     # budget for double-buffered blocks per kernel
_VMEM_LIMIT = 32 * 1024 * 1024      # scoped VMEM request (fits all generations)


def _round_up(x, m):
    return ((x + m - 1) // m) * m


# ----------------------------------------------------------------------------
# Pallas kernels
# ----------------------------------------------------------------------------
def _matmul_bias_act_kernel(p_ref, w_ref, b_ref, o_ref, *, act):
    """o = act(P @ W + b) for one (TM, K) x (K, TN) tile; f32 accumulation."""
    acc = jnp.dot(p_ref[...], w_ref[...], preferred_element_type=jnp.float32)
    acc = acc + b_ref[...]
    if act == "lrelu":
        acc = jnp.where(acc > 0, acc, 0.2 * acc)
    o_ref[...] = acc.astype(o_ref.dtype)


def _inorm_lrelu_kernel(x_ref, o_ref):
    """InstanceNorm2d(affine=False, eps=1e-5) + LeakyReLU(0.2) on one
    (HW, C_TILE) slab of one image (NHWC layout: reduce over rows = H*W)."""
    x = x_ref[0].astype(jnp.float32)                      # (HW, CT)
    mean = jnp.mean(x, axis=0, keepdims=True)
    var = jnp.mean((x - mean) * (x - mean), axis=0, keepdims=True)
    y = (x - mean) * jax.lax.rsqrt(var + 1e-5)
    y = jnp.where(y > 0, y, 0.2 * y)
    o_ref[0] = y.astype(o_ref.dtype)


def _inorm_lrelu_proj_kernel(x_ref, w_ref, b_ref, o_ref):
    """Fused InstanceNorm + LeakyReLU + final 1x1 conv (Cout=1) for one image.
    The 1x1 conv is a VPU weighted channel sum + lane reduction."""
    x = x_ref[0].astype(jnp.float32)                      # (HW, C)
    mean = jnp.mean(x, axis=0, keepdims=True)
    var = jnp.mean((x - mean) * (x - mean), axis=0, keepdims=True)
    y = (x - mean) * jax.lax.rsqrt(var + 1e-5)
    y = jnp.where(y > 0, y, 0.2 * y)                      # (HW, C)
    o = jnp.sum(y * w_ref[...], axis=-1, keepdims=True) + b_ref[...]
    o_ref[0] = o.astype(o_ref.dtype)


# ----------------------------------------------------------------------------
# Glue: im2col (reflect padding + patch extraction) in plain JAX.
# ----------------------------------------------------------------------------
def _im2col_nhwc(x, kh, kw, stride, pad):
    if pad > 0:
        x = jnp.pad(x, ((0, 0), (pad, pad), (pad, pad), (0, 0)), mode="reflect")
    n, hp, wp, c = x.shape
    oh = (hp - kh) // stride + 1
    ow = (wp - kw) // stride + 1
    cols = []
    for i in range(kh):
        for j in range(kw):
            cols.append(
                x[:, i : i + stride * (oh - 1) + 1 : stride,
                     j : j + stride * (ow - 1) + 1 : stride, :]
            )
    patches = jnp.concatenate(cols, axis=-1)              # (N, OH, OW, KH*KW*C)
    return patches.reshape(n * oh * ow, kh * kw * c), oh, ow


def _pick_tiles(m, kp, coutp, in_bytes, out_bytes):
    """(TM, TN): keep the whole weight slab resident unless it is large, then
    pick the largest power-of-two M tile whose double-buffered blocks fit."""
    tn = coutp if kp * coutp * in_bytes <= (8 << 20) else LANE
    tm = 1024
    while tm > 8:
        need = ((2 * tm * kp + 2 * kp * tn + 2 * tn) * in_bytes
                + 2 * tm * tn * out_bytes)
        if need <= _VMEM_BUDGET:
            break
        tm //= 2
    return min(tm, _round_up(m, 8)), tn


def conv2d_pallas(x_nhwc, w, b, *, stride, pad, act="none",
                  compute_dtype=jnp.float32):
    """Conv2d (reflect pad) + bias (+ optional LeakyReLU(0.2)) in NHWC layout.

    The input may carry zero-padded channels (>= w.shape[1]); the output is
    zero-padded along channels to a multiple of 128 so all stores are lane-dense.
    """
    cout, cin_w, kh, kw = w.shape
    n, _, _, cin = x_nhwc.shape
    coutp = _round_up(cout, LANE)

    # Weight as (KH*KW*Cin, CoutP) in (kh, kw, c)-major order (matches im2col
    # column order); zero rows for padded input channels, zero cols/bias for
    # padded output channels.
    wm = jnp.transpose(w, (2, 3, 1, 0))                   # (KH, KW, Cin_w, Cout)
    if cin > cin_w:
        wm = jnp.pad(wm, ((0, 0), (0, 0), (0, cin - cin_w), (0, 0)))
    wm = wm.reshape(kh * kw * cin, cout)
    wm = jnp.pad(wm, ((0, 0), (0, coutp - cout)))
    bm = jnp.pad(b, (0, coutp - cout)).reshape(1, coutp).astype(jnp.float32)

    patches, oh, ow = _im2col_nhwc(x_nhwc.astype(compute_dtype), kh, kw, stride, pad)
    m, k = patches.shape
    kp = _round_up(k, LANE)

    itemsize = jnp.dtype(compute_dtype).itemsize
    tm, tn = _pick_tiles(m, kp, coutp, itemsize, itemsize)
    m_pad = _round_up(m, tm)

    patches = jnp.pad(patches, ((0, m_pad - m), (0, kp - k)))
    wm = jnp.pad(wm, ((0, kp - k), (0, 0))).astype(compute_dtype)

    out = pl.pallas_call(
        functools.partial(_matmul_bias_act_kernel, act=act),
        out_shape=jax.ShapeDtypeStruct((m_pad, coutp), compute_dtype),
        grid=(m_pad // tm, coutp // tn),
        in_specs=[
            pl.BlockSpec((tm, kp), lambda i, j: (i, 0)),   # patches stream (pipelined)
            pl.BlockSpec((kp, tn), lambda i, j: (0, j)),   # weight tile
            pl.BlockSpec((1, tn), lambda i, j: (0, j)),    # bias tile
        ],
        out_specs=pl.BlockSpec((tm, tn), lambda i, j: (i, j)),
        compiler_params=pltpu.CompilerParams(
            dimension_semantics=("parallel", "parallel"),
            vmem_limit_bytes=_VMEM_LIMIT,
        ),
    )(patches, wm, bm)

    return out[:m].reshape(n, oh, ow, coutp)


def instance_norm_lrelu_pallas(x_nhwc):
    """InstanceNorm2d(affine=False) + LeakyReLU(0.2); NHWC, tiled over (N, C)."""
    n, h, w, c = x_nhwc.shape
    hw = h * w
    ct = LANE if c % LANE == 0 else c
    xf = x_nhwc.reshape(n, hw, c)
    out = pl.pallas_call(
        _inorm_lrelu_kernel,
        out_shape=jax.ShapeDtypeStruct((n, hw, c), x_nhwc.dtype),
        grid=(n, c // ct),
        in_specs=[pl.BlockSpec((1, hw, ct), lambda i, j: (i, 0, j))],
        out_specs=pl.BlockSpec((1, hw, ct), lambda i, j: (i, 0, j)),
        compiler_params=pltpu.CompilerParams(
            dimension_semantics=("parallel", "parallel"),
            vmem_limit_bytes=_VMEM_LIMIT,
        ),
    )(xf)
    return out.reshape(n, h, w, c)


def instance_norm_lrelu_final_conv_pallas(x_nhwc, w_final, b_final):
    """Fused InstanceNorm + LeakyReLU + final 1x1 conv (Cout=1). Returns NHWC."""
    n, h, w, c = x_nhwc.shape
    hw = h * w
    cout, cin_w, _, _ = w_final.shape                     # (1, Cin, 1, 1)
    wf = w_final.reshape(cout, cin_w).astype(jnp.float32)
    wf = jnp.pad(wf, ((0, 0), (0, c - cin_w)))            # zero weight for padded channels
    bf = b_final.reshape(1, 1).astype(jnp.float32)
    xf = x_nhwc.reshape(n, hw, c)
    out = pl.pallas_call(
        _inorm_lrelu_proj_kernel,
        out_shape=jax.ShapeDtypeStruct((n, hw, 1), jnp.float32),
        grid=(n,),
        in_specs=[
            pl.BlockSpec((1, hw, c), lambda i: (i, 0, 0)),
            pl.BlockSpec((1, c), lambda i: (0, 0)),
            pl.BlockSpec((1, 1), lambda i: (0, 0)),
        ],
        out_specs=pl.BlockSpec((1, hw, 1), lambda i: (i, 0, 0)),
        compiler_params=pltpu.CompilerParams(
            dimension_semantics=("parallel",),
            vmem_limit_bytes=_VMEM_LIMIT,
        ),
    )(xf, wf, bf)
    return out.reshape(n, h, w, 1)


# ----------------------------------------------------------------------------
# Discriminator forward (matches the PyTorch module semantics)
# ----------------------------------------------------------------------------
def discriminator_forward(x_nchw, params, compute_dtype=jnp.float32):
    # Single layout conversion at the model boundary; NHWC everywhere inside.
    h = jnp.transpose(x_nchw, (0, 2, 3, 1))
    # FeatureMapBlock: 7x7 conv, stride 1, reflect pad 3 (no activation)
    h = conv2d_pallas(h, *params["feat"], stride=1, pad=3, act="none",
                      compute_dtype=compute_dtype)
    # EncoderBlock(hidden, use_bn=False, k=4): conv s2 p1 + LeakyReLU(0.2)
    h = conv2d_pallas(h, *params["enc1"], stride=2, pad=1, act="lrelu",
                      compute_dtype=compute_dtype)
    # EncoderBlock(hidden*2, use_bn=True, k=4): conv + InstanceNorm + LeakyReLU
    h = conv2d_pallas(h, *params["enc2"], stride=2, pad=1, act="none",
                      compute_dtype=compute_dtype)
    h = instance_norm_lrelu_pallas(h)
    # EncoderBlock(hidden*4, use_bn=True, k=4): conv, then fused
    # InstanceNorm + LeakyReLU + final 1x1 conv epilogue.
    h = conv2d_pallas(h, *params["enc3"], stride=2, pad=1, act="none",
                      compute_dtype=compute_dtype)
    out = instance_norm_lrelu_final_conv_pallas(h, *params["final"])
    return jnp.transpose(out, (0, 3, 1, 2)).astype(jnp.float32)   # back to NCHW


# ----------------------------------------------------------------------------
# Pure-JAX reference for correctness checking
# ----------------------------------------------------------------------------
def discriminator_ref(x, params):
    def conv(x, w, b, stride, pad):
        if pad > 0:
            x = jnp.pad(x, ((0, 0), (0, 0), (pad, pad), (pad, pad)), mode="reflect")
        y = jax.lax.conv_general_dilated(
            x, w, (stride, stride), "VALID",
            dimension_numbers=("NCHW", "OIHW", "NCHW"),
        )
        return y + b[None, :, None, None]

    def lrelu(x):
        return jnp.where(x > 0, x, 0.2 * x)

    def inorm(x):
        m = jnp.mean(x, axis=(2, 3), keepdims=True)
        v = jnp.mean((x - m) ** 2, axis=(2, 3), keepdims=True)
        return (x - m) * jax.lax.rsqrt(v + 1e-5)

    h = conv(x, *params["feat"], 1, 3)
    h = lrelu(conv(h, *params["enc1"], 2, 1))
    h = lrelu(inorm(conv(h, *params["enc2"], 2, 1)))
    h = lrelu(inorm(conv(h, *params["enc3"], 2, 1)))
    return conv(h, *params["final"], 1, 0)


# ----------------------------------------------------------------------------
# Deterministic parameter init + main
# ----------------------------------------------------------------------------
def init_params(key, input_channels, hidden_channels):
    def conv_init(k, cout, cin, kh, kw):
        kw_key, kb_key = jax.random.split(k)
        scale = 1.0 / (cin * kh * kw) ** 0.5
        w = jax.random.uniform(kw_key, (cout, cin, kh, kw), jnp.float32, -scale, scale)
        b = jax.random.uniform(kb_key, (cout,), jnp.float32, -scale, scale)
        return (w, b)

    ks = jax.random.split(key, 5)
    hc = hidden_channels
    return {
        "feat": conv_init(ks[0], hc, input_channels, 7, 7),
        "enc1": conv_init(ks[1], hc * 2, hc, 4, 4),
        "enc2": conv_init(ks[2], hc * 4, hc * 2, 4, 4),
        "enc3": conv_init(ks[3], hc * 8, hc * 4, 4, 4),
        "final": conv_init(ks[4], 1, hc * 8, 1, 1),
    }


if __name__ == "__main__":
    key = jax.random.PRNGKey(0)
    k_x, k_p = jax.random.split(key)

    batch, in_ch, hidden, spatial = 2, 3, 8, 16
    x = jax.random.normal(k_x, (batch, in_ch, spatial, spatial), jnp.float32)
    params = init_params(k_p, in_ch, hidden)

    ref = jax.block_until_ready(discriminator_ref(x, params))

    # f32 path: exact semantics of the PyTorch module.
    fwd_f32 = jax.jit(functools.partial(discriminator_forward,
                                        compute_dtype=jnp.float32))
    out = jax.block_until_ready(fwd_f32(x, params))
    assert out.shape == (batch, 1, spatial // 8, spatial // 8), out.shape
    assert jnp.allclose(out, ref, atol=1e-4, rtol=1e-4), (
        float(jnp.max(jnp.abs(out - ref)))
    )

    # bf16 MXU path (f32 accumulation): looser tolerance.
    fwd_bf16 = jax.jit(functools.partial(discriminator_forward,
                                         compute_dtype=jnp.bfloat16))
    out_bf16 = jax.block_until_ready(fwd_bf16(x, params))
    assert out_bf16.shape == out.shape, out_bf16.shape
    assert jnp.allclose(out_bf16, ref, atol=1e-1, rtol=1e-1), (
        float(jnp.max(jnp.abs(out_bf16 - ref)))
    )

    print("KERNEL_OK")
</pallas_src>

<mosaic_0001>
module attributes {stable_mosaic.version = 11 : i64} {
  func.func @_matmul_bias_act_kernel(%arg0: i32, %arg1: i32, %arg2: memref<512x256xf32, #tpu.memory_space<vmem>>, %arg3: memref<256x128xf32, #tpu.memory_space<vmem>>, %arg4: memref<1x128xf32, #tpu.memory_space<vmem>>, %arg5: memref<512x128xf32, #tpu.memory_space<vmem>>) attributes {dimension_semantics = [#tpu.dimension_semantics<parallel>, #tpu.dimension_semantics<parallel>], iteration_bounds = array<i64: 1, 1>, scalar_prefetch = 0 : i64, scratch_operands = 0 : i64, tpu.core_type = #tpu.core_type<tc>, window_params = [{transform_indices = @transform_0, window_bounds = array<i64: 512, 256>}, {transform_indices = @transform_1, window_bounds = array<i64: 256, 128>}, {transform_indices = @transform_2, window_bounds = array<i64: 1, 128>}, {transform_indices = @transform_3, window_bounds = array<i64: 512, 128>}]} {
    %c0 = arith.constant 0 : index
    %c0_0 = arith.constant 0 : index
    %0 = vector.load %arg2[%c0, %c0_0] : memref<512x256xf32, #tpu.memory_space<vmem>>, vector<512x256xf32>
    %c0_1 = arith.constant 0 : index
    %c0_2 = arith.constant 0 : index
    %1 = vector.load %arg3[%c0_1, %c0_2] : memref<256x128xf32, #tpu.memory_space<vmem>>, vector<256x128xf32>
    %cst = arith.constant dense<0.000000e+00> : vector<512x128xf32>
    %2 = tpu.matmul %0, %1, %cst {dimension_numbers = #tpu.dot_dimension_numbers<[1], [0], [0], [1], [0, 0, 1, 1], [], []>} : vector<512x256xf32>, vector<256x128xf32>, vector<512x128xf32> -> vector<512x128xf32>
    %c0_3 = arith.constant 0 : index
    %c0_4 = arith.constant 0 : index
    %3 = vector.load %arg4[%c0_3, %c0_4] : memref<1x128xf32, #tpu.memory_space<vmem>>, vector<1x128xf32>
    %4 = vector.broadcast %3 : vector<1x128xf32> to vector<512x128xf32>
    %5 = arith.addf %2, %4 : vector<512x128xf32>
    %c0_5 = arith.constant 0 : index
    %c0_6 = arith.constant 0 : index
    %6 = vector.load %arg5[%c0_5, %c0_6] : memref<512x128xf32, #tpu.memory_space<vmem>>, vector<512x128xf32>
    tpu.vector_store %arg5[%c0_5, %c0_6], %5 {strides = array<i32>} : memref<512x128xf32, #tpu.memory_space<vmem>>, vector<512x128xf32>,
    return
  }
  func.func @transform_0(%arg0: i32, %arg1: i32) -> (i32, i32) {
    %c0_i32 = arith.constant 0 : i32
    %c0_i32_0 = arith.constant 0 : i32
    return %arg0, %c0_i32 : i32, i32
  }
  func.func @transform_1(%arg0: i32, %arg1: i32) -> (i32, i32) {
    %c0_i32 = arith.constant 0 : i32
    %c0_i32_0 = arith.constant 0 : i32
    return %c0_i32, %arg1 : i32, i32
  }
  func.func @transform_2(%arg0: i32, %arg1: i32) -> (i32, i32) {
    %c0_i32 = arith.constant 0 : i32
    %c0_i32_0 = arith.constant 0 : i32
    return %c0_i32, %arg1 : i32, i32
  }
  func.func @transform_3(%arg0: i32, %arg1: i32) -> (i32, i32) {
    %c0_i32 = arith.constant 0 : i32
    return %arg0, %arg1 : i32, i32
  }
}

module attributes {stable_mosaic.version = 11 : i64} {
  func.func @_matmul_bias_act_kernel(%arg0: i32, %arg1: i32, %arg2: memref<128x2048xf32, #tpu.memory_space<vmem>>, %arg3: memref<2048x128xf32, #tpu.memory_space<vmem>>, %arg4: memref<1x128xf32, #tpu.memory_space<vmem>>, %arg5: memref<128x128xf32, #tpu.memory_space<vmem>>) attributes {dimension_semantics = [#tpu.dimension_semantics<parallel>, #tpu.dimension_semantics<parallel>], iteration_bounds = array<i64: 1, 1>, scalar_prefetch = 0 : i64, scratch_operands = 0 : i64, tpu.core_type = #tpu.core_type<tc>, window_params = [{transform_indices = @transform_0, window_bounds = array<i64: 128, 2048>}, {transform_indices = @transform_1, window_bounds = array<i64: 2048, 128>}, {transform_indices = @transform_2, window_bounds = array<i64: 1, 128>}, {transform_indices = @transform_3, window_bounds = array<i64: 128, 128>}]} {
    %c0 = arith.constant 0 : index
    %c0_0 = arith.constant 0 : index
    %0 = vector.load %arg2[%c0, %c0_0] : memref<128x2048xf32, #tpu.memory_space<vmem>>, vector<128x2048xf32>
    %c0_1 = arith.constant 0 : index
    %c0_2 = arith.constant 0 : index
    %1 = vector.load %arg3[%c0_1, %c0_2] : memref<2048x128xf32, #tpu.memory_space<vmem>>, vector<2048x128xf32>
    %cst = arith.constant dense<0.000000e+00> : vector<128x128xf32>
    %2 = tpu.matmul %0, %1, %cst {dimension_numbers = #tpu.dot_dimension_numbers<[1], [0], [0], [1], [0, 0, 1, 1], [], []>} : vector<128x2048xf32>, vector<2048x128xf32>, vector<128x128xf32> -> vector<128x128xf32>
    %c0_3 = arith.constant 0 : index
    %c0_4 = arith.constant 0 : index
    %3 = vector.load %arg4[%c0_3, %c0_4] : memref<1x128xf32, #tpu.memory_space<vmem>>, vector<1x128xf32>
    %4 = vector.broadcast %3 : vector<1x128xf32> to vector<128x128xf32>
    %5 = arith.addf %2, %4 : vector<128x128xf32>
    %cst_5 = arith.constant 0.000000e+00 : f32
    %6 = vector.broadcast %cst_5 : f32 to vector<128x128xf32>
    %7 = arith.cmpf ogt, %5, %6 : vector<128x128xf32>
    %cst_6 = arith.constant 2.000000e-01 : f32
    %8 = vector.broadcast %cst_6 : f32 to vector<128x128xf32>
    %9 = arith.mulf %8, %5 : vector<128x128xf32>
    %10 = arith.select %7, %5, %9 : vector<128x128xi1>, vector<128x128xf32>
    %c0_7 = arith.constant 0 : index
    %c0_8 = arith.constant 0 : index
    %11 = vector.load %arg5[%c0_7, %c0_8] : memref<128x128xf32, #tpu.memory_space<vmem>>, vector<128x128xf32>
    tpu.vector_store %arg5[%c0_7, %c0_8], %10 {strides = array<i32>} : memref<128x128xf32, #tpu.memory_space<vmem>>, vector<128x128xf32>,
    return
  }
  func.func @transform_0(%arg0: i32, %arg1: i32) -> (i32, i32) {
    %c0_i32 = arith.constant 0 : i32
    %c0_i32_0 = arith.constant 0 : i32
    return %arg0, %c0_i32 : i32, i32
  }
  func.func @transform_1(%arg0: i32, %arg1: i32) -> (i32, i32) {
    %c0_i32 = arith.constant 0 : i32
    %c0_i32_0 = arith.constant 0 : i32
    return %c0_i32, %arg1 : i32, i32
  }
  func.func @transform_2(%arg0: i32, %arg1: i32) -> (i32, i32) {
    %c0_i32 = arith.constant 0 : i32
    %c0_i32_0 = arith.constant 0 : i32
    return %c0_i32, %arg1 : i32, i32
  }
  func.func @transform_3(%arg0: i32, %arg1: i32) -> (i32, i32) {
    %c0_i32 = arith.constant 0 : i32
    return %arg0, %arg1 : i32, i32
  }
}

module attributes {stable_mosaic.version = 11 : i64} {
  func.func @_inorm_lrelu_kernel(%arg0: i32, %arg1: i32, %arg2: memref<1x16x128xf32, #tpu.memory_space<vmem>>, %arg3: memref<1x16x128xf32, #tpu.memory_space<vmem>>) attributes {dimension_semantics = [#tpu.dimension_semantics<parallel>, #tpu.dimension_semantics<parallel>], iteration_bounds = array<i64: 2, 1>, scalar_prefetch = 0 : i64, scratch_operands = 0 : i64, tpu.core_type = #tpu.core_type<tc>, window_params = [{transform_indices = @transform_0, window_bounds = array<i64: 1, 16, 128>}, {transform_indices = @transform_1, window_bounds = array<i64: 1, 16, 128>}]} {
    %c0 = arith.constant 0 : index
    %c0_0 = arith.constant 0 : index
    %c0_1 = arith.constant 0 : index
    %0 = vector.load %arg2[%c0, %c0_0, %c0_1] : memref<1x16x128xf32, #tpu.memory_space<vmem>>, vector<1x16x128xf32>
    %1 = vector.shape_cast %0 : vector<1x16x128xf32> to vector<16x128xf32>
    %cst = arith.constant dense<0.000000e+00> : vector<128xf32>
    %2 = vector.multi_reduction <add>, %1, %cst [0] : vector<16x128xf32> to vector<128xf32>
    %3 = vector.shape_cast %2 : vector<128xf32> to vector<1x128xf32>
    %cst_2 = arith.constant 1.600000e+01 : f32
    %4 = vector.broadcast %cst_2 : f32 to vector<1x128xf32>
    %5 = arith.divf %3, %4 : vector<1x128xf32>
    %6 = vector.broadcast %5 : vector<1x128xf32> to vector<16x128xf32>
    %7 = arith.subf %1, %6 : vector<16x128xf32>
    %8 = vector.broadcast %5 : vector<1x128xf32> to vector<16x128xf32>
    %9 = arith.subf %1, %8 : vector<16x128xf32>
    %10 = arith.mulf %7, %9 : vector<16x128xf32>
    %cst_3 = arith.constant dense<0.000000e+00> : vector<128xf32>
    %11 = vector.multi_reduction <add>, %10, %cst_3 [0] : vector<16x128xf32> to vector<128xf32>
    %12 = vector.shape_cast %11 : vector<128xf32> to vector<1x128xf32>
    %cst_4 = arith.constant 1.600000e+01 : f32
    %13 = vector.broadcast %cst_4 : f32 to vector<1x128xf32>
    %14 = arith.divf %12, %13 : vector<1x128xf32>
    %15 = vector.broadcast %5 : vector<1x128xf32> to vector<16x128xf32>
    %16 = arith.subf %1, %15 : vector<16x128xf32>
    %cst_5 = arith.constant 9.99999974E-6 : f32
    %17 = vector.broadcast %cst_5 : f32 to vector<1x128xf32>
    %18 = arith.addf %14, %17 : vector<1x128xf32>
    %19 = math.rsqrt %18 : vector<1x128xf32>
    %20 = vector.broadcast %19 : vector<1x128xf32> to vector<16x128xf32>
    %21 = arith.mulf %16, %20 : vector<16x128xf32>
    %cst_6 = arith.constant 0.000000e+00 : f32
    %22 = vector.broadcast %cst_6 : f32 to vector<16x128xf32>
    %23 = arith.cmpf ogt, %21, %22 : vector<16x128xf32>
    %cst_7 = arith.constant 2.000000e-01 : f32
    %24 = vector.broadcast %cst_7 : f32 to vector<16x128xf32>
    %25 = arith.mulf %24, %21 : vector<16x128xf32>
    %26 = arith.select %23, %21, %25 : vector<16x128xi1>, vector<16x128xf32>
    %c0_8 = arith.constant 0 : index
    %c0_9 = arith.constant 0 : index
    %c0_10 = arith.constant 0 : index
    %27 = vector.load %arg3[%c0_8, %c0_9, %c0_10] : memref<1x16x128xf32, #tpu.memory_space<vmem>>, vector<1x16x128xf32>
    %28 = vector.shape_cast %27 : vector<1x16x128xf32> to vector<16x128xf32>
    %29 = vector.shape_cast %26 : vector<16x128xf32> to vector<1x16x128xf32>
    tpu.vector_store %arg3[%c0_8, %c0_9, %c0_10], %29 {strides = array<i32>} : memref<1x16x128xf32, #tpu.memory_space<vmem>>, vector<1x16x128xf32>,
    return
  }
  func.func @transform_0(%arg0: i32, %arg1: i32) -> (i32, i32, i32) {
    %c0_i32 = arith.constant 0 : i32
    %c0_i32_0 = arith.constant 0 : i32
    return %arg0, %c0_i32, %arg1 : i32, i32, i32
  }
  func.func @transform_1(%arg0: i32, %arg1: i32) -> (i32, i32, i32) {
    %c0_i32 = arith.constant 0 : i32
    %c0_i32_0 = arith.constant 0 : i32
    return %arg0, %c0_i32, %arg1 : i32, i32, i32
  }
}

module attributes {stable_mosaic.version = 11 : i64} {
  func.func @_matmul_bias_act_kernel(%arg0: i32, %arg1: i32, %arg2: memref<32x2048xf32, #tpu.memory_space<vmem>>, %arg3: memref<2048x128xf32, #tpu.memory_space<vmem>>, %arg4: memref<1x128xf32, #tpu.memory_space<vmem>>, %arg5: memref<32x128xf32, #tpu.memory_space<vmem>>) attributes {dimension_semantics = [#tpu.dimension_semantics<parallel>, #tpu.dimension_semantics<parallel>], iteration_bounds = array<i64: 1, 1>, scalar_prefetch = 0 : i64, scratch_operands = 0 : i64, tpu.core_type = #tpu.core_type<tc>, window_params = [{transform_indices = @transform_0, window_bounds = array<i64: 32, 2048>}, {transform_indices = @transform_1, window_bounds = array<i64: 2048, 128>}, {transform_indices = @transform_2, window_bounds = array<i64: 1, 128>}, {transform_indices = @transform_3, window_bounds = array<i64: 32, 128>}]} {
    %c0 = arith.constant 0 : index
    %c0_0 = arith.constant 0 : index
    %0 = vector.load %arg2[%c0, %c0_0] : memref<32x2048xf32, #tpu.memory_space<vmem>>, vector<32x2048xf32>
    %c0_1 = arith.constant 0 : index
    %c0_2 = arith.constant 0 : index
    %1 = vector.load %arg3[%c0_1, %c0_2] : memref<2048x128xf32, #tpu.memory_space<vmem>>, vector<2048x128xf32>
    %cst = arith.constant dense<0.000000e+00> : vector<32x128xf32>
    %2 = tpu.matmul %0, %1, %cst {dimension_numbers = #tpu.dot_dimension_numbers<[1], [0], [0], [1], [0, 0, 1, 1], [], []>} : vector<32x2048xf32>, vector<2048x128xf32>, vector<32x128xf32> -> vector<32x128xf32>
    %c0_3 = arith.constant 0 : index
    %c0_4 = arith.constant 0 : index
    %3 = vector.load %arg4[%c0_3, %c0_4] : memref<1x128xf32, #tpu.memory_space<vmem>>, vector<1x128xf32>
    %4 = vector.broadcast %3 : vector<1x128xf32> to vector<32x128xf32>
    %5 = arith.addf %2, %4 : vector<32x128xf32>
    %c0_5 = arith.constant 0 : index
    %c0_6 = arith.constant 0 : index
    %6 = vector.load %arg5[%c0_5, %c0_6] : memref<32x128xf32, #tpu.memory_space<vmem>>, vector<32x128xf32>
    tpu.vector_store %arg5[%c0_5, %c0_6], %5 {strides = array<i32>} : memref<32x128xf32, #tpu.memory_space<vmem>>, vector<32x128xf32>,
    return
  }
  func.func @transform_0(%arg0: i32, %arg1: i32) -> (i32, i32) {
    %c0_i32 = arith.constant 0 : i32
    %c0_i32_0 = arith.constant 0 : i32
    return %arg0, %c0_i32 : i32, i32
  }
  func.func @transform_1(%arg0: i32, %arg1: i32) -> (i32, i32) {
    %c0_i32 = arith.constant 0 : i32
    %c0_i32_0 = arith.constant 0 : i32
    return %c0_i32, %arg1 : i32, i32
  }
  func.func @transform_2(%arg0: i32, %arg1: i32) -> (i32, i32) {
    %c0_i32 = arith.constant 0 : i32
    %c0_i32_0 = arith.constant 0 : i32
    return %c0_i32, %arg1 : i32, i32
  }
  func.func @transform_3(%arg0: i32, %arg1: i32) -> (i32, i32) {
    %c0_i32 = arith.constant 0 : i32
    return %arg0, %arg1 : i32, i32
  }
}

module attributes {stable_mosaic.version = 11 : i64} {
  func.func @_matmul_bias_act_kernel(%arg0: i32, %arg1: i32, %arg2: memref<8x2048xf32, #tpu.memory_space<vmem>>, %arg3: memref<2048x128xf32, #tpu.memory_space<vmem>>, %arg4: memref<1x128xf32, #tpu.memory_space<vmem>>, %arg5: memref<8x128xf32, #tpu.memory_space<vmem>>) attributes {dimension_semantics = [#tpu.dimension_semantics<parallel>, #tpu.dimension_semantics<parallel>], iteration_bounds = array<i64: 1, 1>, scalar_prefetch = 0 : i64, scratch_operands = 0 : i64, tpu.core_type = #tpu.core_type<tc>, window_params = [{transform_indices = @transform_0, window_bounds = array<i64: 8, 2048>}, {transform_indices = @transform_1, window_bounds = array<i64: 2048, 128>}, {transform_indices = @transform_2, window_bounds = array<i64: 1, 128>}, {transform_indices = @transform_3, window_bounds = array<i64: 8, 128>}]} {
    %c0 = arith.constant 0 : index
    %c0_0 = arith.constant 0 : index
    %0 = vector.load %arg2[%c0, %c0_0] : memref<8x2048xf32, #tpu.memory_space<vmem>>, vector<8x2048xf32>
    %c0_1 = arith.constant 0 : index
    %c0_2 = arith.constant 0 : index
    %1 = vector.load %arg3[%c0_1, %c0_2] : memref<2048x128xf32, #tpu.memory_space<vmem>>, vector<2048x128xf32>
    %cst = arith.constant dense<0.000000e+00> : vector<8x128xf32>
    %2 = tpu.matmul %0, %1, %cst {dimension_numbers = #tpu.dot_dimension_numbers<[1], [0], [0], [1], [0, 0, 1, 1], [], []>} : vector<8x2048xf32>, vector<2048x128xf32>, vector<8x128xf32> -> vector<8x128xf32>
    %c0_3 = arith.constant 0 : index
    %c0_4 = arith.constant 0 : index
    %3 = vector.load %arg4[%c0_3, %c0_4] : memref<1x128xf32, #tpu.memory_space<vmem>>, vector<1x128xf32>
    %4 = vector.broadcast %3 : vector<1x128xf32> to vector<8x128xf32>
    %5 = arith.addf %2, %4 : vector<8x128xf32>
    %c0_5 = arith.constant 0 : index
    %c0_6 = arith.constant 0 : index
    %6 = vector.load %arg5[%c0_5, %c0_6] : memref<8x128xf32, #tpu.memory_space<vmem>>, vector<8x128xf32>
    tpu.vector_store %arg5[%c0_5, %c0_6], %5 {strides = array<i32>} : memref<8x128xf32, #tpu.memory_space<vmem>>, vector<8x128xf32>,
    return
  }
  func.func @transform_0(%arg0: i32, %arg1: i32) -> (i32, i32) {
    %c0_i32 = arith.constant 0 : i32
    %c0_i32_0 = arith.constant 0 : i32
    return %arg0, %c0_i32 : i32, i32
  }
  func.func @transform_1(%arg0: i32, %arg1: i32) -> (i32, i32) {
    %c0_i32 = arith.constant 0 : i32
    %c0_i32_0 = arith.constant 0 : i32
    return %c0_i32, %arg1 : i32, i32
  }
  func.func @transform_2(%arg0: i32, %arg1: i32) -> (i32, i32) {
    %c0_i32 = arith.constant 0 : i32
    %c0_i32_0 = arith.constant 0 : i32
    return %c0_i32, %arg1 : i32, i32
  }
  func.func @transform_3(%arg0: i32, %arg1: i32) -> (i32, i32) {
    %c0_i32 = arith.constant 0 : i32
    return %arg0, %arg1 : i32, i32
  }
}

module attributes {stable_mosaic.version = 11 : i64} {
  func.func @_inorm_lrelu_proj_kernel(%arg0: i32, %arg1: memref<1x4x128xf32, #tpu.memory_space<vmem>>, %arg2: memref<1x128xf32, #tpu.memory_space<vmem>>, %arg3: memref<1x1xf32, #tpu.memory_space<vmem>>, %arg4: memref<1x4x1xf32, #tpu.memory_space<vmem>>) attributes {dimension_semantics = [#tpu.dimension_semantics<parallel>], iteration_bounds = array<i64: 2>, scalar_prefetch = 0 : i64, scratch_operands = 0 : i64, tpu.core_type = #tpu.core_type<tc>, window_params = [{transform_indices = @transform_0, window_bounds = array<i64: 1, 4, 128>}, {pipeline_mode = #tpu.pipeline_mode<synchronous>, transform_indices = @transform_1, window_bounds = array<i64: 1, 128>}, {pipeline_mode = #tpu.pipeline_mode<synchronous>, transform_indices = @transform_2, window_bounds = array<i64: 1, 1>}, {transform_indices = @transform_3, window_bounds = array<i64: 1, 4, 1>}]} {
    %c0 = arith.constant 0 : index
    %c0_0 = arith.constant 0 : index
    %c0_1 = arith.constant 0 : index
    %0 = vector.load %arg1[%c0, %c0_0, %c0_1] : memref<1x4x128xf32, #tpu.memory_space<vmem>>, vector<1x4x128xf32>
    %1 = vector.shape_cast %0 : vector<1x4x128xf32> to vector<4x128xf32>
    %cst = arith.constant dense<0.000000e+00> : vector<128xf32>
    %2 = vector.multi_reduction <add>, %1, %cst [0] : vector<4x128xf32> to vector<128xf32>
    %3 = vector.shape_cast %2 : vector<128xf32> to vector<1x128xf32>
    %cst_2 = arith.constant 4.000000e+00 : f32
    %4 = vector.broadcast %cst_2 : f32 to vector<1x128xf32>
    %5 = arith.divf %3, %4 : vector<1x128xf32>
    %6 = vector.broadcast %5 : vector<1x128xf32> to vector<4x128xf32>
    %7 = arith.subf %1, %6 : vector<4x128xf32>
    %8 = vector.broadcast %5 : vector<1x128xf32> to vector<4x128xf32>
    %9 = arith.subf %1, %8 : vector<4x128xf32>
    %10 = arith.mulf %7, %9 : vector<4x128xf32>
    %cst_3 = arith.constant dense<0.000000e+00> : vector<128xf32>
    %11 = vector.multi_reduction <add>, %10, %cst_3 [0] : vector<4x128xf32> to vector<128xf32>
    %12 = vector.shape_cast %11 : vector<128xf32> to vector<1x128xf32>
    %cst_4 = arith.constant 4.000000e+00 : f32
    %13 = vector.broadcast %cst_4 : f32 to vector<1x128xf32>
    %14 = arith.divf %12, %13 : vector<1x128xf32>
    %15 = vector.broadcast %5 : vector<1x128xf32> to vector<4x128xf32>
    %16 = arith.subf %1, %15 : vector<4x128xf32>
    %cst_5 = arith.constant 9.99999974E-6 : f32
    %17 = vector.broadcast %cst_5 : f32 to vector<1x128xf32>
    %18 = arith.addf %14, %17 : vector<1x128xf32>
    %19 = math.rsqrt %18 : vector<1x128xf32>
    %20 = vector.broadcast %19 : vector<1x128xf32> to vector<4x128xf32>
    %21 = arith.mulf %16, %20 : vector<4x128xf32>
    %cst_6 = arith.constant 0.000000e+00 : f32
    %22 = vector.broadcast %cst_6 : f32 to vector<4x128xf32>
    %23 = arith.cmpf ogt, %21, %22 : vector<4x128xf32>
    %cst_7 = arith.constant 2.000000e-01 : f32
    %24 = vector.broadcast %cst_7 : f32 to vector<4x128xf32>
    %25 = arith.mulf %24, %21 : vector<4x128xf32>
    %26 = arith.select %23, %21, %25 : vector<4x128xi1>, vector<4x128xf32>
    %c0_8 = arith.constant 0 : index
    %c0_9 = arith.constant 0 : index
    %27 = vector.load %arg2[%c0_8, %c0_9] : memref<1x128xf32, #tpu.memory_space<vmem>>, vector<1x128xf32>
    %28 = vector.broadcast %27 : vector<1x128xf32> to vector<4x128xf32>
    %29 = arith.mulf %26, %28 : vector<4x128xf32>
    %cst_10 = arith.constant dense<0.000000e+00> : vector<4xf32>
    %30 = vector.multi_reduction <add>, %29, %cst_10 [1] : vector<4x128xf32> to vector<4xf32>
    %31 = vector.shape_cast %30 : vector<4xf32> to vector<4x1xf32>
    %c0_11 = arith.constant 0 : index
    %c0_12 = arith.constant 0 : index
    %32 = vector.load %arg3[%c0_11, %c0_12] : memref<1x1xf32, #tpu.memory_space<vmem>>, vector<1x1xf32>
    %33 = vector.broadcast %32 : vector<1x1xf32> to vector<4x1xf32>
    %34 = arith.addf %31, %33 : vector<4x1xf32>
    %c0_13 = arith.constant 0 : index
    %c0_14 = arith.constant 0 : index
    %c0_15 = arith.constant 0 : index
    %35 = vector.load %arg4[%c0_13, %c0_14, %c0_15] : memref<1x4x1xf32, #tpu.memory_space<vmem>>, vector<1x4x1xf32>
    %36 = vector.shape_cast %35 : vector<1x4x1xf32> to vector<4x1xf32>
    %37 = vector.shape_cast %34 : vector<4x1xf32> to vector<1x4x1xf32>
    tpu.vector_store %arg4[%c0_13, %c0_14, %c0_15], %37 {strides = array<i32>} : memref<1x4x1xf32, #tpu.memory_space<vmem>>, vector<1x4x1xf32>,
    return
  }
  func.func @transform_0(%arg0: i32) -> (i32, i32, i32) {
    %c0_i32 = arith.constant 0 : i32
    %c0_i32_0 = arith.constant 0 : i32
    %c0_i32_1 = arith.constant 0 : i32
    return %arg0, %c0_i32, %c0_i32_0 : i32, i32, i32
  }
  func.func @transform_1(%arg0: i32) -> (i32, i32) {
    %c0_i32 = arith.constant 0 : i32
    %c0_i32_0 = arith.constant 0 : i32
    %c0_i32_1 = arith.constant 0 : i32
    return %c0_i32, %c0_i32_0 : i32, i32
  }
  func.func @transform_2(%arg0: i32) -> (i32, i32) {
    %c0_i32 = arith.constant 0 : i32
    %c0_i32_0 = arith.constant 0 : i32
    %c0_i32_1 = arith.constant 0 : i32
    return %c0_i32, %c0_i32_0 : i32, i32
  }
  func.func @transform_3(%arg0: i32) -> (i32, i32, i32) {
    %c0_i32 = arith.constant 0 : i32
    %c0_i32_0 = arith.constant 0 : i32
    %c0_i32_1 = arith.constant 0 : i32
    return %arg0, %c0_i32, %c0_i32_0 : i32, i32, i32
  }
}

</mosaic_0001>

<bundles_post_ra>
// kernel: discriminator_forward.6
= control target key start
LH: loop header
LB: loop body
LE: loop exit
PB: predicated region body
PF: predicated region fallthrough
CT: control target
= control target key end

     0   :  { %s1458_s1 = inlined_call_operand.vmem [shape: f32[256,128], index: 1, kind: input, shape index: {}]   ;;  %s1459_s0 = inlined_call_operand.vmem [shape: f32[512,256], index: 0, kind: input, shape index: {}]   ;;  %s1460_s2 = inlined_call_operand.vmem [shape: f32[1,128], index: 2, kind: input, shape index: {}]   ;;  %s1461_s3 = inlined_call_operand.vmem [shape: f32[512,128], index: 3, kind: output, shape index: {}]  }
   0x1   :  { %v157_v0 = vld [vmem:[%s1458_s1 + $0x78] sm:$0xff]  ;;  %v156_v1 = vld [vmem:[%s1458_s1 + $0x70] sm:$0xff]  ;;  %v155_v4 = vld [vmem:[%s1458_s1 + $0x68] sm:$0xff] }
   0x2   :  { %v173_v2 = vld [vmem:[%s1458_s1 + $0xf8] sm:$0xff]  ;;  %664 = vmatpush.msra.mxu2 %v157_v0  ;;  %v172_v3 = vld [vmem:[%s1458_s1 + $0xf0] sm:$0xff]  ;;  %178 = vmatpush.msra.mxu0 %v157_v0  ;;  %v171_v5 = vld [vmem:[%s1458_s1 + $0xe8] sm:$0xff] }
   0x3   :  { %680 = vmatpush.msra.mxu3 %v173_v2  ;;  %387 = vmatpush.msra.mxu1 %v173_v2  ;;  %v154_v6 = vld [vmem:[%s1458_s1 + $0x60] sm:$0xff]  ;;  %v153_v8 = vld [vmem:[%s1458_s1 + $0x58] sm:$0xff]  ;;  %v152_v10 = vld [vmem:[%s1458_s1 + $0x50] sm:$0xff] }
   0x4   :  { %665 = vmatpush.msra.mxu2 %v156_v1  ;;  %179 = vmatpush.msra.mxu0 %v156_v1  ;;  %v170_v7 = vld [vmem:[%s1458_s1 + $0xe0] sm:$0xff]  ;;  %v169_v9 = vld [vmem:[%s1458_s1 + $0xd8] sm:$0xff]  ;;  %v168_v11 = vld [vmem:[%s1458_s1 + $0xd0] sm:$0xff] }
   0x5   :  { %681 = vmatpush.msra.mxu3 %v172_v3  ;;  %388 = vmatpush.msra.mxu1 %v172_v3  ;;  %v151_v12 = vld [vmem:[%s1458_s1 + $0x48] sm:$0xff]  ;;  %v150_v14 = vld [vmem:[%s1458_s1 + $0x40] sm:$0xff]  ;;  %v149_v16 = vld [vmem:[%s1458_s1 + $0x38] sm:$0xff] }
   0x6   :  { %666 = vmatpush.msra.mxu2 %v155_v4  ;;  %180 = vmatpush.msra.mxu0 %v155_v4  ;;  %v167_v13 = vld [vmem:[%s1458_s1 + $0xc8] sm:$0xff]  ;;  %v166_v15 = vld [vmem:[%s1458_s1 + $0xc0] sm:$0xff]  ;;  %v165_v17 = vld [vmem:[%s1458_s1 + $0xb8] sm:$0xff] }
   0x7   :  { %682 = vmatpush.msra.mxu3 %v171_v5  ;;  %389 = vmatpush.msra.mxu1 %v171_v5  ;;  %v148_v18 = vld [vmem:[%s1458_s1 + $0x30] sm:$0xff]  ;;  %v147_v20 = vld [vmem:[%s1458_s1 + $0x28] sm:$0xff]  ;;  %v146_v22 = vld [vmem:[%s1458_s1 + $0x20] sm:$0xff] }
   0x8   :  { %667 = vmatpush.msra.mxu2 %v154_v6  ;;  %181 = vmatpush.msra.mxu0 %v154_v6  ;;  %v164_v19 = vld [vmem:[%s1458_s1 + $0xb0] sm:$0xff]  ;;  %v163_v21 = vld [vmem:[%s1458_s1 + $0xa8] sm:$0xff]  ;;  %v162_v23 = vld [vmem:[%s1458_s1 + $0xa0] sm:$0xff] }
   0x9   :  { %683 = vmatpush.msra.mxu3 %v170_v7  ;;  %390 = vmatpush.msra.mxu1 %v170_v7  ;;  %v145_v24 = vld [vmem:[%s1458_s1 + $0x18] sm:$0xff]  ;;  %v144_v26 = vld [vmem:[%s1458_s1 + $0x10] sm:$0xff]  ;;  %v143_v28 = vld [vmem:[%s1458_s1 + $0x8] sm:$0xff] }
   0xa   :  { %668 = vmatpush.msra.mxu2 %v153_v8  ;;  %182 = vmatpush.msra.mxu0 %v153_v8  ;;  %v161_v25 = vld [vmem:[%s1458_s1 + $0x98] sm:$0xff]  ;;  %v160_v27 = vld [vmem:[%s1458_s1 + $0x90] sm:$0xff]  ;;  %v159_v29 = vld [vmem:[%s1458_s1 + $0x88] sm:$0xff] }
   0xb   :  { %684 = vmatpush.msra.mxu3 %v169_v9  ;;  %391 = vmatpush.msra.mxu1 %v169_v9  ;;  %v142_v30 = vld [vmem:[%s1458_s1] sm:$0xff]  ;;  %v79_v33 = vld [vmem:[%s1459_s0 + $0x208] sm:$0xff]  ;;  %v80_v36 = vld [vmem:[%s1459_s0 + $0x210] sm:$0xff] }
   0xc   :  { %669 = vmatpush.msra.mxu2 %v152_v10  ;;  %183 = vmatpush.msra.mxu0 %v152_v10  ;;  %v158_v31 = vld [vmem:[%s1458_s1 + $0x80] sm:$0xff]  ;;  %v15_v35 = vld [vmem:[%s1459_s0 + $0x8] sm:$0xff]  ;;  %v81_v37 = vld [vmem:[%s1459_s0 + $0x218] sm:$0xff] }
   0xd   :  { %685 = vmatpush.msra.mxu3 %v168_v11  ;;  %392 = vmatpush.msra.mxu1 %v168_v11  ;;  %v78_v32 = vld [vmem:[%s1459_s0 + $0x200] sm:$0xff]  ;;  %v16_v38 = vld [vmem:[%s1459_s0 + $0x10] sm:$0xff]  ;;  %v17_v39 = vld [vmem:[%s1459_s0 + $0x18] sm:$0xff] }
   0xe   :  { %670 = vmatpush.msra.mxu2 %v151_v12  ;;  %184 = vmatpush.msra.mxu0 %v151_v12  ;;  %v14_v34 = vld [vmem:[%s1459_s0] sm:$0xff]  ;;  %v83_v41 = vld [vmem:[%s1459_s0 + $0x228] sm:$0xff]  ;;  %v84_v44 = vld [vmem:[%s1459_s0 + $0x230] sm:$0xff] }
   0xf   :  { %686 = vmatpush.msra.mxu3 %v167_v13  ;;  %393 = vmatpush.msra.mxu1 %v167_v13  ;;  %v82_v40 = vld [vmem:[%s1459_s0 + $0x220] sm:$0xff]  ;;  %v19_v43 = vld [vmem:[%s1459_s0 + $0x28] sm:$0xff]  ;;  %v85_v45 = vld [vmem:[%s1459_s0 + $0x238] sm:$0xff] }
  0x10   :  { %671 = vmatpush.msra.mxu2 %v150_v14  ;;  %185 = vmatpush.msra.mxu0 %v150_v14  ;;  %v18_v42 = vld [vmem:[%s1459_s0 + $0x20] sm:$0xff]  ;;  %v20_v46 = vld [vmem:[%s1459_s0 + $0x30] sm:$0xff]  ;;  %v21_v47 = vld [vmem:[%s1459_s0 + $0x38] sm:$0xff] }
  0x11   :  { %687 = vmatpush.msra.mxu3 %v166_v15  ;;  %394 = vmatpush.msra.mxu1 %v166_v15  ;;  %v86_v48 = vld [vmem:[%s1459_s0 + $0x240] sm:$0xff]  ;;  %v87_v49 = vld [vmem:[%s1459_s0 + $0x248] sm:$0xff]  ;;  %v88_v52 = vld [vmem:[%s1459_s0 + $0x250] sm:$0xff] }
  0x12   :  { %672 = vmatpush.msra.mxu2 %v149_v16  ;;  %186 = vmatpush.msra.mxu0 %v149_v16  ;;  %v22_v50 = vld [vmem:[%s1459_s0 + $0x40] sm:$0xff]  ;;  %v23_v51 = vld [vmem:[%s1459_s0 + $0x48] sm:$0xff]  ;;  %v89_v53 = vld [vmem:[%s1459_s0 + $0x258] sm:$0xff] }
  0x13   :  { %688 = vmatpush.msra.mxu3 %v165_v17  ;;  %395 = vmatpush.msra.mxu1 %v165_v17  ;;  %v24_v54 = vld [vmem:[%s1459_s0 + $0x50] sm:$0xff]  ;;  %v25_v55 = vld [vmem:[%s1459_s0 + $0x58] sm:$0xff]  ;;  %v90_v56 = vld [vmem:[%s1459_s0 + $0x260] sm:$0xff] }
  0x14   :  { %673 = vmatpush.msra.mxu2 %v148_v18  ;;  %187 = vmatpush.msra.mxu0 %v148_v18  ;;  %v91_v57 = vld [vmem:[%s1459_s0 + $0x268] sm:$0xff]  ;;  %v26_v58 = vld [vmem:[%s1459_s0 + $0x60] sm:$0xff]  ;;  %v92_v60 = vld [vmem:[%s1459_s0 + $0x270] sm:$0xff] }
  0x15   :  { %689 = vmatpush.msra.mxu3 %v164_v19  ;;  %396 = vmatpush.msra.mxu1 %v164_v19  ;;  %v27_v59 = vld [vmem:[%s1459_s0 + $0x68] sm:$0xff]  ;;  %v93_v61 = vld [vmem:[%s1459_s0 + $0x278] sm:$0xff]  ;;  %v28_v62 = vld [vmem:[%s1459_s0 + $0x70] sm:$0xff] }
  0x16   :  { %674 = vmatpush.msra.mxu2 %v147_v20  ;;  %188 = vmatpush.msra.mxu0 %v147_v20  ;;  %v29_v63 = vld [vmem:[%s1459_s0 + $0x78] sm:$0xff]  ;;  %v94_v0 = vld [vmem:[%s1459_s0 + $0x280] sm:$0xff]  ;;  %v95_v1 = vld [vmem:[%s1459_s0 + $0x288] sm:$0xff] }
  0x17   :  { %690 = vmatpush.msra.mxu3 %v163_v21  ;;  %397 = vmatpush.msra.mxu1 %v163_v21  ;;  %v30_v2 = vld [vmem:[%s1459_s0 + $0x80] sm:$0xff]  ;;  %v31_v3 = vld [vmem:[%s1459_s0 + $0x88] sm:$0xff]  ;;  %v96_v4 = vld [vmem:[%s1459_s0 + $0x290] sm:$0xff] }
  0x18   :  { %675 = vmatpush.msra.mxu2 %v146_v22  ;;  %189 = vmatpush.msra.mxu0 %v146_v22  ;;  %v97_v5 = vld [vmem:[%s1459_s0 + $0x298] sm:$0xff]  ;;  %v32_v6 = vld [vmem:[%s1459_s0 + $0x90] sm:$0xff]  ;;  %v98_v8 = vld [vmem:[%s1459_s0 + $0x2a0] sm:$0xff] }
  0x19   :  { %691 = vmatpush.msra.mxu3 %v162_v23  ;;  %398 = vmatpush.msra.mxu1 %v162_v23  ;;  %v33_v7 = vld [vmem:[%s1459_s0 + $0x98] sm:$0xff]  ;;  %v99_v9 = vld [vmem:[%s1459_s0 + $0x2a8] sm:$0xff]  ;;  %v34_v10 = vld [vmem:[%s1459_s0 + $0xa0] sm:$0xff] }
  0x1a   :  { %676 = vmatpush.msra.mxu2 %v145_v24  ;;  %190 = vmatpush.msra.mxu0 %v145_v24  ;;  %v35_v11 = vld [vmem:[%s1459_s0 + $0xa8] sm:$0xff]  ;;  %v100_v12 = vld [vmem:[%s1459_s0 + $0x2b0] sm:$0xff]  ;;  %v101_v13 = vld [vmem:[%s1459_s0 + $0x2b8] sm:$0xff] }
  0x1b   :  { %692 = vmatpush.msra.mxu3 %v161_v25  ;;  %399 = vmatpush.msra.mxu1 %v161_v25  ;;  %v36_v14 = vld [vmem:[%s1459_s0 + $0xb0] sm:$0xff]  ;;  %v37_v15 = vld [vmem:[%s1459_s0 + $0xb8] sm:$0xff]  ;;  %v102_v16 = vld [vmem:[%s1459_s0 + $0x2c0] sm:$0xff] }
  0x1c   :  { %677 = vmatpush.msra.mxu2 %v144_v26  ;;  %191 = vmatpush.msra.mxu0 %v144_v26  ;;  %v103_v17 = vld [vmem:[%s1459_s0 + $0x2c8] sm:$0xff]  ;;  %v38_v18 = vld [vmem:[%s1459_s0 + $0xc0] sm:$0xff]  ;;  %v104_v20 = vld [vmem:[%s1459_s0 + $0x2d0] sm:$0xff] }
  0x1d   :  { %693 = vmatpush.msra.mxu3 %v160_v27  ;;  %400 = vmatpush.msra.mxu1 %v160_v27  ;;  %v39_v19 = vld [vmem:[%s1459_s0 + $0xc8] sm:$0xff]  ;;  %v105_v21 = vld [vmem:[%s1459_s0 + $0x2d8] sm:$0xff]  ;;  %v40_v22 = vld [vmem:[%s1459_s0 + $0xd0] sm:$0xff] }
  0x1e   :  { %678 = vmatpush.msra.mxu2 %v143_v28  ;;  %192 = vmatpush.msra.mxu0 %v143_v28  ;;  %v41_v23 = vld [vmem:[%s1459_s0 + $0xd8] sm:$0xff]  ;;  %v106_v24 = vld [vmem:[%s1459_s0 + $0x2e0] sm:$0xff]  ;;  %v107_v25 = vld [vmem:[%s1459_s0 + $0x2e8] sm:$0xff] }
  0x1f   :  { %694 = vmatpush.msra.mxu3 %v159_v29  ;;  %401 = vmatpush.msra.mxu1 %v159_v29  ;;  %v42_v26 = vld [vmem:[%s1459_s0 + $0xe0] sm:$0xff]  ;;  %v43_v27 = vld [vmem:[%s1459_s0 + $0xe8] sm:$0xff]  ;;  %v108_v28 = vld [vmem:[%s1459_s0 + $0x2f0] sm:$0xff] }
  0x20   :  { %679 = vmatpush.msra.mxu2 %v142_v30  ;;  %193 = vmatpush.msra.mxu0 %v142_v30  ;;  %v109_v29 = vld [vmem:[%s1459_s0 + $0x2f8] sm:$0xff]  ;;  %v44_v30 = vld [vmem:[%s1459_s0 + $0xf0] sm:$0xff] }
  0x21   :  { %695 = vmatpush.msra.mxu3 %v158_v31  ;;  %290 = vmatmul.f32.vlgmr.msra.gmra.mxu2 %v78_v32  ;;  %v1008_v32 = vld [vmem:[%s1460_s2] ss:$0 sm:$0xff] }
  0x22   :  { %499 = vmatmul.f32.vlgmr.msra.gmra.mxu3 %v79_v33  ;;  %402 = vmatpush.msra.mxu1 %v158_v31  ;;  %v45_v31 = vld [vmem:[%s1459_s0 + $0xf8] sm:$0xff]  ;;  %v110_v33 = vld [vmem:[%s1459_s0 + $0x300] sm:$0xff] }
  0x23   :  { %194 = vmatmul.f32.vlgmr.msra.gmra.mxu0 %v14_v34  ;;  %403 = vmatmul.f32.vlgmr.msra.gmra.mxu1 %v15_v35  ;;  %v111_v34 = vld [vmem:[%s1459_s0 + $0x308] sm:$0xff] }
  0x29   :  { %293 = vmatmul.f32.gmra.mxu2 %v80_v36 }
  0x2a   :  { %502 = vmatmul.f32.gmra.mxu3 %v81_v37  ;;  %v46_v37 = vld [vmem:[%s1459_s0 + $0x100] sm:$0xff] }
  0x2b   :  { %197 = vmatmul.f32.gmra.mxu0 %v16_v38  ;;  %406 = vmatmul.f32.gmra.mxu1 %v17_v39  ;;  %v47_v38 = vld [vmem:[%s1459_s0 + $0x108] sm:$0xff] }
  0x31   :  { %296 = vmatmul.f32.gmra.mxu2 %v82_v40 }
  0x32   :  { %505 = vmatmul.f32.gmra.mxu3 %v83_v41 }
  0x33   :  { %200 = vmatmul.f32.gmra.mxu0 %v18_v42  ;;  %409 = vmatmul.f32.gmra.mxu1 %v19_v43 }
  0x39   :  { %299 = vmatmul.f32.gmra.mxu2 %v84_v44  ;;  %v112_v44 = vld [vmem:[%s1459_s0 + $0x310] sm:$0xff] }
  0x3a   :  { %508 = vmatmul.f32.gmra.mxu3 %v85_v45  ;;  %v113_v45 = vld [vmem:[%s1459_s0 + $0x318] sm:$0xff] }
  0x3b   :  { %203 = vmatmul.f32.gmra.mxu0 %v20_v46  ;;  %412 = vmatmul.f32.gmra.mxu1 %v21_v47 }
  0x41   :  { %302 = vmatmul.f32.gmra.mxu2 %v86_v48 }
  0x42   :  { %511 = vmatmul.f32.gmra.mxu3 %v87_v49  ;;  %v48_v49 = vld [vmem:[%s1459_s0 + $0x110] sm:$0xff] }
  0x43   :  { %206 = vmatmul.f32.gmra.mxu0 %v22_v50  ;;  %415 = vmatmul.f32.gmra.mxu1 %v23_v51  ;;  %v49_v50 = vld [vmem:[%s1459_s0 + $0x118] sm:$0xff] }
  0x49   :  { %305 = vmatmul.f32.gmra.mxu2 %v88_v52 }
  0x4a   :  { %514 = vmatmul.f32.gmra.mxu3 %v89_v53 }
  0x4b   :  { %209 = vmatmul.f32.gmra.mxu0 %v24_v54  ;;  %418 = vmatmul.f32.gmra.mxu1 %v25_v55 }
  0x51   :  { %308 = vmatmul.f32.gmra.mxu2 %v90_v56  ;;  %v114_v56 = vld [vmem:[%s1459_s0 + $0x320] sm:$0xff] }
  0x52   :  { %517 = vmatmul.f32.gmra.mxu3 %v91_v57  ;;  %v115_v57 = vld [vmem:[%s1459_s0 + $0x328] sm:$0xff] }
  0x53   :  { %212 = vmatmul.f32.gmra.mxu0 %v26_v58  ;;  %421 = vmatmul.f32.gmra.mxu1 %v27_v59 }
  0x59   :  { %311 = vmatmul.f32.gmra.mxu2 %v92_v60 }
  0x5a   :  { %520 = vmatmul.f32.gmra.mxu3 %v93_v61  ;;  %v50_v61 = vld [vmem:[%s1459_s0 + $0x120] sm:$0xff] }
  0x5b   :  { %215 = vmatmul.f32.gmra.mxu0 %v28_v62  ;;  %424 = vmatmul.f32.gmra.mxu1 %v29_v63  ;;  %v51_v62 = vld [vmem:[%s1459_s0 + $0x128] sm:$0xff] }
  0x61   :  { %314 = vmatmul.f32.gmra.mxu2 %v94_v0 }
  0x62   :  { %523 = vmatmul.f32.gmra.mxu3 %v95_v1 }
  0x63   :  { %218 = vmatmul.f32.gmra.mxu0 %v30_v2  ;;  %427 = vmatmul.f32.gmra.mxu1 %v31_v3 }
  0x69   :  { %317 = vmatmul.f32.gmra.mxu2 %v96_v4  ;;  %v116_v4 = vld [vmem:[%s1459_s0 + $0x330] sm:$0xff] }
  0x6a   :  { %526 = vmatmul.f32.gmra.mxu3 %v97_v5  ;;  %v117_v5 = vld [vmem:[%s1459_s0 + $0x338] sm:$0xff] }
  0x6b   :  { %221 = vmatmul.f32.gmra.mxu0 %v32_v6  ;;  %430 = vmatmul.f32.gmra.mxu1 %v33_v7 }
  0x71   :  { %320 = vmatmul.f32.gmra.mxu2 %v98_v8 }
  0x72   :  { %529 = vmatmul.f32.gmra.mxu3 %v99_v9  ;;  %v52_v9 = vld [vmem:[%s1459_s0 + $0x130] sm:$0xff] }
  0x73   :  { %224 = vmatmul.f32.gmra.mxu0 %v34_v10  ;;  %433 = vmatmul.f32.gmra.mxu1 %v35_v11  ;;  %v53_v10 = vld [vmem:[%s1459_s0 + $0x138] sm:$0xff] }
  0x79   :  { %323 = vmatmul.f32.gmra.mxu2 %v100_v12 }
  0x7a   :  { %532 = vmatmul.f32.gmra.mxu3 %v101_v13 }
  0x7b   :  { %227 = vmatmul.f32.gmra.mxu0 %v36_v14  ;;  %436 = vmatmul.f32.gmra.mxu1 %v37_v15 }
  0x81   :  { %326 = vmatmul.f32.gmra.mxu2 %v102_v16  ;;  %v118_v16 = vld [vmem:[%s1459_s0 + $0x340] sm:$0xff] }
  0x82   :  { %535 = vmatmul.f32.gmra.mxu3 %v103_v17  ;;  %v119_v17 = vld [vmem:[%s1459_s0 + $0x348] sm:$0xff] }
  0x83   :  { %230 = vmatmul.f32.gmra.mxu0 %v38_v18  ;;  %439 = vmatmul.f32.gmra.mxu1 %v39_v19 }
  0x89   :  { %329 = vmatmul.f32.gmra.mxu2 %v104_v20 }
  0x8a   :  { %538 = vmatmul.f32.gmra.mxu3 %v105_v21  ;;  %v54_v21 = vld [vmem:[%s1459_s0 + $0x140] sm:$0xff] }
  0x8b   :  { %233 = vmatmul.f32.gmra.mxu0 %v40_v22  ;;  %442 = vmatmul.f32.gmra.mxu1 %v41_v23  ;;  %v55_v22 = vld [vmem:[%s1459_s0 + $0x148] sm:$0xff] }
  0x91   :  { %332 = vmatmul.f32.gmra.mxu2 %v106_v24 }
  0x92   :  { %541 = vmatmul.f32.gmra.mxu3 %v107_v25 }
  0x93   :  { %236 = vmatmul.f32.gmra.mxu0 %v42_v26  ;;  %445 = vmatmul.f32.gmra.mxu1 %v43_v27 }
  0x99   :  { %335 = vmatmul.f32.gmra.mxu2 %v108_v28  ;;  %v120_v28 = vld [vmem:[%s1459_s0 + $0x350] sm:$0xff] }
  0x9a   :  { %544 = vmatmul.f32.gmra.mxu3 %v109_v29  ;;  %v121_v29 = vld [vmem:[%s1459_s0 + $0x358] sm:$0xff] }
  0x9b   :  { %239 = vmatmul.f32.gmra.mxu0 %v44_v30  ;;  %448 = vmatmul.f32.gmra.mxu1 %v45_v31 }
  0xa0   :  { %v195_v35 = vpop.f32.mrf.mxu0  ;;  %v404_v36 = vpop.f32.mrf.mxu1 }
  0xa1   :  { %338 = vmatmul.f32.gmra.mxu2 %v110_v33  ;;  %v196_v39 = vadd.f32 %v1008_v32, %v195_v35  ;;  %v57_v35 = vld [vmem:[%s1459_s0 + $0x158] sm:$0xff] }
  0xa2   :  { %547 = vmatmul.f32.gmra.mxu3 %v111_v34  ;;  %v56_v34 = vld [vmem:[%s1459_s0 + $0x150] sm:$0xff] }
  0xa3   :  { %v405_v40 = vadd.f32 %v404_v36, %v196_v39  ;;  %242 = vmatmul.f32.gmra.mxu0 %v46_v37  ;;  %451 = vmatmul.f32.gmra.mxu1 %v47_v38 }
  0xa4   :  { %v291_v41 = vpop.f32.mrf.mxu2 }
  0xa5   :  { %v500_v42 = vpop.f32.mrf.mxu3  ;;  %v292_v43 = vadd.f32 %v1008_v32, %v291_v41  ;;  %596 = vst [vmem:[%s1461_s3] sm:$0xff] %v405_v40  ;;  %v122_v41 = vld [vmem:[%s1459_s0 + $0x360] sm:$0xff] }
  0xa7   :  { %v501_v46 = vadd.f32 %v500_v42, %v292_v43  ;;  %v123_v42 = vld [vmem:[%s1459_s0 + $0x368] sm:$0xff] }
  0xa8   :  { %v198_v47 = vpop.f32.mrf.mxu0  ;;  %v407_v48 = vpop.f32.mrf.mxu1 }
  0xa9   :  { %628 = vst [vmem:[%s1461_s3 + $0x100] sm:$0xff] %v501_v46  ;;  %341 = vmatmul.f32.gmra.mxu2 %v112_v44  ;;  %v199_v51 = vadd.f32 %v1008_v32, %v198_v47  ;;  %v58_v46 = vld [vmem:[%s1459_s0 + $0x160] sm:$0xff]  ;;  %v59_v47 = vld [vmem:[%s1459_s0 + $0x168] sm:$0xff] }
  0xaa   :  { %550 = vmatmul.f32.gmra.mxu3 %v113_v45 }
  0xab   :  { %v408_v52 = vadd.f32 %v407_v48, %v199_v51  ;;  %245 = vmatmul.f32.gmra.mxu0 %v48_v49  ;;  %454 = vmatmul.f32.gmra.mxu1 %v49_v50 }
  0xac   :  { %v294_v53 = vpop.f32.mrf.mxu2 }
  0xad   :  { %v503_v54 = vpop.f32.mrf.mxu3  ;;  %v295_v55 = vadd.f32 %v1008_v32, %v294_v53  ;;  %597 = vst [vmem:[%s1461_s3 + $0x8] sm:$0xff] %v408_v52  ;;  %v124_v53 = vld [vmem:[%s1459_s0 + $0x370] sm:$0xff] }
  0xaf   :  { %v504_v58 = vadd.f32 %v503_v54, %v295_v55  ;;  %v125_v54 = vld [vmem:[%s1459_s0 + $0x378] sm:$0xff] }
  0xb0   :  { %v201_v59 = vpop.f32.mrf.mxu0  ;;  %v410_v60 = vpop.f32.mrf.mxu1 }
  0xb1   :  { %629 = vst [vmem:[%s1461_s3 + $0x108] sm:$0xff] %v504_v58  ;;  %344 = vmatmul.f32.gmra.mxu2 %v114_v56  ;;  %v202_v63 = vadd.f32 %v1008_v32, %v201_v59  ;;  %v60_v58 = vld [vmem:[%s1459_s0 + $0x170] sm:$0xff]  ;;  %v61_v59 = vld [vmem:[%s1459_s0 + $0x178] sm:$0xff] }
  0xb2   :  { %553 = vmatmul.f32.gmra.mxu3 %v115_v57 }
  0xb3   :  { %v411_v0 = vadd.f32 %v410_v60, %v202_v63  ;;  %248 = vmatmul.f32.gmra.mxu0 %v50_v61  ;;  %457 = vmatmul.f32.gmra.mxu1 %v51_v62 }
  0xb4   :  { %v297_v1 = vpop.f32.mrf.mxu2 }
  0xb5   :  { %v506_v2 = vpop.f32.mrf.mxu3  ;;  %v298_v3 = vadd.f32 %v1008_v32, %v297_v1  ;;  %598 = vst [vmem:[%s1461_s3 + $0x10] sm:$0xff] %v411_v0  ;;  %v126_v1 = vld [vmem:[%s1459_s0 + $0x380] sm:$0xff] }
  0xb7   :  { %v507_v6 = vadd.f32 %v506_v2, %v298_v3  ;;  %v127_v2 = vld [vmem:[%s1459_s0 + $0x388] sm:$0xff] }
  0xb8   :  { %v204_v7 = vpop.f32.mrf.mxu0  ;;  %v413_v8 = vpop.f32.mrf.mxu1 }
  0xb9   :  { %630 = vst [vmem:[%s1461_s3 + $0x110] sm:$0xff] %v507_v6  ;;  %347 = vmatmul.f32.gmra.mxu2 %v116_v4  ;;  %v205_v11 = vadd.f32 %v1008_v32, %v204_v7  ;;  %v62_v6 = vld [vmem:[%s1459_s0 + $0x180] sm:$0xff]  ;;  %v63_v7 = vld [vmem:[%s1459_s0 + $0x188] sm:$0xff] }
  0xba   :  { %556 = vmatmul.f32.gmra.mxu3 %v117_v5 }
  0xbb   :  { %v414_v12 = vadd.f32 %v413_v8, %v205_v11  ;;  %251 = vmatmul.f32.gmra.mxu0 %v52_v9  ;;  %460 = vmatmul.f32.gmra.mxu1 %v53_v10 }
  0xbc   :  { %v300_v13 = vpop.f32.mrf.mxu2 }
  0xbd   :  { %v509_v14 = vpop.f32.mrf.mxu3  ;;  %v301_v15 = vadd.f32 %v1008_v32, %v300_v13  ;;  %599 = vst [vmem:[%s1461_s3 + $0x18] sm:$0xff] %v414_v12  ;;  %v128_v13 = vld [vmem:[%s1459_s0 + $0x390] sm:$0xff] }
  0xbf   :  { %v510_v18 = vadd.f32 %v509_v14, %v301_v15  ;;  %v129_v14 = vld [vmem:[%s1459_s0 + $0x398] sm:$0xff] }
  0xc0   :  { %v207_v19 = vpop.f32.mrf.mxu0  ;;  %v416_v20 = vpop.f32.mrf.mxu1 }
  0xc1   :  { %631 = vst [vmem:[%s1461_s3 + $0x118] sm:$0xff] %v510_v18  ;;  %350 = vmatmul.f32.gmra.mxu2 %v118_v16  ;;  %v208_v23 = vadd.f32 %v1008_v32, %v207_v19  ;;  %v64_v18 = vld [vmem:[%s1459_s0 + $0x190] sm:$0xff]  ;;  %v65_v19 = vld [vmem:[%s1459_s0 + $0x198] sm:$0xff] }
  0xc2   :  { %559 = vmatmul.f32.gmra.mxu3 %v119_v17 }
  0xc3   :  { %v417_v24 = vadd.f32 %v416_v20, %v208_v23  ;;  %254 = vmatmul.f32.gmra.mxu0 %v54_v21  ;;  %463 = vmatmul.f32.gmra.mxu1 %v55_v22 }
  0xc4   :  { %v303_v25 = vpop.f32.mrf.mxu2 }
  0xc5   :  { %v512_v26 = vpop.f32.mrf.mxu3  ;;  %v304_v27 = vadd.f32 %v1008_v32, %v303_v25  ;;  %600 = vst [vmem:[%s1461_s3 + $0x20] sm:$0xff] %v417_v24  ;;  %v130_v25 = vld [vmem:[%s1459_s0 + $0x3a0] sm:$0xff] }
  0xc7   :  { %v513_v30 = vadd.f32 %v512_v26, %v304_v27  ;;  %v131_v26 = vld [vmem:[%s1459_s0 + $0x3a8] sm:$0xff] }
  0xc8   :  { %v210_v31 = vpop.f32.mrf.mxu0  ;;  %v419_v33 = vpop.f32.mrf.mxu1 }
  0xc9   :  { %632 = vst [vmem:[%s1461_s3 + $0x120] sm:$0xff] %v513_v30  ;;  %353 = vmatmul.f32.gmra.mxu2 %v120_v28  ;;  %v211_v36 = vadd.f32 %v1008_v32, %v210_v31  ;;  %v66_v30 = vld [vmem:[%s1459_s0 + $0x1a0] sm:$0xff]  ;;  %v67_v31 = vld [vmem:[%s1459_s0 + $0x1a8] sm:$0xff] }
  0xca   :  { %562 = vmatmul.f32.gmra.mxu3 %v121_v29 }
  0xcb   :  { %v420_v37 = vadd.f32 %v419_v33, %v211_v36  ;;  %257 = vmatmul.f32.gmra.mxu0 %v56_v34  ;;  %466 = vmatmul.f32.gmra.mxu1 %v57_v35 }
  0xcc   :  { %v306_v38 = vpop.f32.mrf.mxu2 }
  0xcd   :  { %v515_v39 = vpop.f32.mrf.mxu3  ;;  %v307_v40 = vadd.f32 %v1008_v32, %v306_v38  ;;  %601 = vst [vmem:[%s1461_s3 + $0x28] sm:$0xff] %v420_v37  ;;  %v132_v38 = vld [vmem:[%s1459_s0 + $0x3b0] sm:$0xff] }
  0xcf   :  { %v516_v43 = vadd.f32 %v515_v39, %v307_v40  ;;  %v133_v39 = vld [vmem:[%s1459_s0 + $0x3b8] sm:$0xff] }
  0xd0   :  { %v213_v44 = vpop.f32.mrf.mxu0  ;;  %v422_v45 = vpop.f32.mrf.mxu1 }
  0xd1   :  { %633 = vst [vmem:[%s1461_s3 + $0x128] sm:$0xff] %v516_v43  ;;  %356 = vmatmul.f32.gmra.mxu2 %v122_v41  ;;  %v214_v48 = vadd.f32 %v1008_v32, %v213_v44  ;;  %v68_v43 = vld [vmem:[%s1459_s0 + $0x1b0] sm:$0xff]  ;;  %v69_v44 = vld [vmem:[%s1459_s0 + $0x1b8] sm:$0xff] }
  0xd2   :  { %565 = vmatmul.f32.gmra.mxu3 %v123_v42 }
  0xd3   :  { %v423_v49 = vadd.f32 %v422_v45, %v214_v48  ;;  %260 = vmatmul.f32.gmra.mxu0 %v58_v46  ;;  %469 = vmatmul.f32.gmra.mxu1 %v59_v47 }
  0xd4   :  { %v309_v50 = vpop.f32.mrf.mxu2 }
  0xd5   :  { %v518_v51 = vpop.f32.mrf.mxu3  ;;  %v310_v52 = vadd.f32 %v1008_v32, %v309_v50  ;;  %602 = vst [vmem:[%s1461_s3 + $0x30] sm:$0xff] %v423_v49  ;;  %v134_v50 = vld [vmem:[%s1459_s0 + $0x3c0] sm:$0xff] }
  0xd7   :  { %v519_v55 = vadd.f32 %v518_v51, %v310_v52  ;;  %v135_v51 = vld [vmem:[%s1459_s0 + $0x3c8] sm:$0xff] }
  0xd8   :  { %v216_v56 = vpop.f32.mrf.mxu0  ;;  %v425_v57 = vpop.f32.mrf.mxu1 }
  0xd9   :  { %634 = vst [vmem:[%s1461_s3 + $0x130] sm:$0xff] %v519_v55  ;;  %359 = vmatmul.f32.gmra.mxu2 %v124_v53  ;;  %v217_v60 = vadd.f32 %v1008_v32, %v216_v56  ;;  %v70_v55 = vld [vmem:[%s1459_s0 + $0x1c0] sm:$0xff]  ;;  %v71_v56 = vld [vmem:[%s1459_s0 + $0x1c8] sm:$0xff] }
  0xda   :  { %568 = vmatmul.f32.gmra.mxu3 %v125_v54 }
  0xdb   :  { %v426_v61 = vadd.f32 %v425_v57, %v217_v60  ;;  %263 = vmatmul.f32.gmra.mxu0 %v60_v58  ;;  %472 = vmatmul.f32.gmra.mxu1 %v61_v59 }
  0xdc   :  { %v312_v62 = vpop.f32.mrf.mxu2 }
  0xdd   :  { %v521_v63 = vpop.f32.mrf.mxu3  ;;  %v313_v0 = vadd.f32 %v1008_v32, %v312_v62  ;;  %603 = vst [vmem:[%s1461_s3 + $0x38] sm:$0xff] %v426_v61  ;;  %v136_v62 = vld [vmem:[%s1459_s0 + $0x3d0] sm:$0xff] }
  0xdf   :  { %v522_v3 = vadd.f32 %v521_v63, %v313_v0  ;;  %v137_v63 = vld [vmem:[%s1459_s0 + $0x3d8] sm:$0xff] }
  0xe0   :  { %v219_v4 = vpop.f32.mrf.mxu0  ;;  %v428_v5 = vpop.f32.mrf.mxu1 }
  0xe1   :  { %635 = vst [vmem:[%s1461_s3 + $0x138] sm:$0xff] %v522_v3  ;;  %362 = vmatmul.f32.gmra.mxu2 %v126_v1  ;;  %v220_v8 = vadd.f32 %v1008_v32, %v219_v4  ;;  %v72_v3 = vld [vmem:[%s1459_s0 + $0x1d0] sm:$0xff]  ;;  %v73_v4 = vld [vmem:[%s1459_s0 + $0x1d8] sm:$0xff] }
  0xe2   :  { %571 = vmatmul.f32.gmra.mxu3 %v127_v2 }
  0xe3   :  { %v429_v9 = vadd.f32 %v428_v5, %v220_v8  ;;  %266 = vmatmul.f32.gmra.mxu0 %v62_v6  ;;  %475 = vmatmul.f32.gmra.mxu1 %v63_v7 }
  0xe4   :  { %v315_v10 = vpop.f32.mrf.mxu2 }
  0xe5   :  { %v524_v11 = vpop.f32.mrf.mxu3  ;;  %v316_v12 = vadd.f32 %v1008_v32, %v315_v10  ;;  %604 = vst [vmem:[%s1461_s3 + $0x40] sm:$0xff] %v429_v9  ;;  %v138_v10 = vld [vmem:[%s1459_s0 + $0x3e0] sm:$0xff] }
  0xe7   :  { %v525_v15 = vadd.f32 %v524_v11, %v316_v12  ;;  %v139_v11 = vld [vmem:[%s1459_s0 + $0x3e8] sm:$0xff] }
  0xe8   :  { %v222_v16 = vpop.f32.mrf.mxu0  ;;  %v431_v17 = vpop.f32.mrf.mxu1 }
  0xe9   :  { %636 = vst [vmem:[%s1461_s3 + $0x140] sm:$0xff] %v525_v15  ;;  %365 = vmatmul.f32.gmra.mxu2 %v128_v13  ;;  %v223_v20 = vadd.f32 %v1008_v32, %v222_v16  ;;  %v74_v15 = vld [vmem:[%s1459_s0 + $0x1e0] sm:$0xff]  ;;  %v75_v16 = vld [vmem:[%s1459_s0 + $0x1e8] sm:$0xff] }
  0xea   :  { %574 = vmatmul.f32.gmra.mxu3 %v129_v14 }
  0xeb   :  { %v432_v21 = vadd.f32 %v431_v17, %v223_v20  ;;  %269 = vmatmul.f32.gmra.mxu0 %v64_v18  ;;  %478 = vmatmul.f32.gmra.mxu1 %v65_v19 }
  0xec   :  { %v318_v22 = vpop.f32.mrf.mxu2 }
  0xed   :  { %v527_v23 = vpop.f32.mrf.mxu3  ;;  %v319_v24 = vadd.f32 %v1008_v32, %v318_v22  ;;  %605 = vst [vmem:[%s1461_s3 + $0x48] sm:$0xff] %v432_v21  ;;  %v140_v22 = vld [vmem:[%s1459_s0 + $0x3f0] sm:$0xff] }
  0xef   :  { %v528_v27 = vadd.f32 %v527_v23, %v319_v24  ;;  %v141_v23 = vld [vmem:[%s1459_s0 + $0x3f8] sm:$0xff] }
  0xf0   :  { %v225_v28 = vpop.f32.mrf.mxu0  ;;  %v434_v29 = vpop.f32.mrf.mxu1 }
  0xf1   :  { %637 = vst [vmem:[%s1461_s3 + $0x148] sm:$0xff] %v528_v27  ;;  %368 = vmatmul.f32.gmra.mxu2 %v130_v25  ;;  %v226_v33 = vadd.f32 %v1008_v32, %v225_v28  ;;  %v76_v27 = vld [vmem:[%s1459_s0 + $0x1f0] sm:$0xff]  ;;  %v77_v28 = vld [vmem:[%s1459_s0 + $0x1f8] sm:$0xff] }
  0xf2   :  { %577 = vmatmul.f32.gmra.mxu3 %v131_v26 }
  0xf3   :  { %v435_v34 = vadd.f32 %v434_v29, %v226_v33  ;;  %272 = vmatmul.f32.gmra.mxu0 %v66_v30  ;;  %481 = vmatmul.f32.gmra.mxu1 %v67_v31 }
  0xf4   :  { %v321_v35 = vpop.f32.mrf.mxu2 }
  0xf5   :  { %v530_v36 = vpop.f32.mrf.mxu3  ;;  %v322_v37 = vadd.f32 %v1008_v32, %v321_v35  ;;  %606 = vst [vmem:[%s1461_s3 + $0x50] sm:$0xff] %v435_v34 }
  0xf7   :  { %v531_v40 = vadd.f32 %v530_v36, %v322_v37 }
  0xf8   :  { %v228_v41 = vpop.f32.mrf.mxu0  ;;  %v437_v42 = vpop.f32.mrf.mxu1 }
  0xf9   :  { %638 = vst [vmem:[%s1461_s3 + $0x150] sm:$0xff] %v531_v40  ;;  %371 = vmatmul.f32.gmra.mxu2 %v132_v38  ;;  %v229_v45 = vadd.f32 %v1008_v32, %v228_v41 }
  0xfa   :  { %580 = vmatmul.f32.gmra.mxu3 %v133_v39 }
  0xfb   :  { %v438_v46 = vadd.f32 %v437_v42, %v229_v45  ;;  %275 = vmatmul.f32.gmra.mxu0 %v68_v43  ;;  %484 = vmatmul.f32.gmra.mxu1 %v69_v44 }
  0xfc   :  { %v324_v47 = vpop.f32.mrf.mxu2 }
  0xfd   :  { %v533_v48 = vpop.f32.mrf.mxu3  ;;  %v325_v49 = vadd.f32 %v1008_v32, %v324_v47  ;;  %607 = vst [vmem:[%s1461_s3 + $0x58] sm:$0xff] %v438_v46 }
  0xff   :  { %v534_v52 = vadd.f32 %v533_v48, %v325_v49 }
 0x100   :  { %v231_v53 = vpop.f32.mrf.mxu0  ;;  %v440_v54 = vpop.f32.mrf.mxu1 }
 0x101   :  { %639 = vst [vmem:[%s1461_s3 + $0x158] sm:$0xff] %v534_v52  ;;  %374 = vmatmul.f32.gmra.mxu2 %v134_v50  ;;  %v232_v57 = vadd.f32 %v1008_v32, %v231_v53 }
 0x102   :  { %583 = vmatmul.f32.gmra.mxu3 %v135_v51 }
 0x103   :  { %v441_v58 = vadd.f32 %v440_v54, %v232_v57  ;;  %278 = vmatmul.f32.gmra.mxu0 %v70_v55  ;;  %487 = vmatmul.f32.gmra.mxu1 %v71_v56 }
 0x104   :  { %v327_v59 = vpop.f32.mrf.mxu2 }
 0x105   :  { %v536_v60 = vpop.f32.mrf.mxu3  ;;  %v328_v61 = vadd.f32 %v1008_v32, %v327_v59  ;;  %608 = vst [vmem:[%s1461_s3 + $0x60] sm:$0xff] %v441_v58 }
 0x107   :  { %v537_v0 = vadd.f32 %v536_v60, %v328_v61 }
 0x108   :  { %v234_v1 = vpop.f32.mrf.mxu0  ;;  %v443_v2 = vpop.f32.mrf.mxu1 }
 0x109   :  { %640 = vst [vmem:[%s1461_s3 + $0x160] sm:$0xff] %v537_v0  ;;  %377 = vmatmul.f32.gmra.mxu2 %v136_v62  ;;  %v235_v5 = vadd.f32 %v1008_v32, %v234_v1 }
 0x10a   :  { %586 = vmatmul.f32.gmra.mxu3 %v137_v63 }
 0x10b   :  { %v444_v6 = vadd.f32 %v443_v2, %v235_v5  ;;  %281 = vmatmul.f32.gmra.mxu0 %v72_v3  ;;  %490 = vmatmul.f32.gmra.mxu1 %v73_v4 }
 0x10c   :  { %v330_v7 = vpop.f32.mrf.mxu2 }
 0x10d   :  { %v539_v8 = vpop.f32.mrf.mxu3  ;;  %v331_v9 = vadd.f32 %v1008_v32, %v330_v7  ;;  %609 = vst [vmem:[%s1461_s3 + $0x68] sm:$0xff] %v444_v6 }
 0x10f   :  { %v540_v12 = vadd.f32 %v539_v8, %v331_v9 }
 0x110   :  { %v237_v13 = vpop.f32.mrf.mxu0  ;;  %v446_v14 = vpop.f32.mrf.mxu1 }
 0x111   :  { %641 = vst [vmem:[%s1461_s3 + $0x168] sm:$0xff] %v540_v12  ;;  %380 = vmatmul.f32.gmra.mxu2 %v138_v10  ;;  %v238_v17 = vadd.f32 %v1008_v32, %v237_v13 }
 0x112   :  { %589 = vmatmul.f32.gmra.mxu3 %v139_v11 }
 0x113   :  { %v447_v18 = vadd.f32 %v446_v14, %v238_v17  ;;  %284 = vmatmul.f32.gmra.mxu0 %v74_v15  ;;  %493 = vmatmul.f32.gmra.mxu1 %v75_v16 }
 0x114   :  { %v333_v19 = vpop.f32.mrf.mxu2 }
 0x115   :  { %v542_v20 = vpop.f32.mrf.mxu3  ;;  %v334_v21 = vadd.f32 %v1008_v32, %v333_v19  ;;  %610 = vst [vmem:[%s1461_s3 + $0x70] sm:$0xff] %v447_v18 }
 0x117   :  { %v543_v24 = vadd.f32 %v542_v20, %v334_v21 }
 0x118   :  { %v240_v25 = vpop.f32.mrf.mxu0  ;;  %v449_v26 = vpop.f32.mrf.mxu1 }
 0x119   :  { %642 = vst [vmem:[%s1461_s3 + $0x170] sm:$0xff] %v543_v24  ;;  %383 = vmatmul.f32.gmra.mxu2 %v140_v22  ;;  %v241_v29 = vadd.f32 %v1008_v32, %v240_v25 }
 0x11a   :  { %592 = vmatmul.f32.gmra.mxu3 %v141_v23 }
 0x11b   :  { %v450_v30 = vadd.f32 %v449_v26, %v241_v29  ;;  %287 = vmatmul.f32.gmra.mxu0 %v76_v27  ;;  %496 = vmatmul.f32.gmra.mxu1 %v77_v28 }
 0x11c   :  { %v336_v31 = vpop.f32.mrf.mxu2 }
 0x11d   :  { %v545_v33 = vpop.f32.mrf.mxu3  ;;  %v337_v34 = vadd.f32 %v1008_v32, %v336_v31  ;;  %611 = vst [vmem:[%s1461_s3 + $0x78] sm:$0xff] %v450_v30 }
 0x11f   :  { %v546_v35 = vadd.f32 %v545_v33, %v337_v34 }
 0x120   :  { %v243_v36 = vpop.f32.mrf.mxu0  ;;  %v452_v37 = vpop.f32.mrf.mxu1 }
 0x121   :  { %643 = vst [vmem:[%s1461_s3 + $0x178] sm:$0xff] %v546_v35  ;;  %v244_v38 = vadd.f32 %v1008_v32, %v243_v36 }
 0x123   :  { %v453_v39 = vadd.f32 %v452_v37, %v244_v38 }
 0x124   :  { %v339_v40 = vpop.f32.mrf.mxu2 }
 0x125   :  { %v548_v41 = vpop.f32.mrf.mxu3  ;;  %v340_v42 = vadd.f32 %v1008_v32, %v339_v40  ;;  %612 = vst [vmem:[%s1461_s3 + $0x80] sm:$0xff] %v453_v39 }
 0x127   :  { %v549_v43 = vadd.f32 %v548_v41, %v340_v42 }
 0x128   :  { %v246_v44 = vpop.f32.mrf.mxu0  ;;  %v455_v45 = vpop.f32.mrf.mxu1 }
 0x129   :  { %644 = vst [vmem:[%s1461_s3 + $0x180] sm:$0xff] %v549_v43  ;;  %v247_v46 = vadd.f32 %v1008_v32, %v246_v44 }
 0x12b   :  { %v456_v47 = vadd.f32 %v455_v45, %v247_v46 }
 0x12c   :  { %v342_v48 = vpop.f32.mrf.mxu2 }
 0x12d   :  { %v551_v49 = vpop.f32.mrf.mxu3  ;;  %v343_v50 = vadd.f32 %v1008_v32, %v342_v48  ;;  %613 = vst [vmem:[%s1461_s3 + $0x88] sm:$0xff] %v456_v47 }
 0x12f   :  { %v552_v51 = vadd.f32 %v551_v49, %v343_v50 }
 0x130   :  { %v249_v52 = vpop.f32.mrf.mxu0  ;;  %v458_v53 = vpop.f32.mrf.mxu1 }
 0x131   :  { %645 = vst [vmem:[%s1461_s3 + $0x188] sm:$0xff] %v552_v51  ;;  %v250_v54 = vadd.f32 %v1008_v32, %v249_v52 }
 0x133   :  { %v459_v55 = vadd.f32 %v458_v53, %v250_v54 }
 0x134   :  { %v345_v56 = vpop.f32.mrf.mxu2 }
 0x135   :  { %v554_v57 = vpop.f32.mrf.mxu3  ;;  %v346_v58 = vadd.f32 %v1008_v32, %v345_v56  ;;  %614 = vst [vmem:[%s1461_s3 + $0x90] sm:$0xff] %v459_v55 }
 0x137   :  { %v555_v59 = vadd.f32 %v554_v57, %v346_v58 }
 0x138   :  { %v252_v60 = vpop.f32.mrf.mxu0  ;;  %v461_v61 = vpop.f32.mrf.mxu1 }
 0x139   :  { %646 = vst [vmem:[%s1461_s3 + $0x190] sm:$0xff] %v555_v59  ;;  %v253_v62 = vadd.f32 %v1008_v32, %v252_v60 }
 0x13b   :  { %v462_v63 = vadd.f32 %v461_v61, %v253_v62 }
 0x13c   :  { %v348_v0 = vpop.f32.mrf.mxu2 }
 0x13d   :  { %v557_v1 = vpop.f32.mrf.mxu3  ;;  %v349_v2 = vadd.f32 %v1008_v32, %v348_v0  ;;  %615 = vst [vmem:[%s1461_s3 + $0x98] sm:$0xff] %v462_v63 }
 0x13f   :  { %v558_v3 = vadd.f32 %v557_v1, %v349_v2 }
 0x140   :  { %v255_v4 = vpop.f32.mrf.mxu0  ;;  %v464_v5 = vpop.f32.mrf.mxu1 }
 0x141   :  { %647 = vst [vmem:[%s1461_s3 + $0x198] sm:$0xff] %v558_v3  ;;  %v256_v6 = vadd.f32 %v1008_v32, %v255_v4 }
 0x143   :  { %v465_v7 = vadd.f32 %v464_v5, %v256_v6 }
 0x144   :  { %v351_v8 = vpop.f32.mrf.mxu2 }
 0x145   :  { %v560_v9 = vpop.f32.mrf.mxu3  ;;  %v352_v10 = vadd.f32 %v1008_v32, %v351_v8  ;;  %616 = vst [vmem:[%s1461_s3 + $0xa0] sm:$0xff] %v465_v7 }
 0x147   :  { %v561_v11 = vadd.f32 %v560_v9, %v352_v10 }
 0x148   :  { %v258_v12 = vpop.f32.mrf.mxu0  ;;  %v467_v13 = vpop.f32.mrf.mxu1 }
 0x149   :  { %648 = vst [vmem:[%s1461_s3 + $0x1a0] sm:$0xff] %v561_v11  ;;  %v259_v14 = vadd.f32 %v1008_v32, %v258_v12 }
 0x14b   :  { %v468_v15 = vadd.f32 %v467_v13, %v259_v14 }
 0x14c   :  { %v354_v16 = vpop.f32.mrf.mxu2 }
 0x14d   :  { %v563_v17 = vpop.f32.mrf.mxu3  ;;  %v355_v18 = vadd.f32 %v1008_v32, %v354_v16  ;;  %617 = vst [vmem:[%s1461_s3 + $0xa8] sm:$0xff] %v468_v15 }
 0x14f   :  { %v564_v19 = vadd.f32 %v563_v17, %v355_v18 }
 0x150   :  { %v261_v20 = vpop.f32.mrf.mxu0  ;;  %v470_v21 = vpop.f32.mrf.mxu1 }
 0x151   :  { %649 = vst [vmem:[%s1461_s3 + $0x1a8] sm:$0xff] %v564_v19  ;;  %v262_v22 = vadd.f32 %v1008_v32, %v261_v20 }
 0x153   :  { %v471_v23 = vadd.f32 %v470_v21, %v262_v22 }
 0x154   :  { %v357_v24 = vpop.f32.mrf.mxu2 }
 0x155   :  { %v566_v25 = vpop.f32.mrf.mxu3  ;;  %v358_v26 = vadd.f32 %v1008_v32, %v357_v24  ;;  %618 = vst [vmem:[%s1461_s3 + $0xb0] sm:$0xff] %v471_v23 }
 0x157   :  { %v567_v27 = vadd.f32 %v566_v25, %v358_v26 }
 0x158   :  { %v264_v28 = vpop.f32.mrf.mxu0  ;;  %v473_v29 = vpop.f32.mrf.mxu1 }
 0x159   :  { %650 = vst [vmem:[%s1461_s3 + $0x1b0] sm:$0xff] %v567_v27  ;;  %v265_v30 = vadd.f32 %v1008_v32, %v264_v28 }
 0x15b   :  { %v474_v31 = vadd.f32 %v473_v29, %v265_v30 }
 0x15c   :  { %v360_v33 = vpop.f32.mrf.mxu2 }
 0x15d   :  { %v569_v34 = vpop.f32.mrf.mxu3  ;;  %v361_v35 = vadd.f32 %v1008_v32, %v360_v33  ;;  %619 = vst [vmem:[%s1461_s3 + $0xb8] sm:$0xff] %v474_v31 }
 0x15f   :  { %v570_v36 = vadd.f32 %v569_v34, %v361_v35 }
 0x160   :  { %v267_v37 = vpop.f32.mrf.mxu0  ;;  %v476_v38 = vpop.f32.mrf.mxu1 }
 0x161   :  { %651 = vst [vmem:[%s1461_s3 + $0x1b8] sm:$0xff] %v570_v36  ;;  %v268_v39 = vadd.f32 %v1008_v32, %v267_v37 }
 0x163   :  { %v477_v40 = vadd.f32 %v476_v38, %v268_v39 }
 0x164   :  { %v363_v41 = vpop.f32.mrf.mxu2 }
 0x165   :  { %v572_v42 = vpop.f32.mrf.mxu3  ;;  %v364_v43 = vadd.f32 %v1008_v32, %v363_v41  ;;  %620 = vst [vmem:[%s1461_s3 + $0xc0] sm:$0xff] %v477_v40 }
 0x167   :  { %v573_v44 = vadd.f32 %v572_v42, %v364_v43 }
 0x168   :  { %v270_v45 = vpop.f32.mrf.mxu0  ;;  %v479_v46 = vpop.f32.mrf.mxu1 }
 0x169   :  { %652 = vst [vmem:[%s1461_s3 + $0x1c0] sm:$0xff] %v573_v44  ;;  %v271_v47 = vadd.f32 %v1008_v32, %v270_v45 }
 0x16b   :  { %v480_v48 = vadd.f32 %v479_v46, %v271_v47 }
 0x16c   :  { %v366_v49 = vpop.f32.mrf.mxu2 }
 0x16d   :  { %v575_v50 = vpop.f32.mrf.mxu3  ;;  %v367_v51 = vadd.f32 %v1008_v32, %v366_v49  ;;  %621 = vst [vmem:[%s1461_s3 + $0xc8] sm:$0xff] %v480_v48 }
 0x16f   :  { %v576_v52 = vadd.f32 %v575_v50, %v367_v51 }
 0x170   :  { %v273_v53 = vpop.f32.mrf.mxu0  ;;  %v482_v54 = vpop.f32.mrf.mxu1 }
 0x171   :  { %653 = vst [vmem:[%s1461_s3 + $0x1c8] sm:$0xff] %v576_v52  ;;  %v274_v55 = vadd.f32 %v1008_v32, %v273_v53 }
 0x173   :  { %v483_v56 = vadd.f32 %v482_v54, %v274_v55 }
 0x174   :  { %v369_v57 = vpop.f32.mrf.mxu2 }
 0x175   :  { %v578_v58 = vpop.f32.mrf.mxu3  ;;  %v370_v59 = vadd.f32 %v1008_v32, %v369_v57  ;;  %622 = vst [vmem:[%s1461_s3 + $0xd0] sm:$0xff] %v483_v56 }
 0x177   :  { %v579_v60 = vadd.f32 %v578_v58, %v370_v59 }
 0x178   :  { %v276_v61 = vpop.f32.mrf.mxu0  ;;  %v485_v62 = vpop.f32.mrf.mxu1 }
 0x179   :  { %654 = vst [vmem:[%s1461_s3 + $0x1d0] sm:$0xff] %v579_v60  ;;  %v277_v63 = vadd.f32 %v1008_v32, %v276_v61 }
 0x17b   :  { %v486_v0 = vadd.f32 %v485_v62, %v277_v63 }
 0x17c   :  { %v372_v1 = vpop.f32.mrf.mxu2 }
 0x17d   :  { %v581_v2 = vpop.f32.mrf.mxu3  ;;  %v373_v3 = vadd.f32 %v1008_v32, %v372_v1  ;;  %623 = vst [vmem:[%s1461_s3 + $0xd8] sm:$0xff] %v486_v0 }
 0x17f   :  { %v582_v4 = vadd.f32 %v581_v2, %v373_v3 }
 0x180   :  { %v279_v5 = vpop.f32.mrf.mxu0  ;;  %v488_v6 = vpop.f32.mrf.mxu1 }
 0x181   :  { %655 = vst [vmem:[%s1461_s3 + $0x1d8] sm:$0xff] %v582_v4  ;;  %v280_v7 = vadd.f32 %v1008_v32, %v279_v5 }
 0x183   :  { %v489_v8 = vadd.f32 %v488_v6, %v280_v7 }
 0x184   :  { %v375_v9 = vpop.f32.mrf.mxu2 }
 0x185   :  { %v584_v10 = vpop.f32.mrf.mxu3  ;;  %v376_v11 = vadd.f32 %v1008_v32, %v375_v9  ;;  %624 = vst [vmem:[%s1461_s3 + $0xe0] sm:$0xff] %v489_v8 }
 0x187   :  { %v585_v12 = vadd.f32 %v584_v10, %v376_v11 }
 0x188   :  { %v282_v13 = vpop.f32.mrf.mxu0  ;;  %v491_v14 = vpop.f32.mrf.mxu1 }
 0x189   :  { %656 = vst [vmem:[%s1461_s3 + $0x1e0] sm:$0xff] %v585_v12  ;;  %v283_v15 = vadd.f32 %v1008_v32, %v282_v13 }
 0x18b   :  { %v492_v16 = vadd.f32 %v491_v14, %v283_v15 }
 0x18c   :  { %v378_v17 = vpop.f32.mrf.mxu2 }
 0x18d   :  { %v587_v18 = vpop.f32.mrf.mxu3  ;;  %v379_v19 = vadd.f32 %v1008_v32, %v378_v17  ;;  %625 = vst [vmem:[%s1461_s3 + $0xe8] sm:$0xff] %v492_v16 }
 0x18f   :  { %v588_v20 = vadd.f32 %v587_v18, %v379_v19 }
 0x190   :  { %v285_v21 = vpop.f32.mrf.mxu0  ;;  %v494_v22 = vpop.f32.mrf.mxu1 }
 0x191   :  { %657 = vst [vmem:[%s1461_s3 + $0x1e8] sm:$0xff] %v588_v20  ;;  %v286_v23 = vadd.f32 %v1008_v32, %v285_v21 }
 0x193   :  { %v495_v24 = vadd.f32 %v494_v22, %v286_v23 }
 0x194   :  { %v381_v25 = vpop.f32.mrf.mxu2 }
 0x195   :  { %v590_v26 = vpop.f32.mrf.mxu3  ;;  %v382_v27 = vadd.f32 %v1008_v32, %v381_v25  ;;  %626 = vst [vmem:[%s1461_s3 + $0xf0] sm:$0xff] %v495_v24 }
 0x197   :  { %v591_v28 = vadd.f32 %v590_v26, %v382_v27 }
 0x198   :  { %v288_v29 = vpop.f32.mrf.mxu0  ;;  %v497_v30 = vpop.f32.mrf.mxu1 }
 0x199   :  { %658 = vst [vmem:[%s1461_s3 + $0x1f0] sm:$0xff] %v591_v28  ;;  %v289_v31 = vadd.f32 %v1008_v32, %v288_v29 }
 0x19b   :  { %v498_v33 = vadd.f32 %v497_v30, %v289_v31 }
 0x19c   :  { %v384_v34 = vpop.f32.mrf.mxu2 }
 0x19d   :  { %v593_v35 = vpop.f32.mrf.mxu3  ;;  %v385_v36 = vadd.f32 %v1008_v32, %v384_v34  ;;  %627 = vst [vmem:[%s1461_s3 + $0xf8] sm:$0xff] %v498_v33 }
 0x19f   :  { %v594_v37 = vadd.f32 %v593_v35, %v385_v36 }
 0x1a1   :  { %659 = vst [vmem:[%s1461_s3 + $0x1f8] sm:$0xff] %v594_v37 }

// kernel: discriminator_forward.7
= control target key start
LH: loop header
LB: loop body
LE: loop exit
PB: predicated region body
PF: predicated region fallthrough
CT: control target
= control target key end

     0   :  { %s3408_s1 = inlined_call_operand.vmem [shape: f32[2048,128], index: 1, kind: input, shape index: {}]   ;;  %s3409_s0 = inlined_call_operand.vmem [shape: f32[128,2048], index: 0, kind: input, shape index: {}]   ;;  %s3410_s2 = inlined_call_operand.vmem [shape: f32[1,128], index: 2, kind: input, shape index: {}]   ;;  %s3411_s3 = inlined_call_operand.vmem [shape: f32[128,128], index: 3, kind: output, shape index: {}]  }
   0x1   :  { %v285_v0 = vld [vmem:[%s3408_s1 + $0x78] sm:$0xff]  ;;  %v284_v2 = vld [vmem:[%s3408_s1 + $0x70] sm:$0xff]  ;;  %v283_v6 = vld [vmem:[%s3408_s1 + $0x68] sm:$0xff] }
   0x2   :  { %v317_v1 = vld [vmem:[%s3408_s1 + $0x178] sm:$0xff]  ;;  %530 = vmatpush.msra.mxu0 %v285_v0  ;;  %v316_v4 = vld [vmem:[%s3408_s1 + $0x170] sm:$0xff]  ;;  %v315_v8 = vld [vmem:[%s3408_s1 + $0x168] sm:$0xff] }
   0x3   :  { %660 = vmatpush.msra.mxu2 %v317_v1  ;;  %v301_v3 = vld [vmem:[%s3408_s1 + $0xf8] sm:$0xff]  ;;  %v300_v7 = vld [vmem:[%s3408_s1 + $0xf0] sm:$0xff]  ;;  %v299_v10 = vld [vmem:[%s3408_s1 + $0xe8] sm:$0xff] }
   0x4   :  { %v333_v5 = vld [vmem:[%s3408_s1 + $0x1f8] sm:$0xff]  ;;  %595 = vmatpush.msra.mxu1 %v301_v3  ;;  %531 = vmatpush.msra.mxu0 %v284_v2  ;;  %v332_v9 = vld [vmem:[%s3408_s1 + $0x1f0] sm:$0xff]  ;;  %v282_v11 = vld [vmem:[%s3408_s1 + $0x60] sm:$0xff] }
   0x5   :  { %725 = vmatpush.msra.mxu3 %v333_v5  ;;  %661 = vmatpush.msra.mxu2 %v316_v4  ;;  %v314_v12 = vld [vmem:[%s3408_s1 + $0x160] sm:$0xff]  ;;  %v331_v13 = vld [vmem:[%s3408_s1 + $0x1e8] sm:$0xff]  ;;  %v281_v16 = vld [vmem:[%s3408_s1 + $0x58] sm:$0xff] }
   0x6   :  { %596 = vmatpush.msra.mxu1 %v300_v7  ;;  %532 = vmatpush.msra.mxu0 %v283_v6  ;;  %v298_v14 = vld [vmem:[%s3408_s1 + $0xe0] sm:$0xff]  ;;  %v313_v17 = vld [vmem:[%s3408_s1 + $0x158] sm:$0xff]  ;;  %v280_v20 = vld [vmem:[%s3408_s1 + $0x50] sm:$0xff] }
   0x7   :  { %726 = vmatpush.msra.mxu3 %v332_v9  ;;  %662 = vmatpush.msra.mxu2 %v315_v8  ;;  %v330_v15 = vld [vmem:[%s3408_s1 + $0x1e0] sm:$0xff]  ;;  %v297_v18 = vld [vmem:[%s3408_s1 + $0xd8] sm:$0xff]  ;;  %v312_v21 = vld [vmem:[%s3408_s1 + $0x150] sm:$0xff] }
   0x8   :  { %597 = vmatpush.msra.mxu1 %v299_v10  ;;  %533 = vmatpush.msra.mxu0 %v282_v11  ;;  %v329_v19 = vld [vmem:[%s3408_s1 + $0x1d8] sm:$0xff]  ;;  %v296_v22 = vld [vmem:[%s3408_s1 + $0xd0] sm:$0xff]  ;;  %v279_v24 = vld [vmem:[%s3408_s1 + $0x48] sm:$0xff] }
   0x9   :  { %727 = vmatpush.msra.mxu3 %v331_v13  ;;  %663 = vmatpush.msra.mxu2 %v314_v12  ;;  %v328_v23 = vld [vmem:[%s3408_s1 + $0x1d0] sm:$0xff]  ;;  %v311_v25 = vld [vmem:[%s3408_s1 + $0x148] sm:$0xff]  ;;  %v278_v28 = vld [vmem:[%s3408_s1 + $0x40] sm:$0xff] }
   0xa   :  { %598 = vmatpush.msra.mxu1 %v298_v14  ;;  %534 = vmatpush.msra.mxu0 %v281_v16  ;;  %v295_v26 = vld [vmem:[%s3408_s1 + $0xc8] sm:$0xff]  ;;  %v310_v29 = vld [vmem:[%s3408_s1 + $0x140] sm:$0xff]  ;;  %v277_v32 = vld [vmem:[%s3408_s1 + $0x38] sm:$0xff] }
   0xb   :  { %728 = vmatpush.msra.mxu3 %v330_v15  ;;  %664 = vmatpush.msra.mxu2 %v313_v17  ;;  %v327_v27 = vld [vmem:[%s3408_s1 + $0x1c8] sm:$0xff]  ;;  %v294_v30 = vld [vmem:[%s3408_s1 + $0xc0] sm:$0xff]  ;;  %v309_v33 = vld [vmem:[%s3408_s1 + $0x138] sm:$0xff] }
   0xc   :  { %599 = vmatpush.msra.mxu1 %v297_v18  ;;  %535 = vmatpush.msra.mxu0 %v280_v20  ;;  %v326_v31 = vld [vmem:[%s3408_s1 + $0x1c0] sm:$0xff]  ;;  %v293_v34 = vld [vmem:[%s3408_s1 + $0xb8] sm:$0xff]  ;;  %v276_v36 = vld [vmem:[%s3408_s1 + $0x30] sm:$0xff] }
   0xd   :  { %729 = vmatpush.msra.mxu3 %v329_v19  ;;  %665 = vmatpush.msra.mxu2 %v312_v21  ;;  %v325_v35 = vld [vmem:[%s3408_s1 + $0x1b8] sm:$0xff]  ;;  %v308_v37 = vld [vmem:[%s3408_s1 + $0x130] sm:$0xff]  ;;  %v275_v40 = vld [vmem:[%s3408_s1 + $0x28] sm:$0xff] }
   0xe   :  { %600 = vmatpush.msra.mxu1 %v296_v22  ;;  %536 = vmatpush.msra.mxu0 %v279_v24  ;;  %v292_v38 = vld [vmem:[%s3408_s1 + $0xb0] sm:$0xff]  ;;  %v307_v41 = vld [vmem:[%s3408_s1 + $0x128] sm:$0xff]  ;;  %v274_v44 = vld [vmem:[%s3408_s1 + $0x20] sm:$0xff] }
   0xf   :  { %730 = vmatpush.msra.mxu3 %v328_v23  ;;  %666 = vmatpush.msra.mxu2 %v311_v25  ;;  %v324_v39 = vld [vmem:[%s3408_s1 + $0x1b0] sm:$0xff]  ;;  %v291_v42 = vld [vmem:[%s3408_s1 + $0xa8] sm:$0xff]  ;;  %v306_v45 = vld [vmem:[%s3408_s1 + $0x120] sm:$0xff] }
  0x10   :  { %601 = vmatpush.msra.mxu1 %v295_v26  ;;  %537 = vmatpush.msra.mxu0 %v278_v28  ;;  %v323_v43 = vld [vmem:[%s3408_s1 + $0x1a8] sm:$0xff]  ;;  %v290_v46 = vld [vmem:[%s3408_s1 + $0xa0] sm:$0xff]  ;;  %v273_v48 = vld [vmem:[%s3408_s1 + $0x18] sm:$0xff] }
  0x11   :  { %731 = vmatpush.msra.mxu3 %v327_v27  ;;  %667 = vmatpush.msra.mxu2 %v310_v29  ;;  %v322_v47 = vld [vmem:[%s3408_s1 + $0x1a0] sm:$0xff]  ;;  %v305_v49 = vld [vmem:[%s3408_s1 + $0x118] sm:$0xff]  ;;  %v272_v52 = vld [vmem:[%s3408_s1 + $0x10] sm:$0xff] }
  0x12   :  { %602 = vmatpush.msra.mxu1 %v294_v30  ;;  %538 = vmatpush.msra.mxu0 %v277_v32  ;;  %v289_v50 = vld [vmem:[%s3408_s1 + $0x98] sm:$0xff]  ;;  %v304_v53 = vld [vmem:[%s3408_s1 + $0x110] sm:$0xff]  ;;  %v271_v56 = vld [vmem:[%s3408_s1 + $0x8] sm:$0xff] }
  0x13   :  { %732 = vmatpush.msra.mxu3 %v326_v31  ;;  %668 = vmatpush.msra.mxu2 %v309_v33  ;;  %v321_v51 = vld [vmem:[%s3408_s1 + $0x198] sm:$0xff]  ;;  %v288_v54 = vld [vmem:[%s3408_s1 + $0x90] sm:$0xff]  ;;  %v303_v57 = vld [vmem:[%s3408_s1 + $0x108] sm:$0xff] }
  0x14   :  { %603 = vmatpush.msra.mxu1 %v293_v34  ;;  %539 = vmatpush.msra.mxu0 %v276_v36  ;;  %v320_v55 = vld [vmem:[%s3408_s1 + $0x190] sm:$0xff]  ;;  %v287_v58 = vld [vmem:[%s3408_s1 + $0x88] sm:$0xff]  ;;  %v270_v60 = vld [vmem:[%s3408_s1] sm:$0xff] }
  0x15   :  { %733 = vmatpush.msra.mxu3 %v325_v35  ;;  %669 = vmatpush.msra.mxu2 %v308_v37  ;;  %v319_v59 = vld [vmem:[%s3408_s1 + $0x188] sm:$0xff]  ;;  %v302_v61 = vld [vmem:[%s3408_s1 + $0x100] sm:$0xff]  ;;  %v16_v63 = vld [vmem:[%s3409_s0 + $0x10] sm:$0xff] }
  0x16   :  { %604 = vmatpush.msra.mxu1 %v292_v38  ;;  %540 = vmatpush.msra.mxu0 %v275_v40  ;;  %v14_v62 = vld [vmem:[%s3409_s0] sm:$0xff]  ;;  %v381_v0 = vld [vmem:[%s3408_s1 + $0x378] sm:$0xff]  ;;  %v15_v3 = vld [vmem:[%s3409_s0 + $0x8] sm:$0xff] }
  0x17   :  { %734 = vmatpush.msra.mxu3 %v324_v39  ;;  %670 = vmatpush.msra.mxu2 %v307_v41  ;;  %v286_v1 = vld [vmem:[%s3408_s1 + $0x80] sm:$0xff]  ;;  %v17_v4 = vld [vmem:[%s3409_s0 + $0x18] sm:$0xff]  ;;  %v380_v8 = vld [vmem:[%s3408_s1 + $0x370] sm:$0xff] }
  0x18   :  { %605 = vmatpush.msra.mxu1 %v291_v42  ;;  %541 = vmatpush.msra.mxu0 %v274_v44  ;;  %v318_v2 = vld [vmem:[%s3408_s1 + $0x180] sm:$0xff]  ;;  %v349_v5 = vld [vmem:[%s3408_s1 + $0x278] sm:$0xff]  ;;  %v348_v9 = vld [vmem:[%s3408_s1 + $0x270] sm:$0xff] }
  0x19   :  { %735 = vmatpush.msra.mxu3 %v323_v43  ;;  %671 = vmatpush.msra.mxu2 %v306_v45  ;;  %v397_v6 = vld [vmem:[%s3408_s1 + $0x3f8] sm:$0xff]  ;;  %v396_v10 = vld [vmem:[%s3408_s1 + $0x3f0] sm:$0xff]  ;;  %v379_v12 = vld [vmem:[%s3408_s1 + $0x368] sm:$0xff] }
  0x1a   :  { %606 = vmatpush.msra.mxu1 %v290_v46  ;;  %542 = vmatpush.msra.mxu0 %v273_v48  ;;  %v365_v7 = vld [vmem:[%s3408_s1 + $0x2f8] sm:$0xff]  ;;  %v364_v11 = vld [vmem:[%s3408_s1 + $0x2f0] sm:$0xff]  ;;  %v347_v13 = vld [vmem:[%s3408_s1 + $0x268] sm:$0xff] }
  0x1b   :  { %736 = vmatpush.msra.mxu3 %v322_v47  ;;  %672 = vmatpush.msra.mxu2 %v305_v49  ;;  %v30_v14 = vld [vmem:[%s3409_s0 + $0x80] sm:$0xff]  ;;  %v32_v15 = vld [vmem:[%s3409_s0 + $0x90] sm:$0xff]  ;;  %v395_v16 = vld [vmem:[%s3408_s1 + $0x3e8] sm:$0xff] }
  0x1c   :  { %607 = vmatpush.msra.mxu1 %v289_v50  ;;  %543 = vmatpush.msra.mxu0 %v272_v52  ;;  %v363_v17 = vld [vmem:[%s3408_s1 + $0x2e8] sm:$0xff]  ;;  %v378_v19 = vld [vmem:[%s3408_s1 + $0x360] sm:$0xff]  ;;  %v33_v20 = vld [vmem:[%s3409_s0 + $0x98] sm:$0xff] }
  0x1d   :  { %737 = vmatpush.msra.mxu3 %v321_v51  ;;  %673 = vmatpush.msra.mxu2 %v304_v53  ;;  %v31_v18 = vld [vmem:[%s3409_s0 + $0x88] sm:$0xff]  ;;  %v346_v21 = vld [vmem:[%s3408_s1 + $0x260] sm:$0xff]  ;;  %v377_v24 = vld [vmem:[%s3408_s1 + $0x358] sm:$0xff] }
  0x1e   :  { %608 = vmatpush.msra.mxu1 %v288_v54  ;;  %544 = vmatpush.msra.mxu0 %v271_v56  ;;  %v394_v22 = vld [vmem:[%s3408_s1 + $0x3e0] sm:$0xff]  ;;  %v345_v25 = vld [vmem:[%s3408_s1 + $0x258] sm:$0xff]  ;;  %v376_v28 = vld [vmem:[%s3408_s1 + $0x350] sm:$0xff] }
  0x1f   :  { %738 = vmatpush.msra.mxu3 %v320_v55  ;;  %674 = vmatpush.msra.mxu2 %v303_v57  ;;  %v362_v23 = vld [vmem:[%s3408_s1 + $0x2e0] sm:$0xff]  ;;  %v393_v26 = vld [vmem:[%s3408_s1 + $0x3d8] sm:$0xff]  ;;  %v344_v29 = vld [vmem:[%s3408_s1 + $0x250] sm:$0xff] }
  0x20   :  { %609 = vmatpush.msra.mxu1 %v287_v58  ;;  %545 = vmatpush.msra.mxu0 %v270_v60  ;;  %v361_v27 = vld [vmem:[%s3408_s1 + $0x2d8] sm:$0xff]  ;;  %v46_v30 = vld [vmem:[%s3409_s0 + $0x100] sm:$0xff]  ;;  %v48_v31 = vld [vmem:[%s3409_s0 + $0x110] sm:$0xff] }
  0x21   :  { %739 = vmatpush.msra.mxu3 %v319_v59  ;;  %675 = vmatpush.msra.mxu2 %v302_v61  ;;  %v392_v32 = vld [vmem:[%s3408_s1 + $0x3d0] sm:$0xff]  ;;  %v47_v34 = vld [vmem:[%s3409_s0 + $0x108] sm:$0xff]  ;;  %v49_v35 = vld [vmem:[%s3409_s0 + $0x118] sm:$0xff] }
  0x22   :  { %546 = vmatmul.f32.vlgmr.msra.gmra.mxu0 %v14_v62  ;;  %676 = vmatmul.f32.vlgmr.msra.gmra.mxu2 %v16_v63  ;;  %v360_v33 = vld [vmem:[%s3408_s1 + $0x2d0] sm:$0xff]  ;;  %v375_v36 = vld [vmem:[%s3408_s1 + $0x348] sm:$0xff]  ;;  %v62_v40 = vld [vmem:[%s3409_s0 + $0x180] sm:$0xff] }
  0x23   :  { %920 = vmatpush.msrb.mxu2 %v381_v0  ;;  %610 = vmatpush.msra.mxu1 %v286_v1  ;;  %v343_v37 = vld [vmem:[%s3408_s1 + $0x248] sm:$0xff]  ;;  %v64_v41 = vld [vmem:[%s3409_s0 + $0x190] sm:$0xff]  ;;  %v65_v43 = vld [vmem:[%s3409_s0 + $0x198] sm:$0xff] }
  0x24   :  { %740 = vmatpush.msra.mxu3 %v318_v2  ;;  %611 = vmatmul.f32.vlgmr.msra.gmra.mxu1 %v15_v3  ;;  %v391_v38 = vld [vmem:[%s3408_s1 + $0x3c8] sm:$0xff]  ;;  %v374_v44 = vld [vmem:[%s3408_s1 + $0x340] sm:$0xff]  ;;  %v80_v49 = vld [vmem:[%s3409_s0 + $0x210] sm:$0xff] }
  0x25   :  { %741 = vmatmul.f32.vlgmr.msra.gmra.mxu3 %v17_v4  ;;  %790 = vmatpush.msrb.mxu0 %v349_v5  ;;  %v359_v39 = vld [vmem:[%s3408_s1 + $0x2c8] sm:$0xff]  ;;  %v342_v45 = vld [vmem:[%s3408_s1 + $0x240] sm:$0xff]  ;;  %v81_v51 = vld [vmem:[%s3409_s0 + $0x218] sm:$0xff] }
  0x26   :  { %985 = vmatpush.msrb.mxu3 %v397_v6  ;;  %855 = vmatpush.msrb.mxu1 %v365_v7  ;;  %v63_v42 = vld [vmem:[%s3409_s0 + $0x188] sm:$0xff]  ;;  %v390_v46 = vld [vmem:[%s3408_s1 + $0x3c0] sm:$0xff]  ;;  %v373_v52 = vld [vmem:[%s3408_s1 + $0x338] sm:$0xff] }
  0x27   :  { %921 = vmatpush.msrb.mxu2 %v380_v8  ;;  %791 = vmatpush.msrb.mxu0 %v348_v9  ;;  %v358_v47 = vld [vmem:[%s3408_s1 + $0x2c0] sm:$0xff]  ;;  %v79_v50 = vld [vmem:[%s3409_s0 + $0x208] sm:$0xff]  ;;  %v341_v53 = vld [vmem:[%s3408_s1 + $0x238] sm:$0xff] }
  0x28   :  { %986 = vmatpush.msrb.mxu3 %v396_v10  ;;  %856 = vmatpush.msrb.mxu1 %v364_v11  ;;  %v78_v48 = vld [vmem:[%s3409_s0 + $0x200] sm:$0xff]  ;;  %v389_v54 = vld [vmem:[%s3408_s1 + $0x3b8] sm:$0xff]  ;;  %v96_v57 = vld [vmem:[%s3409_s0 + $0x290] sm:$0xff] }
  0x29   :  { %922 = vmatpush.msrb.mxu2 %v379_v12  ;;  %792 = vmatpush.msrb.mxu0 %v347_v13  ;;  %v357_v55 = vld [vmem:[%s3408_s1 + $0x2b8] sm:$0xff]  ;;  %v94_v56 = vld [vmem:[%s3409_s0 + $0x280] sm:$0xff]  ;;  %v95_v58 = vld [vmem:[%s3409_s0 + $0x288] sm:$0xff] }
  0x2a   :  { %549 = vmatmul.f32.gmra.mxu0 %v30_v14  ;;  %679 = vmatmul.f32.gmra.mxu2 %v32_v15  ;;  %v97_v59 = vld [vmem:[%s3409_s0 + $0x298] sm:$0xff]  ;;  %v372_v60 = vld [vmem:[%s3408_s1 + $0x330] sm:$0xff]  ;;  %v110_v0 = vld [vmem:[%s3409_s0 + $0x300] sm:$0xff] }
  0x2b   :  { %987 = vmatpush.msrb.mxu3 %v395_v16  ;;  %857 = vmatpush.msrb.mxu1 %v363_v17  ;;  %v340_v61 = vld [vmem:[%s3408_s1 + $0x230] sm:$0xff]  ;;  %v111_v2 = vld [vmem:[%s3409_s0 + $0x308] sm:$0xff]  ;;  %v113_v3 = vld [vmem:[%s3409_s0 + $0x318] sm:$0xff] }
  0x2c   :  { %614 = vmatmul.f32.gmra.mxu1 %v31_v18  ;;  %923 = vmatpush.msrb.mxu2 %v378_v19  ;;  %v388_v62 = vld [vmem:[%s3408_s1 + $0x3b0] sm:$0xff]  ;;  %v371_v4 = vld [vmem:[%s3408_s1 + $0x328] sm:$0xff]  ;;  %v126_v8 = vld [vmem:[%s3409_s0 + $0x380] sm:$0xff] }
  0x2d   :  { %744 = vmatmul.f32.gmra.mxu3 %v33_v20  ;;  %793 = vmatpush.msrb.mxu0 %v346_v21  ;;  %v356_v63 = vld [vmem:[%s3408_s1 + $0x2b0] sm:$0xff]  ;;  %v339_v5 = vld [vmem:[%s3408_s1 + $0x228] sm:$0xff]  ;;  %v129_v11 = vld [vmem:[%s3409_s0 + $0x398] sm:$0xff] }
  0x2e   :  { %988 = vmatpush.msrb.mxu3 %v394_v22  ;;  %858 = vmatpush.msrb.mxu1 %v362_v23  ;;  %v112_v1 = vld [vmem:[%s3409_s0 + $0x310] sm:$0xff]  ;;  %v387_v6 = vld [vmem:[%s3408_s1 + $0x3a8] sm:$0xff]  ;;  %v370_v12 = vld [vmem:[%s3408_s1 + $0x320] sm:$0xff] }
  0x2f   :  { %924 = vmatpush.msrb.mxu2 %v377_v24  ;;  %794 = vmatpush.msrb.mxu0 %v345_v25  ;;  %v355_v7 = vld [vmem:[%s3408_s1 + $0x2a8] sm:$0xff]  ;;  %v128_v9 = vld [vmem:[%s3409_s0 + $0x390] sm:$0xff]  ;;  %v338_v13 = vld [vmem:[%s3408_s1 + $0x220] sm:$0xff] }
  0x30   :  { %989 = vmatpush.msrb.mxu3 %v393_v26  ;;  %859 = vmatpush.msrb.mxu1 %v361_v27  ;;  %v127_v10 = vld [vmem:[%s3409_s0 + $0x388] sm:$0xff]  ;;  %v386_v14 = vld [vmem:[%s3408_s1 + $0x3a0] sm:$0xff]  ;;  %v144_v17 = vld [vmem:[%s3409_s0 + $0x410] sm:$0xff] }
  0x31   :  { %925 = vmatpush.msrb.mxu2 %v376_v28  ;;  %795 = vmatpush.msrb.mxu0 %v344_v29  ;;  %v354_v15 = vld [vmem:[%s3408_s1 + $0x2a0] sm:$0xff]  ;;  %v143_v18 = vld [vmem:[%s3409_s0 + $0x408] sm:$0xff]  ;;  %v145_v19 = vld [vmem:[%s3409_s0 + $0x418] sm:$0xff] }
  0x32   :  { %552 = vmatmul.f32.gmra.mxu0 %v46_v30  ;;  %682 = vmatmul.f32.gmra.mxu2 %v48_v31  ;;  %v142_v16 = vld [vmem:[%s3409_s0 + $0x400] sm:$0xff]  ;;  %v369_v20 = vld [vmem:[%s3408_s1 + $0x318] sm:$0xff]  ;;  %v160_v25 = vld [vmem:[%s3409_s0 + $0x490] sm:$0xff] }
  0x33   :  { %990 = vmatpush.msrb.mxu3 %v392_v32  ;;  %860 = vmatpush.msrb.mxu1 %v360_v33  ;;  %v337_v21 = vld [vmem:[%s3408_s1 + $0x218] sm:$0xff]  ;;  %v158_v24 = vld [vmem:[%s3409_s0 + $0x480] sm:$0xff]  ;;  %v159_v26 = vld [vmem:[%s3409_s0 + $0x488] sm:$0xff] }
  0x34   :  { %617 = vmatmul.f32.gmra.mxu1 %v47_v34  ;;  %926 = vmatpush.msrb.mxu2 %v375_v36  ;;  %v385_v22 = vld [vmem:[%s3408_s1 + $0x398] sm:$0xff]  ;;  %v368_v28 = vld [vmem:[%s3408_s1 + $0x310] sm:$0xff]  ;;  %v174_v32 = vld [vmem:[%s3409_s0 + $0x500] sm:$0xff] }
  0x35   :  { %747 = vmatmul.f32.gmra.mxu3 %v49_v35  ;;  %796 = vmatpush.msrb.mxu0 %v343_v37  ;;  %v353_v23 = vld [vmem:[%s3408_s1 + $0x298] sm:$0xff]  ;;  %v336_v29 = vld [vmem:[%s3408_s1 + $0x210] sm:$0xff]  ;;  %v175_v34 = vld [vmem:[%s3409_s0 + $0x508] sm:$0xff] }
  0x36   :  { %991 = vmatpush.msrb.mxu3 %v391_v38  ;;  %861 = vmatpush.msrb.mxu1 %v359_v39  ;;  %v161_v27 = vld [vmem:[%s3409_s0 + $0x498] sm:$0xff]  ;;  %v384_v30 = vld [vmem:[%s3408_s1 + $0x390] sm:$0xff]  ;;  %v367_v36 = vld [vmem:[%s3408_s1 + $0x308] sm:$0xff] }
  0x37   :  { %927 = vmatpush.msrb.mxu2 %v374_v44  ;;  %797 = vmatpush.msrb.mxu0 %v342_v45  ;;  %v352_v31 = vld [vmem:[%s3408_s1 + $0x290] sm:$0xff]  ;;  %v177_v35 = vld [vmem:[%s3409_s0 + $0x518] sm:$0xff]  ;;  %v335_v37 = vld [vmem:[%s3408_s1 + $0x208] sm:$0xff] }
  0x38   :  { %992 = vmatpush.msrb.mxu3 %v390_v46  ;;  %862 = vmatpush.msrb.mxu1 %v358_v47  ;;  %v176_v33 = vld [vmem:[%s3409_s0 + $0x510] sm:$0xff]  ;;  %v383_v38 = vld [vmem:[%s3408_s1 + $0x388] sm:$0xff]  ;;  %v366_v44 = vld [vmem:[%s3408_s1 + $0x300] sm:$0xff] }
  0x39   :  { %928 = vmatpush.msrb.mxu2 %v373_v52  ;;  %798 = vmatpush.msrb.mxu0 %v341_v53  ;;  %v351_v39 = vld [vmem:[%s3408_s1 + $0x288] sm:$0xff]  ;;  %v334_v45 = vld [vmem:[%s3408_s1 + $0x200] sm:$0xff]  ;;  %v445_v52 = vld [vmem:[%s3408_s1 + $0x578] sm:$0xff] }
  0x3a   :  { %555 = vmatmul.f32.gmra.mxu0 %v62_v40  ;;  %685 = vmatmul.f32.gmra.mxu2 %v64_v41  ;;  %v190_v40 = vld [vmem:[%s3409_s0 + $0x580] sm:$0xff]  ;;  %v192_v41 = vld [vmem:[%s3409_s0 + $0x590] sm:$0xff]  ;;  %v413_v53 = vld [vmem:[%s3408_s1 + $0x478] sm:$0xff] }
  0x3b   :  { %993 = vmatpush.msrb.mxu3 %v389_v54  ;;  %863 = vmatpush.msrb.mxu1 %v357_v55  ;;  %v382_v46 = vld [vmem:[%s3408_s1 + $0x380] sm:$0xff]  ;;  %v461_v54 = vld [vmem:[%s3408_s1 + $0x5f8] sm:$0xff] }
  0x3c   :  { %620 = vmatmul.f32.gmra.mxu1 %v63_v42  ;;  %929 = vmatpush.msrb.mxu2 %v372_v60  ;;  %v191_v42 = vld [vmem:[%s3409_s0 + $0x588] sm:$0xff]  ;;  %v350_v47 = vld [vmem:[%s3408_s1 + $0x280] sm:$0xff]  ;;  %v429_v55 = vld [vmem:[%s3408_s1 + $0x4f8] sm:$0xff] }
  0x3d   :  { %750 = vmatmul.f32.gmra.mxu3 %v65_v43  ;;  %799 = vmatpush.msrb.mxu0 %v340_v61  ;;  %v193_v43 = vld [vmem:[%s3409_s0 + $0x598] sm:$0xff]  ;;  %v444_v60 = vld [vmem:[%s3408_s1 + $0x570] sm:$0xff] }
  0x3e   :  { %994 = vmatpush.msrb.mxu3 %v388_v62  ;;  %864 = vmatpush.msrb.mxu1 %v356_v63  ;;  %v412_v61 = vld [vmem:[%s3408_s1 + $0x470] sm:$0xff] }
  0x3f   :  { %930 = vmatpush.msrb.mxu2 %v371_v4  ;;  %800 = vmatpush.msrb.mxu0 %v339_v5  ;;  %v460_v62 = vld [vmem:[%s3408_s1 + $0x5f0] sm:$0xff]  ;;  %v443_v4 = vld [vmem:[%s3408_s1 + $0x568] sm:$0xff] }
  0x40   :  { %995 = vmatpush.msrb.mxu3 %v387_v6  ;;  %865 = vmatpush.msrb.mxu1 %v355_v7  ;;  %v428_v63 = vld [vmem:[%s3408_s1 + $0x4f0] sm:$0xff]  ;;  %v411_v5 = vld [vmem:[%s3408_s1 + $0x468] sm:$0xff] }
  0x41   :  { %931 = vmatpush.msrb.mxu2 %v370_v12  ;;  %801 = vmatpush.msrb.mxu0 %v338_v13  ;;  %v459_v6 = vld [vmem:[%s3408_s1 + $0x5e8] sm:$0xff]  ;;  %v442_v12 = vld [vmem:[%s3408_s1 + $0x560] sm:$0xff] }
  0x42   :  { %558 = vmatmul.f32.gmra.mxu0 %v78_v48  ;;  %688 = vmatmul.f32.gmra.mxu2 %v80_v49  ;;  %v206_v48 = vld [vmem:[%s3409_s0 + $0x600] sm:$0xff]  ;;  %v208_v49 = vld [vmem:[%s3409_s0 + $0x610] sm:$0xff]  ;;  %v427_v7 = vld [vmem:[%s3408_s1 + $0x4e8] sm:$0xff] }
  0x43   :  { %996 = vmatpush.msrb.mxu3 %v386_v14  ;;  %866 = vmatpush.msrb.mxu1 %v354_v15  ;;  %v2277_v13 = vld [vmem:[%s3410_s2] ss:$0 sm:$0xff] }
  0x44   :  { %623 = vmatmul.f32.gmra.mxu1 %v79_v50  ;;  %932 = vmatpush.msrb.mxu2 %v369_v20  ;;  %v207_v50 = vld [vmem:[%s3409_s0 + $0x608] sm:$0xff]  ;;  %v410_v14 = vld [vmem:[%s3408_s1 + $0x460] sm:$0xff] }
  0x45   :  { %753 = vmatmul.f32.gmra.mxu3 %v81_v51  ;;  %802 = vmatpush.msrb.mxu0 %v337_v21  ;;  %v209_v51 = vld [vmem:[%s3409_s0 + $0x618] sm:$0xff]  ;;  %v458_v15 = vld [vmem:[%s3408_s1 + $0x5e0] sm:$0xff] }
  0x46   :  { %997 = vmatpush.msrb.mxu3 %v385_v22  ;;  %867 = vmatpush.msrb.mxu1 %v353_v23  ;;  %v19_v22 = vld [vmem:[%s3409_s0 + $0x28] sm:$0xff] }
  0x47   :  { %933 = vmatpush.msrb.mxu2 %v368_v28  ;;  %803 = vmatpush.msrb.mxu0 %v336_v29  ;;  %v457_v28 = vld [vmem:[%s3408_s1 + $0x5d8] sm:$0xff] }
  0x48   :  { %998 = vmatpush.msrb.mxu3 %v384_v30  ;;  %868 = vmatpush.msrb.mxu1 %v352_v31  ;;  %v425_v30 = vld [vmem:[%s3408_s1 + $0x4d8] sm:$0xff] }
  0x49   :  { %934 = vmatpush.msrb.mxu2 %v367_v36  ;;  %804 = vmatpush.msrb.mxu0 %v335_v37 }
  0x4a   :  { %561 = vmatmul.f32.gmra.mxu0 %v94_v56  ;;  %691 = vmatmul.f32.gmra.mxu2 %v96_v57  ;;  %v222_v56 = vld [vmem:[%s3409_s0 + $0x680] sm:$0xff]  ;;  %v224_v57 = vld [vmem:[%s3409_s0 + $0x690] sm:$0xff] }
  0x4b   :  { %999 = vmatpush.msrb.mxu3 %v383_v38  ;;  %869 = vmatpush.msrb.mxu1 %v351_v39  ;;  %v35_v38 = vld [vmem:[%s3409_s0 + $0xa8] sm:$0xff] }
  0x4c   :  { %626 = vmatmul.f32.gmra.mxu1 %v95_v58  ;;  %935 = vmatpush.msrb.mxu2 %v366_v44  ;;  %v223_v58 = vld [vmem:[%s3409_s0 + $0x688] sm:$0xff]  ;;  %v456_v44 = vld [vmem:[%s3408_s1 + $0x5d0] sm:$0xff] }
  0x4d   :  { %756 = vmatmul.f32.gmra.mxu3 %v97_v59  ;;  %805 = vmatpush.msrb.mxu0 %v334_v45  ;;  %v225_v59 = vld [vmem:[%s3409_s0 + $0x698] sm:$0xff] }
  0x4e   :  { %1000 = vmatpush.msrb.mxu3 %v382_v46  ;;  %870 = vmatpush.msrb.mxu1 %v350_v47  ;;  %v424_v46 = vld [vmem:[%s3408_s1 + $0x4d0] sm:$0xff] }
  0x4f   :  { %1180 = vmatpush.msra.mxu2 %v445_v52  ;;  %1050 = vmatpush.msra.mxu0 %v413_v53 }
  0x50   :  { %1245 = vmatpush.msra.mxu3 %v461_v54  ;;  %1115 = vmatpush.msra.mxu1 %v429_v55  ;;  %v51_v54 = vld [vmem:[%s3409_s0 + $0x128] sm:$0xff] }
  0x51   :  { %1181 = vmatpush.msra.mxu2 %v444_v60  ;;  %1051 = vmatpush.msra.mxu0 %v412_v61  ;;  %v455_v60 = vld [vmem:[%s3408_s1 + $0x5c8] sm:$0xff] }
  0x52   :  { %564 = vmatmul.f32.gmra.mxu0 %v110_v0  ;;  %694 = vmatmul.f32.gmra.mxu2 %v112_v1  ;;  %v238_v0 = vld [vmem:[%s3409_s0 + $0x700] sm:$0xff]  ;;  %v240_v1 = vld [vmem:[%s3409_s0 + $0x710] sm:$0xff] }
  0x53   :  { %1246 = vmatpush.msra.mxu3 %v460_v62  ;;  %1116 = vmatpush.msra.mxu1 %v428_v63  ;;  %v423_v62 = vld [vmem:[%s3408_s1 + $0x4c8] sm:$0xff] }
  0x54   :  { %629 = vmatmul.f32.gmra.mxu1 %v111_v2  ;;  %v239_v2 = vld [vmem:[%s3409_s0 + $0x708] sm:$0xff]  ;;  %1182 = vmatpush.msra.mxu2 %v443_v4 }
  0x55   :  { %759 = vmatmul.f32.gmra.mxu3 %v113_v3  ;;  %v241_v3 = vld [vmem:[%s3409_s0 + $0x718] sm:$0xff]  ;;  %1052 = vmatpush.msra.mxu0 %v411_v5 }
  0x56   :  { %1247 = vmatpush.msra.mxu3 %v459_v6  ;;  %1117 = vmatpush.msra.mxu1 %v427_v7  ;;  %v67_v6 = vld [vmem:[%s3409_s0 + $0x1a8] sm:$0xff] }
  0x57   :  { %1183 = vmatpush.msra.mxu2 %v442_v12  ;;  %1053 = vmatpush.msra.mxu0 %v410_v14  ;;  %v454_v12 = vld [vmem:[%s3408_s1 + $0x5c0] sm:$0xff] }
  0x58   :  { %1248 = vmatpush.msra.mxu3 %v458_v15  ;;  %v422_v15 = vld [vmem:[%s3408_s1 + $0x4c0] sm:$0xff] }
  0x5a   :  { %567 = vmatmul.f32.gmra.mxu0 %v126_v8  ;;  %697 = vmatmul.f32.gmra.mxu2 %v128_v9  ;;  %v254_v8 = vld [vmem:[%s3409_s0 + $0x780] sm:$0xff]  ;;  %v256_v9 = vld [vmem:[%s3409_s0 + $0x790] sm:$0xff] }
  0x5b   :  { %1249 = vmatpush.msra.mxu3 %v457_v28  ;;  %v405_v28 = vld [vmem:[%s3408_s1 + $0x438] sm:$0xff] }
  0x5c   :  { %632 = vmatmul.f32.gmra.mxu1 %v127_v10  ;;  %v255_v10 = vld [vmem:[%s3409_s0 + $0x788] sm:$0xff] }
  0x5d   :  { %762 = vmatmul.f32.gmra.mxu3 %v129_v11  ;;  %v257_v11 = vld [vmem:[%s3409_s0 + $0x798] sm:$0xff] }
  0x5e   :  { %1250 = vmatpush.msra.mxu3 %v456_v44 }
  0x60   :  { %1251 = vmatpush.msra.mxu3 %v455_v60  ;;  %v435_v60 = vld [vmem:[%s3408_s1 + $0x528] sm:$0xff] }
  0x62   :  { %570 = vmatmul.f32.gmra.mxu0 %v142_v16  ;;  %700 = vmatmul.f32.gmra.mxu2 %v144_v17  ;;  %v426_v16 = vld [vmem:[%s3408_s1 + $0x4e0] sm:$0xff] }
  0x63   :  { %1118 = vmatpush.msra.mxu1 %v426_v16  ;;  %1252 = vmatpush.msra.mxu3 %v454_v12  ;;  %v133_v12 = vld [vmem:[%s3409_s0 + $0x3b8] sm:$0xff] }
  0x64   :  { %635 = vmatmul.f32.gmra.mxu1 %v143_v18  ;;  %v18_v18 = vld [vmem:[%s3409_s0 + $0x20] sm:$0xff] }
  0x65   :  { %765 = vmatmul.f32.gmra.mxu3 %v145_v19  ;;  %v20_v19 = vld [vmem:[%s3409_s0 + $0x30] sm:$0xff]  ;;  %1119 = vmatpush.msra.mxu1 %v425_v30 }
  0x67   :  { %1120 = vmatpush.msra.mxu1 %v424_v46  ;;  %v452_v46 = vld [vmem:[%s3408_s1 + $0x5b0] sm:$0xff] }
  0x69   :  { %1121 = vmatpush.msra.mxu1 %v423_v62  ;;  %v403_v62 = vld [vmem:[%s3408_s1 + $0x428] sm:$0xff] }
  0x6a   :  { %573 = vmatmul.f32.gmra.mxu0 %v158_v24  ;;  %703 = vmatmul.f32.gmra.mxu2 %v160_v25  ;;  %v21_v24 = vld [vmem:[%s3409_s0 + $0x38] sm:$0xff] }
  0x6b   :  { %v441_v25 = vld [vmem:[%s3408_s1 + $0x558] sm:$0xff]  ;;  %1122 = vmatpush.msra.mxu1 %v422_v15 }
  0x6c   :  { %638 = vmatmul.f32.gmra.mxu1 %v159_v26  ;;  %1184 = vmatpush.msra.mxu2 %v441_v25  ;;  %v85_v25 = vld [vmem:[%s3409_s0 + $0x238] sm:$0xff] }
  0x6d   :  { %768 = vmatmul.f32.gmra.mxu3 %v161_v27  ;;  %v409_v27 = vld [vmem:[%s3408_s1 + $0x458] sm:$0xff] }
  0x6e   :  { %1054 = vmatpush.msra.mxu0 %v409_v27 }
  0x72   :  { %576 = vmatmul.f32.gmra.mxu0 %v174_v32  ;;  %706 = vmatmul.f32.gmra.mxu2 %v176_v33  ;;  %v34_v32 = vld [vmem:[%s3409_s0 + $0xa0] sm:$0xff]  ;;  %v36_v33 = vld [vmem:[%s3409_s0 + $0xb0] sm:$0xff] }
  0x74   :  { %641 = vmatmul.f32.gmra.mxu1 %v175_v34 }
  0x75   :  { %771 = vmatmul.f32.gmra.mxu3 %v177_v35 }
  0x7a   :  { %579 = vmatmul.f32.gmra.mxu0 %v190_v40  ;;  %709 = vmatmul.f32.gmra.mxu2 %v192_v41  ;;  %v37_v40 = vld [vmem:[%s3409_s0 + $0xb8] sm:$0xff]  ;;  %v440_v41 = vld [vmem:[%s3408_s1 + $0x550] sm:$0xff] }
  0x7b   :  { %1185 = vmatpush.msra.mxu2 %v440_v41 }
  0x7c   :  { %644 = vmatmul.f32.gmra.mxu1 %v191_v42 }
  0x7d   :  { %774 = vmatmul.f32.gmra.mxu3 %v193_v43  ;;  %v408_v43 = vld [vmem:[%s3408_s1 + $0x450] sm:$0xff] }
  0x7e   :  { %1055 = vmatpush.msra.mxu0 %v408_v43  ;;  %v436_v43 = vld [vmem:[%s3408_s1 + $0x530] sm:$0xff] }
  0x82   :  { %582 = vmatmul.f32.gmra.mxu0 %v206_v48  ;;  %712 = vmatmul.f32.gmra.mxu2 %v208_v49  ;;  %v50_v48 = vld [vmem:[%s3409_s0 + $0x120] sm:$0xff]  ;;  %v52_v49 = vld [vmem:[%s3409_s0 + $0x130] sm:$0xff] }
  0x84   :  { %647 = vmatmul.f32.gmra.mxu1 %v207_v50 }
  0x85   :  { %777 = vmatmul.f32.gmra.mxu3 %v209_v51 }
  0x8a   :  { %585 = vmatmul.f32.gmra.mxu0 %v222_v56  ;;  %715 = vmatmul.f32.gmra.mxu2 %v224_v57  ;;  %v53_v56 = vld [vmem:[%s3409_s0 + $0x138] sm:$0xff]  ;;  %v439_v57 = vld [vmem:[%s3408_s1 + $0x548] sm:$0xff] }
  0x8b   :  { %1186 = vmatpush.msra.mxu2 %v439_v57  ;;  %v115_v57 = vld [vmem:[%s3409_s0 + $0x328] sm:$0xff] }
  0x8c   :  { %650 = vmatmul.f32.gmra.mxu1 %v223_v58 }
  0x8d   :  { %780 = vmatmul.f32.gmra.mxu3 %v225_v59  ;;  %v407_v59 = vld [vmem:[%s3408_s1 + $0x448] sm:$0xff] }
  0x8e   :  { %1056 = vmatpush.msra.mxu0 %v407_v59  ;;  %v117_v59 = vld [vmem:[%s3409_s0 + $0x338] sm:$0xff] }
  0x92   :  { %588 = vmatmul.f32.gmra.mxu0 %v238_v0  ;;  %718 = vmatmul.f32.gmra.mxu2 %v240_v1  ;;  %v66_v0 = vld [vmem:[%s3409_s0 + $0x1a0] sm:$0xff]  ;;  %v68_v1 = vld [vmem:[%s3409_s0 + $0x1b0] sm:$0xff] }
  0x94   :  { %653 = vmatmul.f32.gmra.mxu1 %v239_v2 }
  0x95   :  { %783 = vmatmul.f32.gmra.mxu3 %v241_v3 }
  0x9a   :  { %591 = vmatmul.f32.gmra.mxu0 %v254_v8  ;;  %721 = vmatmul.f32.gmra.mxu2 %v256_v9  ;;  %v69_v8 = vld [vmem:[%s3409_s0 + $0x1b8] sm:$0xff]  ;;  %v438_v9 = vld [vmem:[%s3408_s1 + $0x540] sm:$0xff] }
  0x9b   :  { %1187 = vmatpush.msra.mxu2 %v438_v9 }
  0x9c   :  { %656 = vmatmul.f32.gmra.mxu1 %v255_v10 }
  0x9d   :  { %786 = vmatmul.f32.gmra.mxu3 %v257_v11  ;;  %v406_v11 = vld [vmem:[%s3408_s1 + $0x440] sm:$0xff] }
  0x9e   :  { %1057 = vmatpush.msra.mxu0 %v406_v11 }
  0x9f   :  { %v547_v17 = vpop.f32.mrf.mxu0 }
  0xa0   :  { %v548_v20 = vadd.f32 %v2277_v13, %v547_v17  ;;  %v82_v17 = vld [vmem:[%s3409_s0 + $0x220] sm:$0xff]  ;;  %1058 = vmatpush.msra.mxu0 %v405_v28  ;;  %v147_v28 = vld [vmem:[%s3409_s0 + $0x428] sm:$0xff] }
  0xa1   :  { %v612_v21 = vpop.f32.mrf.mxu1 }
  0xa2   :  { %v613_v23 = vadd.f32 %v612_v21, %v548_v20  ;;  %806 = vmatmul.f32.vlgmr.msrb.gmra.mxu0 %v18_v18  ;;  %936 = vmatmul.f32.vlgmr.msrb.gmra.mxu2 %v20_v19  ;;  %v84_v18 = vld [vmem:[%s3409_s0 + $0x230] sm:$0xff] }
  0xa4   :  { %871 = vmatmul.f32.vlgmr.msrb.gmra.mxu1 %v19_v22 }
  0xa5   :  { %1001 = vmatmul.f32.vlgmr.msrb.gmra.mxu3 %v21_v24  ;;  %v677_v26 = vpop.f32.mrf.mxu2 }
  0xa6   :  { %v678_v29 = vadd.f32 %v677_v26, %v613_v23  ;;  %v83_v23 = vld [vmem:[%s3409_s0 + $0x228] sm:$0xff]  ;;  %v437_v26 = vld [vmem:[%s3408_s1 + $0x538] sm:$0xff] }
  0xa7   :  { %v550_v31 = vpop.f32.mrf.mxu0  ;;  %1188 = vmatpush.msra.mxu2 %v437_v26 }
  0xa8   :  { %v551_v34 = vadd.f32 %v2277_v13, %v550_v31  ;;  %v742_v35 = vpop.f32.mrf.mxu3  ;;  %v421_v31 = vld [vmem:[%s3408_s1 + $0x4b8] sm:$0xff] }
  0xa9   :  { %v2320_v36 = vadd.f32 %v742_v35, %v678_v29  ;;  %v615_v37 = vpop.f32.mrf.mxu1  ;;  %v453_v29 = vld [vmem:[%s3408_s1 + $0x5b8] sm:$0xff]  ;;  %1123 = vmatpush.msra.mxu1 %v421_v31  ;;  %1189 = vmatpush.msra.mxu2 %v436_v43 }
  0xaa   :  { %v616_v39 = vadd.f32 %v615_v37, %v551_v34  ;;  %809 = vmatmul.f32.gmra.mxu0 %v34_v32  ;;  %939 = vmatmul.f32.gmra.mxu2 %v36_v33  ;;  %v98_v33 = vld [vmem:[%s3409_s0 + $0x2a0] sm:$0xff]  ;;  %v100_v34 = vld [vmem:[%s3409_s0 + $0x2b0] sm:$0xff]  ;;  %v433_v31 = vld [vmem:[%s3408_s1 + $0x518] sm:$0xff] }
  0xab   :  { %1253 = vmatpush.msra.mxu3 %v453_v29  ;;  %1190 = vmatpush.msra.mxu2 %v435_v60 }
  0xac   :  { %874 = vmatmul.f32.gmra.mxu1 %v35_v38 }
  0xad   :  { %1004 = vmatmul.f32.gmra.mxu3 %v37_v40  ;;  %v680_v42 = vpop.f32.mrf.mxu2  ;;  %v99_v40 = vld [vmem:[%s3409_s0 + $0x2a8] sm:$0xff] }
  0xae   :  { %v681_v45 = vadd.f32 %v680_v42, %v616_v39  ;;  %v101_v42 = vld [vmem:[%s3409_s0 + $0x2b8] sm:$0xff]  ;;  %1254 = vmatpush.msra.mxu3 %v452_v46  ;;  %v163_v46 = vld [vmem:[%s3409_s0 + $0x4a8] sm:$0xff] }
  0xaf   :  { %v553_v47 = vpop.f32.mrf.mxu0 }
  0xb0   :  { %v554_v50 = vadd.f32 %v2277_v13, %v553_v47  ;;  %v745_v51 = vpop.f32.mrf.mxu3 }
  0xb1   :  { %v2347_v52 = vadd.f32 %v745_v51, %v681_v45  ;;  %v618_v53 = vpop.f32.mrf.mxu1  ;;  %v404_v45 = vld [vmem:[%s3408_s1 + $0x430] sm:$0xff] }
  0xb2   :  { %v619_v55 = vadd.f32 %v618_v53, %v554_v50  ;;  %812 = vmatmul.f32.gmra.mxu0 %v50_v48  ;;  %942 = vmatmul.f32.gmra.mxu2 %v52_v49  ;;  %v420_v48 = vld [vmem:[%s3408_s1 + $0x4b0] sm:$0xff]  ;;  %v114_v50 = vld [vmem:[%s3409_s0 + $0x320] sm:$0xff] }
  0xb3   :  { %1059 = vmatpush.msra.mxu0 %v404_v45  ;;  %v116_v51 = vld [vmem:[%s3409_s0 + $0x330] sm:$0xff]  ;;  %1124 = vmatpush.msra.mxu1 %v420_v48  ;;  %v165_v48 = vld [vmem:[%s3409_s0 + $0x4b8] sm:$0xff] }
  0xb4   :  { %877 = vmatmul.f32.gmra.mxu1 %v51_v54 }
  0xb5   :  { %1007 = vmatmul.f32.gmra.mxu3 %v53_v56  ;;  %v683_v58 = vpop.f32.mrf.mxu2  ;;  %1060 = vmatpush.msra.mxu0 %v403_v62 }
  0xb6   :  { %v684_v61 = vadd.f32 %v683_v58, %v619_v55 }
  0xb7   :  { %v556_v63 = vpop.f32.mrf.mxu0 }
  0xb8   :  { %v557_v2 = vadd.f32 %v2277_v13, %v556_v63  ;;  %v748_v3 = vpop.f32.mrf.mxu3  ;;  %v451_v63 = vld [vmem:[%s3408_s1 + $0x5a8] sm:$0xff] }
  0xb9   :  { %v2374_v4 = vadd.f32 %v748_v3, %v684_v61  ;;  %v621_v5 = vpop.f32.mrf.mxu1  ;;  %1255 = vmatpush.msra.mxu3 %v451_v63  ;;  %v130_v3 = vld [vmem:[%s3409_s0 + $0x3a0] sm:$0xff] }
  0xba   :  { %v622_v7 = vadd.f32 %v621_v5, %v557_v2  ;;  %815 = vmatmul.f32.gmra.mxu0 %v66_v0  ;;  %945 = vmatmul.f32.gmra.mxu2 %v68_v1  ;;  %v419_v1 = vld [vmem:[%s3408_s1 + $0x4a8] sm:$0xff]  ;;  %v132_v5 = vld [vmem:[%s3409_s0 + $0x3b0] sm:$0xff] }
  0xbb   :  { %1125 = vmatpush.msra.mxu1 %v419_v1 }
  0xbc   :  { %880 = vmatmul.f32.gmra.mxu1 %v67_v6 }
  0xbd   :  { %1010 = vmatmul.f32.gmra.mxu3 %v69_v8  ;;  %v686_v10 = vpop.f32.mrf.mxu2 }
  0xbe   :  { %v687_v14 = vadd.f32 %v686_v10, %v622_v7  ;;  %v131_v10 = vld [vmem:[%s3409_s0 + $0x3a8] sm:$0xff] }
  0xbf   :  { %v559_v16 = vpop.f32.mrf.mxu0 }
  0xc0   :  { %v560_v19 = vadd.f32 %v2277_v13, %v559_v16  ;;  %v751_v20 = vpop.f32.mrf.mxu3  ;;  %v402_v16 = vld [vmem:[%s3408_s1 + $0x420] sm:$0xff] }
  0xc1   :  { %v2401_v21 = vadd.f32 %v751_v20, %v687_v14  ;;  %v624_v22 = vpop.f32.mrf.mxu1  ;;  %v434_v14 = vld [vmem:[%s3408_s1 + $0x520] sm:$0xff]  ;;  %1061 = vmatpush.msra.mxu0 %v402_v16 }
  0xc2   :  { %v625_v24 = vadd.f32 %v624_v22, %v560_v19  ;;  %818 = vmatmul.f32.gmra.mxu0 %v82_v17  ;;  %948 = vmatmul.f32.gmra.mxu2 %v84_v18  ;;  %v450_v17 = vld [vmem:[%s3408_s1 + $0x5a0] sm:$0xff] }
  0xc3   :  { %1191 = vmatpush.msra.mxu2 %v434_v14  ;;  %1256 = vmatpush.msra.mxu3 %v450_v17  ;;  %v418_v19 = vld [vmem:[%s3408_s1 + $0x4a0] sm:$0xff]  ;;  %v196_v14 = vld [vmem:[%s3409_s0 + $0x5b0] sm:$0xff] }
  0xc4   :  { %883 = vmatmul.f32.gmra.mxu1 %v83_v23  ;;  %v146_v22 = vld [vmem:[%s3409_s0 + $0x420] sm:$0xff]  ;;  %v148_v23 = vld [vmem:[%s3409_s0 + $0x430] sm:$0xff] }
  0xc5   :  { %1013 = vmatmul.f32.gmra.mxu3 %v85_v25  ;;  %v689_v27 = vpop.f32.mrf.mxu2  ;;  %1126 = vmatpush.msra.mxu1 %v418_v19  ;;  %v195_v19 = vld [vmem:[%s3409_s0 + $0x5a8] sm:$0xff] }
  0xc6   :  { %v690_v30 = vadd.f32 %v689_v27, %v625_v24  ;;  %1192 = vmatpush.msra.mxu2 %v433_v31  ;;  %v210_v31 = vld [vmem:[%s3409_s0 + $0x620] sm:$0xff] }
  0xc7   :  { %v562_v32 = vpop.f32.mrf.mxu0 }
  0xc8   :  { %v563_v35 = vadd.f32 %v2277_v13, %v562_v32  ;;  %v754_v37 = vpop.f32.mrf.mxu3 }
  0xc9   :  { %v2428_v38 = vadd.f32 %v754_v37, %v690_v30  ;;  %v627_v39 = vpop.f32.mrf.mxu1  ;;  %v149_v30 = vld [vmem:[%s3409_s0 + $0x438] sm:$0xff] }
  0xca   :  { %v628_v41 = vadd.f32 %v627_v39, %v563_v35  ;;  %821 = vmatmul.f32.gmra.mxu0 %v98_v33  ;;  %951 = vmatmul.f32.gmra.mxu2 %v100_v34  ;;  %v401_v33 = vld [vmem:[%s3408_s1 + $0x418] sm:$0xff] }
  0xcb   :  { %v449_v34 = vld [vmem:[%s3408_s1 + $0x598] sm:$0xff]  ;;  %1062 = vmatpush.msra.mxu0 %v401_v33 }
  0xcc   :  { %886 = vmatmul.f32.gmra.mxu1 %v99_v40  ;;  %1257 = vmatpush.msra.mxu3 %v449_v34  ;;  %v417_v37 = vld [vmem:[%s3408_s1 + $0x498] sm:$0xff]  ;;  %v162_v40 = vld [vmem:[%s3409_s0 + $0x4a0] sm:$0xff] }
  0xcd   :  { %1016 = vmatmul.f32.gmra.mxu3 %v101_v42  ;;  %v692_v44 = vpop.f32.mrf.mxu2  ;;  %1127 = vmatpush.msra.mxu1 %v417_v37 }
  0xce   :  { %v693_v47 = vadd.f32 %v692_v44, %v628_v41  ;;  %v164_v41 = vld [vmem:[%s3409_s0 + $0x4b0] sm:$0xff] }
  0xcf   :  { %v565_v49 = vpop.f32.mrf.mxu0 }
  0xd0   :  { %v566_v53 = vadd.f32 %v2277_v13, %v565_v49  ;;  %v757_v54 = vpop.f32.mrf.mxu3  ;;  %v432_v49 = vld [vmem:[%s3408_s1 + $0x510] sm:$0xff] }
  0xd1   :  { %v2455_v55 = vadd.f32 %v757_v54, %v693_v47  ;;  %v630_v56 = vpop.f32.mrf.mxu1  ;;  %1193 = vmatpush.msra.mxu2 %v432_v49 }
  0xd2   :  { %v631_v58 = vadd.f32 %v630_v56, %v566_v53  ;;  %824 = vmatmul.f32.gmra.mxu0 %v114_v50  ;;  %954 = vmatmul.f32.gmra.mxu2 %v116_v51  ;;  %v400_v51 = vld [vmem:[%s3408_s1 + $0x410] sm:$0xff] }
  0xd3   :  { %v448_v53 = vld [vmem:[%s3408_s1 + $0x590] sm:$0xff]  ;;  %1063 = vmatpush.msra.mxu0 %v400_v51 }
  0xd4   :  { %889 = vmatmul.f32.gmra.mxu1 %v115_v57  ;;  %1258 = vmatpush.msra.mxu3 %v448_v53  ;;  %v416_v56 = vld [vmem:[%s3408_s1 + $0x490] sm:$0xff] }
  0xd5   :  { %1019 = vmatmul.f32.gmra.mxu3 %v117_v59  ;;  %v695_v61 = vpop.f32.mrf.mxu2  ;;  %v180_v59 = vld [vmem:[%s3409_s0 + $0x530] sm:$0xff]  ;;  %1128 = vmatpush.msra.mxu1 %v416_v56 }
  0xd6   :  { %v696_v0 = vadd.f32 %v695_v61, %v631_v58  ;;  %v178_v58 = vld [vmem:[%s3409_s0 + $0x520] sm:$0xff]  ;;  %v228_v51 = vld [vmem:[%s3409_s0 + $0x6b0] sm:$0xff] }
  0xd7   :  { %v568_v2 = vpop.f32.mrf.mxu0 }
  0xd8   :  { %v569_v6 = vadd.f32 %v2277_v13, %v568_v2  ;;  %v760_v7 = vpop.f32.mrf.mxu3  ;;  %v181_v2 = vld [vmem:[%s3409_s0 + $0x538] sm:$0xff] }
  0xd9   :  { %v2482_v8 = vadd.f32 %v760_v7, %v696_v0  ;;  %v633_v9 = vpop.f32.mrf.mxu1  ;;  %v179_v0 = vld [vmem:[%s3409_s0 + $0x528] sm:$0xff] }
  0xda   :  { %v634_v11 = vadd.f32 %v633_v9, %v569_v6  ;;  %827 = vmatmul.f32.gmra.mxu0 %v130_v3  ;;  %957 = vmatmul.f32.gmra.mxu2 %v132_v5  ;;  %v431_v3 = vld [vmem:[%s3408_s1 + $0x508] sm:$0xff] }
  0xdb   :  { %1194 = vmatpush.msra.mxu2 %v431_v3  ;;  %v399_v6 = vld [vmem:[%s3408_s1 + $0x408] sm:$0xff]  ;;  %v492_v3 = vld [vmem:[%s3408_s1 + $0x6f0] sm:$0xff] }
  0xdc   :  { %892 = vmatmul.f32.gmra.mxu1 %v131_v10  ;;  %v447_v7 = vld [vmem:[%s3408_s1 + $0x588] sm:$0xff]  ;;  %1064 = vmatpush.msra.mxu0 %v399_v6  ;;  %v242_v6 = vld [vmem:[%s3409_s0 + $0x720] sm:$0xff] }
  0xdd   :  { %1022 = vmatmul.f32.gmra.mxu3 %v133_v12  ;;  %v698_v15 = vpop.f32.mrf.mxu2  ;;  %v415_v10 = vld [vmem:[%s3408_s1 + $0x488] sm:$0xff]  ;;  %v194_v12 = vld [vmem:[%s3409_s0 + $0x5a0] sm:$0xff] }
  0xde   :  { %v699_v18 = vadd.f32 %v698_v15, %v634_v11  ;;  %1259 = vmatpush.msra.mxu3 %v447_v7  ;;  %1129 = vmatpush.msra.mxu1 %v415_v10  ;;  %v244_v7 = vld [vmem:[%s3409_s0 + $0x730] sm:$0xff] }
  0xdf   :  { %v571_v20 = vpop.f32.mrf.mxu0 }
  0xe0   :  { %v572_v24 = vadd.f32 %v2277_v13, %v571_v20  ;;  %v763_v25 = vpop.f32.mrf.mxu3 }
  0xe1   :  { %v2509_v26 = vadd.f32 %v763_v25, %v699_v18  ;;  %v636_v27 = vpop.f32.mrf.mxu1  ;;  %v398_v25 = vld [vmem:[%s3408_s1 + $0x400] sm:$0xff] }
  0xe2   :  { %v637_v29 = vadd.f32 %v636_v27, %v572_v24  ;;  %830 = vmatmul.f32.gmra.mxu0 %v146_v22  ;;  %960 = vmatmul.f32.gmra.mxu2 %v148_v23  ;;  %v197_v22 = vld [vmem:[%s3409_s0 + $0x5b8] sm:$0xff]  ;;  %v430_v23 = vld [vmem:[%s3408_s1 + $0x500] sm:$0xff] }
  0xe3   :  { %1195 = vmatpush.msra.mxu2 %v430_v23  ;;  %v446_v27 = vld [vmem:[%s3408_s1 + $0x580] sm:$0xff]  ;;  %1065 = vmatpush.msra.mxu0 %v398_v25 }
  0xe4   :  { %895 = vmatmul.f32.gmra.mxu1 %v147_v28  ;;  %1260 = vmatpush.msra.mxu3 %v446_v27  ;;  %v258_v27 = vld [vmem:[%s3409_s0 + $0x7a0] sm:$0xff] }
  0xe5   :  { %1025 = vmatmul.f32.gmra.mxu3 %v149_v30  ;;  %v701_v32 = vpop.f32.mrf.mxu2 }
  0xe6   :  { %v702_v35 = vadd.f32 %v701_v32, %v637_v29  ;;  %v414_v29 = vld [vmem:[%s3408_s1 + $0x480] sm:$0xff]  ;;  %v212_v32 = vld [vmem:[%s3409_s0 + $0x630] sm:$0xff] }
  0xe7   :  { %v574_v39 = vpop.f32.mrf.mxu0  ;;  %1130 = vmatpush.msra.mxu1 %v414_v29 }
  0xe8   :  { %v575_v42 = vadd.f32 %v2277_v13, %v574_v39  ;;  %v766_v43 = vpop.f32.mrf.mxu3  ;;  %v211_v39 = vld [vmem:[%s3409_s0 + $0x628] sm:$0xff] }
  0xe9   :  { %v2536_v44 = vadd.f32 %v766_v43, %v702_v35  ;;  %v639_v45 = vpop.f32.mrf.mxu1 }
  0xea   :  { %v640_v47 = vadd.f32 %v639_v45, %v575_v42  ;;  %833 = vmatmul.f32.gmra.mxu0 %v162_v40  ;;  %963 = vmatmul.f32.gmra.mxu2 %v164_v41  ;;  %v213_v41 = vld [vmem:[%s3409_s0 + $0x638] sm:$0xff] }
  0xeb   :  { %v509_v42 = vld [vmem:[%s3408_s1 + $0x778] sm:$0xff] }
  0xec   :  { %898 = vmatmul.f32.gmra.mxu1 %v163_v46  ;;  %1440 = vmatpush.msrb.mxu2 %v509_v42  ;;  %v477_v45 = vld [vmem:[%s3408_s1 + $0x678] sm:$0xff] }
  0xed   :  { %1028 = vmatmul.f32.gmra.mxu3 %v165_v48  ;;  %v704_v50 = vpop.f32.mrf.mxu2  ;;  %v525_v46 = vld [vmem:[%s3408_s1 + $0x7f8] sm:$0xff]  ;;  %1310 = vmatpush.msrb.mxu0 %v477_v45 }
  0xee   :  { %v705_v54 = vadd.f32 %v704_v50, %v640_v47  ;;  %1505 = vmatpush.msrb.mxu3 %v525_v46  ;;  %v493_v48 = vld [vmem:[%s3408_s1 + $0x6f8] sm:$0xff]  ;;  %v226_v50 = vld [vmem:[%s3409_s0 + $0x6a0] sm:$0xff] }
  0xef   :  { %v577_v57 = vpop.f32.mrf.mxu0  ;;  %1375 = vmatpush.msrb.mxu1 %v493_v48  ;;  %v22_v46 = vld [vmem:[%s3409_s0 + $0x40] sm:$0xff] }
  0xf0   :  { %v578_v60 = vadd.f32 %v2277_v13, %v577_v57  ;;  %v769_v61 = vpop.f32.mrf.mxu3 }
  0xf1   :  { %v2563_v62 = vadd.f32 %v769_v61, %v705_v54  ;;  %v642_v63 = vpop.f32.mrf.mxu1  ;;  %v508_v61 = vld [vmem:[%s3408_s1 + $0x770] sm:$0xff]  ;;  %1376 = vmatpush.msrb.mxu1 %v492_v3 }
  0xf2   :  { %v643_v1 = vadd.f32 %v642_v63, %v578_v60  ;;  %836 = vmatmul.f32.gmra.mxu0 %v178_v58  ;;  %966 = vmatmul.f32.gmra.mxu2 %v180_v59  ;;  %v227_v58 = vld [vmem:[%s3409_s0 + $0x6a8] sm:$0xff]  ;;  %v229_v60 = vld [vmem:[%s3409_s0 + $0x6b8] sm:$0xff] }
  0xf3   :  { %1441 = vmatpush.msrb.mxu2 %v508_v61 }
  0xf4   :  { %901 = vmatmul.f32.gmra.mxu1 %v179_v0  ;;  %v476_v0 = vld [vmem:[%s3408_s1 + $0x670] sm:$0xff] }
  0xf5   :  { %1031 = vmatmul.f32.gmra.mxu3 %v181_v2  ;;  %v707_v5 = vpop.f32.mrf.mxu2  ;;  %1311 = vmatpush.msrb.mxu0 %v476_v0 }
  0xf6   :  { %v708_v9 = vadd.f32 %v707_v5, %v643_v1  ;;  %v524_v1 = vld [vmem:[%s3408_s1 + $0x7f0] sm:$0xff] }
  0xf7   :  { %v580_v11 = vpop.f32.mrf.mxu0  ;;  %1506 = vmatpush.msrb.mxu3 %v524_v1  ;;  %v38_v1 = vld [vmem:[%s3409_s0 + $0xc0] sm:$0xff] }
  0xf8   :  { %v581_v15 = vadd.f32 %v2277_v13, %v580_v11  ;;  %v772_v16 = vpop.f32.mrf.mxu3 }
  0xf9   :  { %v2590_v17 = vadd.f32 %v772_v16, %v708_v9  ;;  %v645_v18 = vpop.f32.mrf.mxu1  ;;  %v245_v16 = vld [vmem:[%s3409_s0 + $0x738] sm:$0xff] }
  0xfa   :  { %v646_v20 = vadd.f32 %v645_v18, %v581_v15  ;;  %839 = vmatmul.f32.gmra.mxu0 %v194_v12  ;;  %969 = vmatmul.f32.gmra.mxu2 %v196_v14  ;;  %v243_v14 = vld [vmem:[%s3409_s0 + $0x728] sm:$0xff] }
  0xfb   :  { %v507_v18 = vld [vmem:[%s3408_s1 + $0x768] sm:$0xff] }
  0xfc   :  { %904 = vmatmul.f32.gmra.mxu1 %v195_v19  ;;  %1442 = vmatpush.msrb.mxu2 %v507_v18 }
  0xfd   :  { %1034 = vmatmul.f32.gmra.mxu3 %v197_v22  ;;  %v710_v24 = vpop.f32.mrf.mxu2  ;;  %v523_v22 = vld [vmem:[%s3408_s1 + $0x7e8] sm:$0xff] }
  0xfe   :  { %v711_v28 = vadd.f32 %v710_v24, %v646_v20  ;;  %v475_v20 = vld [vmem:[%s3408_s1 + $0x668] sm:$0xff]  ;;  %1507 = vmatpush.msrb.mxu3 %v523_v22  ;;  %v54_v22 = vld [vmem:[%s3409_s0 + $0x140] sm:$0xff] }
  0xff   :  { %v583_v30 = vpop.f32.mrf.mxu0  ;;  %1312 = vmatpush.msrb.mxu0 %v475_v20  ;;  %v491_v24 = vld [vmem:[%s3408_s1 + $0x6e8] sm:$0xff] }
 0x100   :  { %v584_v33 = vadd.f32 %v2277_v13, %v583_v30  ;;  %v775_v34 = vpop.f32.mrf.mxu3  ;;  %1377 = vmatpush.msrb.mxu1 %v491_v24 }
 0x101   :  { %v2617_v35 = vadd.f32 %v775_v34, %v711_v28  ;;  %v648_v37 = vpop.f32.mrf.mxu1  ;;  %v260_v28 = vld [vmem:[%s3409_s0 + $0x7b0] sm:$0xff] }
 0x102   :  { %v649_v40 = vadd.f32 %v648_v37, %v584_v33  ;;  %842 = vmatmul.f32.gmra.mxu0 %v210_v31  ;;  %972 = vmatmul.f32.gmra.mxu2 %v212_v32  ;;  %v259_v33 = vld [vmem:[%s3409_s0 + $0x7a8] sm:$0xff]  ;;  %v261_v37 = vld [vmem:[%s3409_s0 + $0x7b8] sm:$0xff] }
 0x104   :  { %907 = vmatmul.f32.gmra.mxu1 %v211_v39  ;;  %v506_v39 = vld [vmem:[%s3408_s1 + $0x760] sm:$0xff] }
 0x105   :  { %1037 = vmatmul.f32.gmra.mxu3 %v213_v41  ;;  %v713_v43 = vpop.f32.mrf.mxu2  ;;  %1443 = vmatpush.msrb.mxu2 %v506_v39  ;;  %v522_v41 = vld [vmem:[%s3408_s1 + $0x7e0] sm:$0xff] }
 0x106   :  { %v714_v47 = vadd.f32 %v713_v43, %v649_v40  ;;  %v474_v40 = vld [vmem:[%s3408_s1 + $0x660] sm:$0xff]  ;;  %1508 = vmatpush.msrb.mxu3 %v522_v41 }
 0x107   :  { %v586_v49 = vpop.f32.mrf.mxu0  ;;  %1313 = vmatpush.msrb.mxu0 %v474_v40  ;;  %v490_v43 = vld [vmem:[%s3408_s1 + $0x6e0] sm:$0xff] }
 0x108   :  { %v587_v53 = vadd.f32 %v2277_v13, %v586_v49  ;;  %v778_v54 = vpop.f32.mrf.mxu3  ;;  %1378 = vmatpush.msrb.mxu1 %v490_v43  ;;  %v70_v41 = vld [vmem:[%s3409_s0 + $0x1c0] sm:$0xff] }
 0x109   :  { %v2644_v56 = vadd.f32 %v778_v54, %v714_v47  ;;  %v651_v57 = vpop.f32.mrf.mxu1  ;;  %v24_v47 = vld [vmem:[%s3409_s0 + $0x50] sm:$0xff]  ;;  %v25_v54 = vld [vmem:[%s3409_s0 + $0x58] sm:$0xff] }
 0x10a   :  { %v652_v59 = vadd.f32 %v651_v57, %v587_v53  ;;  %845 = vmatmul.f32.gmra.mxu0 %v226_v50  ;;  %975 = vmatmul.f32.gmra.mxu2 %v228_v51  ;;  %v23_v53 = vld [vmem:[%s3409_s0 + $0x48] sm:$0xff]  ;;  %v505_v57 = vld [vmem:[%s3408_s1 + $0x758] sm:$0xff] }
 0x10b   :  { %1444 = vmatpush.msrb.mxu2 %v505_v57  ;;  %v518_v57 = vld [vmem:[%s3408_s1 + $0x7c0] sm:$0xff] }
 0x10c   :  { %910 = vmatmul.f32.gmra.mxu1 %v227_v58 }
 0x10d   :  { %1040 = vmatmul.f32.gmra.mxu3 %v229_v60  ;;  %v716_v63 = vpop.f32.mrf.mxu2  ;;  %v521_v60 = vld [vmem:[%s3408_s1 + $0x7d8] sm:$0xff] }
 0x10e   :  { %v717_v2 = vadd.f32 %v716_v63, %v652_v59  ;;  %v473_v59 = vld [vmem:[%s3408_s1 + $0x658] sm:$0xff]  ;;  %1509 = vmatpush.msrb.mxu3 %v521_v60  ;;  %v86_v60 = vld [vmem:[%s3409_s0 + $0x240] sm:$0xff] }
 0x10f   :  { %v589_v5 = vpop.f32.mrf.mxu0  ;;  %1314 = vmatpush.msrb.mxu0 %v473_v59  ;;  %v489_v63 = vld [vmem:[%s3408_s1 + $0x6d8] sm:$0xff] }
 0x110   :  { %v590_v9 = vadd.f32 %v2277_v13, %v589_v5  ;;  %v781_v10 = vpop.f32.mrf.mxu3  ;;  %1379 = vmatpush.msrb.mxu1 %v489_v63 }
 0x111   :  { %v2671_v11 = vadd.f32 %v781_v10, %v717_v2  ;;  %v654_v12 = vpop.f32.mrf.mxu1  ;;  %v40_v2 = vld [vmem:[%s3409_s0 + $0xd0] sm:$0xff]  ;;  %v41_v10 = vld [vmem:[%s3409_s0 + $0xd8] sm:$0xff] }
 0x112   :  { %v655_v15 = vadd.f32 %v654_v12, %v590_v9  ;;  %848 = vmatmul.f32.gmra.mxu0 %v242_v6  ;;  %978 = vmatmul.f32.gmra.mxu2 %v244_v7  ;;  %v39_v9 = vld [vmem:[%s3409_s0 + $0xc8] sm:$0xff]  ;;  %v504_v12 = vld [vmem:[%s3408_s1 + $0x750] sm:$0xff] }
 0x113   :  { %1445 = vmatpush.msrb.mxu2 %v504_v12  ;;  %v517_v12 = vld [vmem:[%s3408_s1 + $0x7b8] sm:$0xff] }
 0x114   :  { %913 = vmatmul.f32.gmra.mxu1 %v243_v14 }
 0x115   :  { %1043 = vmatmul.f32.gmra.mxu3 %v245_v16  ;;  %v719_v19 = vpop.f32.mrf.mxu2  ;;  %v520_v16 = vld [vmem:[%s3408_s1 + $0x7d0] sm:$0xff] }
 0x116   :  { %v720_v23 = vadd.f32 %v719_v19, %v655_v15  ;;  %v472_v15 = vld [vmem:[%s3408_s1 + $0x650] sm:$0xff]  ;;  %1510 = vmatpush.msrb.mxu3 %v520_v16  ;;  %v102_v16 = vld [vmem:[%s3409_s0 + $0x2c0] sm:$0xff] }
 0x117   :  { %v592_v25 = vpop.f32.mrf.mxu0  ;;  %1315 = vmatpush.msrb.mxu0 %v472_v15  ;;  %v488_v19 = vld [vmem:[%s3408_s1 + $0x6d0] sm:$0xff] }
 0x118   :  { %v593_v29 = vadd.f32 %v2277_v13, %v592_v25  ;;  %v784_v30 = vpop.f32.mrf.mxu3  ;;  %1380 = vmatpush.msrb.mxu1 %v488_v19 }
 0x119   :  { %v2698_v31 = vadd.f32 %v784_v30, %v720_v23  ;;  %v657_v32 = vpop.f32.mrf.mxu1  ;;  %v56_v23 = vld [vmem:[%s3409_s0 + $0x150] sm:$0xff]  ;;  %v57_v30 = vld [vmem:[%s3409_s0 + $0x158] sm:$0xff] }
 0x11a   :  { %v658_v34 = vadd.f32 %v657_v32, %v593_v29  ;;  %851 = vmatmul.f32.gmra.mxu0 %v258_v27  ;;  %981 = vmatmul.f32.gmra.mxu2 %v260_v28  ;;  %v55_v29 = vld [vmem:[%s3409_s0 + $0x148] sm:$0xff] }
 0x11b   :  { %v503_v32 = vld [vmem:[%s3408_s1 + $0x748] sm:$0xff] }
 0x11c   :  { %916 = vmatmul.f32.gmra.mxu1 %v259_v33  ;;  %1446 = vmatpush.msrb.mxu2 %v503_v32  ;;  %v516_v32 = vld [vmem:[%s3408_s1 + $0x7b0] sm:$0xff] }
 0x11d   :  { %1046 = vmatmul.f32.gmra.mxu3 %v261_v37  ;;  %v722_v13 = vpop.f32.mrf.mxu2  ;;  %v519_v37 = vld [vmem:[%s3408_s1 + $0x7c8] sm:$0xff] }
 0x11e   :  { %v723_v42 = vadd.f32 %v722_v13, %v658_v34  ;;  %v471_v34 = vld [vmem:[%s3408_s1 + $0x648] sm:$0xff]  ;;  %1511 = vmatpush.msrb.mxu3 %v519_v37  ;;  %v118_v37 = vld [vmem:[%s3409_s0 + $0x340] sm:$0xff] }
 0x11f   :  { %v807_v45 = vpop.f32.mrf.mxu0  ;;  %1316 = vmatpush.msrb.mxu0 %v471_v34  ;;  %v487_v13 = vld [vmem:[%s3408_s1 + $0x6c8] sm:$0xff] }
 0x120   :  { %v787_v48 = vpop.f32.mrf.mxu3  ;;  %v808_v49 = vadd.f32 %v807_v45, %v2320_v36  ;;  %1381 = vmatpush.msrb.mxu1 %v487_v13  ;;  %1512 = vmatpush.msrb.mxu3 %v518_v57  ;;  %v134_v57 = vld [vmem:[%s3409_s0 + $0x3c0] sm:$0xff] }
 0x121   :  { %v2725_v50 = vadd.f32 %v787_v48, %v723_v42  ;;  %v872_v51 = vpop.f32.mrf.mxu1  ;;  %v72_v42 = vld [vmem:[%s3409_s0 + $0x1d0] sm:$0xff]  ;;  %v71_v48 = vld [vmem:[%s3409_s0 + $0x1c8] sm:$0xff] }
 0x122   :  { %1066 = vmatmul.f32.vlgmr.msra.gmra.mxu0 %v22_v46  ;;  %1196 = vmatmul.f32.vlgmr.msra.gmra.mxu2 %v24_v47  ;;  %v873_v58 = vadd.f32 %v872_v51, %v808_v49  ;;  %v73_v49 = vld [vmem:[%s3409_s0 + $0x1d8] sm:$0xff]  ;;  %v502_v51 = vld [vmem:[%s3408_s1 + $0x740] sm:$0xff] }
 0x123   :  { %1447 = vmatpush.msrb.mxu2 %v502_v51  ;;  %1513 = vmatpush.msrb.mxu3 %v517_v12  ;;  %v515_v51 = vld [vmem:[%s3408_s1 + $0x7a8] sm:$0xff]  ;;  %v150_v12 = vld [vmem:[%s3409_s0 + $0x440] sm:$0xff] }
 0x124   :  { %1131 = vmatmul.f32.vlgmr.msra.gmra.mxu1 %v23_v53 }
 0x125   :  { %1261 = vmatmul.f32.vlgmr.msra.gmra.mxu3 %v25_v54  ;;  %v937_v36 = vpop.f32.mrf.mxu2  ;;  %v470_v54 = vld [vmem:[%s3408_s1 + $0x640] sm:$0xff] }
 0x126   :  { %v938_v61 = vadd.f32 %v937_v36, %v873_v58  ;;  %1317 = vmatpush.msrb.mxu0 %v470_v54  ;;  %v486_v36 = vld [vmem:[%s3408_s1 + $0x6c0] sm:$0xff]  ;;  %1514 = vmatpush.msrb.mxu3 %v516_v32 }
 0x127   :  { %v810_v0 = vpop.f32.mrf.mxu0  ;;  %1382 = vmatpush.msrb.mxu1 %v486_v36  ;;  %v166_v32 = vld [vmem:[%s3409_s0 + $0x4c0] sm:$0xff] }
 0x128   :  { %v811_v3 = vadd.f32 %v810_v0, %v2347_v52  ;;  %v1002_v5 = vpop.f32.mrf.mxu3  ;;  %1515 = vmatpush.msrb.mxu3 %v515_v51  ;;  %v182_v51 = vld [vmem:[%s3409_s0 + $0x540] sm:$0xff] }
 0x129   :  { %v2752_v6 = vadd.f32 %v1002_v5, %v938_v61  ;;  %v875_v7 = vpop.f32.mrf.mxu1  ;;  %v88_v61 = vld [vmem:[%s3409_s0 + $0x250] sm:$0xff]  ;;  %v89_v5 = vld [vmem:[%s3409_s0 + $0x258] sm:$0xff] }
 0x12a   :  { %1069 = vmatmul.f32.gmra.mxu0 %v38_v1  ;;  %1199 = vmatmul.f32.gmra.mxu2 %v40_v2  ;;  %v876_v52 = vadd.f32 %v875_v7, %v811_v3  ;;  %v87_v3 = vld [vmem:[%s3409_s0 + $0x248] sm:$0xff]  ;;  %v501_v7 = vld [vmem:[%s3408_s1 + $0x738] sm:$0xff] }
 0x12b   :  { %1448 = vmatpush.msrb.mxu2 %v501_v7  ;;  %v514_v7 = vld [vmem:[%s3408_s1 + $0x7a0] sm:$0xff] }
 0x12c   :  { %1134 = vmatmul.f32.gmra.mxu1 %v39_v9  ;;  %1516 = vmatpush.msrb.mxu3 %v514_v7  ;;  %v198_v7 = vld [vmem:[%s3409_s0 + $0x5c0] sm:$0xff] }
 0x12d   :  { %1264 = vmatmul.f32.gmra.mxu3 %v41_v10  ;;  %v940_v14 = vpop.f32.mrf.mxu2  ;;  %v469_v10 = vld [vmem:[%s3408_s1 + $0x638] sm:$0xff] }
 0x12e   :  { %v941_v18 = vadd.f32 %v940_v14, %v876_v52  ;;  %1318 = vmatpush.msrb.mxu0 %v469_v10  ;;  %v485_v14 = vld [vmem:[%s3408_s1 + $0x6b8] sm:$0xff] }
 0x12f   :  { %v813_v20 = vpop.f32.mrf.mxu0  ;;  %1383 = vmatpush.msrb.mxu1 %v485_v14 }
 0x130   :  { %v814_v24 = vadd.f32 %v813_v20, %v2374_v4  ;;  %v1005_v25 = vpop.f32.mrf.mxu3 }
 0x131   :  { %v2779_v27 = vadd.f32 %v1005_v25, %v941_v18  ;;  %v878_v28 = vpop.f32.mrf.mxu1  ;;  %v104_v18 = vld [vmem:[%s3409_s0 + $0x2d0] sm:$0xff]  ;;  %v105_v25 = vld [vmem:[%s3409_s0 + $0x2d8] sm:$0xff] }
 0x132   :  { %1072 = vmatmul.f32.gmra.mxu0 %v54_v22  ;;  %1202 = vmatmul.f32.gmra.mxu2 %v56_v23  ;;  %v879_v4 = vadd.f32 %v878_v28, %v814_v24  ;;  %v103_v24 = vld [vmem:[%s3409_s0 + $0x2c8] sm:$0xff]  ;;  %v500_v28 = vld [vmem:[%s3408_s1 + $0x730] sm:$0xff] }
 0x133   :  { %1449 = vmatpush.msrb.mxu2 %v500_v28  ;;  %v513_v28 = vld [vmem:[%s3408_s1 + $0x798] sm:$0xff] }
 0x134   :  { %1137 = vmatmul.f32.gmra.mxu1 %v55_v29  ;;  %1517 = vmatpush.msrb.mxu3 %v513_v28  ;;  %v214_v28 = vld [vmem:[%s3409_s0 + $0x640] sm:$0xff] }
 0x135   :  { %1267 = vmatmul.f32.gmra.mxu3 %v57_v30  ;;  %v943_v33 = vpop.f32.mrf.mxu2  ;;  %v468_v30 = vld [vmem:[%s3408_s1 + $0x630] sm:$0xff] }
 0x136   :  { %v944_v39 = vadd.f32 %v943_v33, %v879_v4  ;;  %1319 = vmatpush.msrb.mxu0 %v468_v30  ;;  %v484_v33 = vld [vmem:[%s3408_s1 + $0x6b0] sm:$0xff] }
 0x137   :  { %v816_v40 = vpop.f32.mrf.mxu0  ;;  %1384 = vmatpush.msrb.mxu1 %v484_v33 }
 0x138   :  { %v817_v43 = vadd.f32 %v816_v40, %v2401_v21  ;;  %v1008_v45 = vpop.f32.mrf.mxu3 }
 0x139   :  { %v2806_v46 = vadd.f32 %v1008_v45, %v944_v39  ;;  %v881_v47 = vpop.f32.mrf.mxu1  ;;  %v120_v39 = vld [vmem:[%s3409_s0 + $0x350] sm:$0xff]  ;;  %v121_v45 = vld [vmem:[%s3409_s0 + $0x358] sm:$0xff] }
 0x13a   :  { %1075 = vmatmul.f32.gmra.mxu0 %v70_v41  ;;  %1205 = vmatmul.f32.gmra.mxu2 %v72_v42  ;;  %v882_v21 = vadd.f32 %v881_v47, %v817_v43  ;;  %v119_v43 = vld [vmem:[%s3409_s0 + $0x348] sm:$0xff] }
 0x13b   :  { %v499_v47 = vld [vmem:[%s3408_s1 + $0x728] sm:$0xff] }
 0x13c   :  { %1140 = vmatmul.f32.gmra.mxu1 %v71_v48  ;;  %1450 = vmatpush.msrb.mxu2 %v499_v47  ;;  %v512_v47 = vld [vmem:[%s3408_s1 + $0x790] sm:$0xff] }
 0x13d   :  { %1270 = vmatmul.f32.gmra.mxu3 %v73_v49  ;;  %v946_v53 = vpop.f32.mrf.mxu2  ;;  %v467_v49 = vld [vmem:[%s3408_s1 + $0x628] sm:$0xff] }
 0x13e   :  { %v947_v58 = vadd.f32 %v946_v53, %v882_v21  ;;  %1320 = vmatpush.msrb.mxu0 %v467_v49  ;;  %v483_v53 = vld [vmem:[%s3408_s1 + $0x6a8] sm:$0xff]  ;;  %1518 = vmatpush.msrb.mxu3 %v512_v47 }
 0x13f   :  { %v819_v59 = vpop.f32.mrf.mxu0  ;;  %1385 = vmatpush.msrb.mxu1 %v483_v53 }
 0x140   :  { %v820_v63 = vadd.f32 %v819_v59, %v2428_v38  ;;  %v1011_v0 = vpop.f32.mrf.mxu3 }
 0x141   :  { %v2833_v1 = vadd.f32 %v1011_v0, %v947_v58  ;;  %v884_v2 = vpop.f32.mrf.mxu1  ;;  %v136_v58 = vld [vmem:[%s3409_s0 + $0x3d0] sm:$0xff]  ;;  %v137_v0 = vld [vmem:[%s3409_s0 + $0x3d8] sm:$0xff] }
 0x142   :  { %1078 = vmatmul.f32.gmra.mxu0 %v86_v60  ;;  %1208 = vmatmul.f32.gmra.mxu2 %v88_v61  ;;  %v885_v38 = vadd.f32 %v884_v2, %v820_v63  ;;  %v135_v63 = vld [vmem:[%s3409_s0 + $0x3c8] sm:$0xff]  ;;  %v498_v2 = vld [vmem:[%s3408_s1 + $0x720] sm:$0xff] }
 0x143   :  { %1451 = vmatpush.msrb.mxu2 %v498_v2  ;;  %v511_v2 = vld [vmem:[%s3408_s1 + $0x788] sm:$0xff] }
 0x144   :  { %1143 = vmatmul.f32.gmra.mxu1 %v87_v3  ;;  %1519 = vmatpush.msrb.mxu3 %v511_v2 }
 0x145   :  { %1273 = vmatmul.f32.gmra.mxu3 %v89_v5  ;;  %v949_v9 = vpop.f32.mrf.mxu2  ;;  %v466_v5 = vld [vmem:[%s3408_s1 + $0x620] sm:$0xff] }
 0x146   :  { %v950_v52 = vadd.f32 %v949_v9, %v885_v38  ;;  %1321 = vmatpush.msrb.mxu0 %v466_v5  ;;  %v482_v9 = vld [vmem:[%s3408_s1 + $0x6a0] sm:$0xff] }
 0x147   :  { %v822_v15 = vpop.f32.mrf.mxu0  ;;  %1386 = vmatpush.msrb.mxu1 %v482_v9 }
 0x148   :  { %v823_v19 = vadd.f32 %v822_v15, %v2455_v55  ;;  %v1014_v20 = vpop.f32.mrf.mxu3 }
 0x149   :  { %v2860_v22 = vadd.f32 %v1014_v20, %v950_v52  ;;  %v887_v23 = vpop.f32.mrf.mxu1  ;;  %v152_v52 = vld [vmem:[%s3409_s0 + $0x450] sm:$0xff]  ;;  %v153_v20 = vld [vmem:[%s3409_s0 + $0x458] sm:$0xff] }
 0x14a   :  { %1081 = vmatmul.f32.gmra.mxu0 %v102_v16  ;;  %1211 = vmatmul.f32.gmra.mxu2 %v104_v18  ;;  %v888_v55 = vadd.f32 %v887_v23, %v823_v19  ;;  %v151_v19 = vld [vmem:[%s3409_s0 + $0x448] sm:$0xff]  ;;  %v497_v23 = vld [vmem:[%s3408_s1 + $0x718] sm:$0xff] }
 0x14b   :  { %1452 = vmatpush.msrb.mxu2 %v497_v23  ;;  %v510_v23 = vld [vmem:[%s3408_s1 + $0x780] sm:$0xff] }
 0x14c   :  { %1146 = vmatmul.f32.gmra.mxu1 %v103_v24  ;;  %1520 = vmatpush.msrb.mxu3 %v510_v23  ;;  %v28_v23 = vld [vmem:[%s3409_s0 + $0x70] sm:$0xff] }
 0x14d   :  { %1276 = vmatmul.f32.gmra.mxu3 %v105_v25  ;;  %v952_v29 = vpop.f32.mrf.mxu2  ;;  %v465_v25 = vld [vmem:[%s3408_s1 + $0x618] sm:$0xff] }
 0x14e   :  { %v953_v4 = vadd.f32 %v952_v29, %v888_v55  ;;  %1322 = vmatpush.msrb.mxu0 %v465_v25  ;;  %v481_v29 = vld [vmem:[%s3408_s1 + $0x698] sm:$0xff] }
 0x14f   :  { %v825_v34 = vpop.f32.mrf.mxu0  ;;  %1387 = vmatpush.msrb.mxu1 %v481_v29 }
 0x150   :  { %v826_v13 = vadd.f32 %v825_v34, %v2482_v8  ;;  %v1017_v40 = vpop.f32.mrf.mxu3 }
 0x151   :  { %v2887_v41 = vadd.f32 %v1017_v40, %v953_v4  ;;  %v890_v42 = vpop.f32.mrf.mxu1  ;;  %v168_v4 = vld [vmem:[%s3409_s0 + $0x4d0] sm:$0xff]  ;;  %v169_v40 = vld [vmem:[%s3409_s0 + $0x4d8] sm:$0xff] }
 0x152   :  { %1084 = vmatmul.f32.gmra.mxu0 %v118_v37  ;;  %1214 = vmatmul.f32.gmra.mxu2 %v120_v39  ;;  %v891_v8 = vadd.f32 %v890_v42, %v826_v13  ;;  %v167_v13 = vld [vmem:[%s3409_s0 + $0x4c8] sm:$0xff]  ;;  %v496_v42 = vld [vmem:[%s3408_s1 + $0x710] sm:$0xff] }
 0x153   :  { %1453 = vmatpush.msrb.mxu2 %v496_v42  ;;  %v230_v42 = vld [vmem:[%s3409_s0 + $0x6c0] sm:$0xff] }
 0x154   :  { %1149 = vmatmul.f32.gmra.mxu1 %v119_v43 }
 0x155   :  { %1279 = vmatmul.f32.gmra.mxu3 %v121_v45  ;;  %v955_v48 = vpop.f32.mrf.mxu2  ;;  %v464_v45 = vld [vmem:[%s3408_s1 + $0x610] sm:$0xff] }
 0x156   :  { %v956_v21 = vadd.f32 %v955_v48, %v891_v8  ;;  %1323 = vmatpush.msrb.mxu0 %v464_v45  ;;  %v480_v48 = vld [vmem:[%s3408_s1 + $0x690] sm:$0xff] }
 0x157   :  { %v828_v54 = vpop.f32.mrf.mxu0  ;;  %1388 = vmatpush.msrb.mxu1 %v480_v48  ;;  %v231_v48 = vld [vmem:[%s3409_s0 + $0x6c8] sm:$0xff] }
 0x158   :  { %v829_v36 = vadd.f32 %v828_v54, %v2509_v26  ;;  %v1020_v59 = vpop.f32.mrf.mxu3 }
 0x159   :  { %v2914_v60 = vadd.f32 %v1020_v59, %v956_v21  ;;  %v893_v61 = vpop.f32.mrf.mxu1  ;;  %v184_v21 = vld [vmem:[%s3409_s0 + $0x550] sm:$0xff]  ;;  %v185_v59 = vld [vmem:[%s3409_s0 + $0x558] sm:$0xff] }
 0x15a   :  { %1087 = vmatmul.f32.gmra.mxu0 %v134_v57  ;;  %1217 = vmatmul.f32.gmra.mxu2 %v136_v58  ;;  %v894_v26 = vadd.f32 %v893_v61, %v829_v36  ;;  %v183_v36 = vld [vmem:[%s3409_s0 + $0x548] sm:$0xff] }
 0x15b   :  { %v495_v61 = vld [vmem:[%s3408_s1 + $0x708] sm:$0xff] }
 0x15c   :  { %1152 = vmatmul.f32.gmra.mxu1 %v135_v63  ;;  %1454 = vmatpush.msrb.mxu2 %v495_v61 }
 0x15d   :  { %1282 = vmatmul.f32.gmra.mxu3 %v137_v0  ;;  %v958_v3 = vpop.f32.mrf.mxu2  ;;  %v463_v0 = vld [vmem:[%s3408_s1 + $0x608] sm:$0xff] }
 0x15e   :  { %v959_v38 = vadd.f32 %v958_v3, %v894_v26  ;;  %1324 = vmatpush.msrb.mxu0 %v463_v0  ;;  %v479_v3 = vld [vmem:[%s3408_s1 + $0x688] sm:$0xff]  ;;  %v249_v0 = vld [vmem:[%s3409_s0 + $0x758] sm:$0xff] }
 0x15f   :  { %v831_v10 = vpop.f32.mrf.mxu0  ;;  %1389 = vmatpush.msrb.mxu1 %v479_v3 }
 0x160   :  { %v832_v14 = vadd.f32 %v831_v10, %v2536_v44  ;;  %v1023_v15 = vpop.f32.mrf.mxu3 }
 0x161   :  { %v2941_v16 = vadd.f32 %v1023_v15, %v959_v38  ;;  %v896_v18 = vpop.f32.mrf.mxu1  ;;  %v200_v38 = vld [vmem:[%s3409_s0 + $0x5d0] sm:$0xff]  ;;  %v201_v15 = vld [vmem:[%s3409_s0 + $0x5d8] sm:$0xff] }
 0x162   :  { %1090 = vmatmul.f32.gmra.mxu0 %v150_v12  ;;  %1220 = vmatmul.f32.gmra.mxu2 %v152_v52  ;;  %v897_v44 = vadd.f32 %v896_v18, %v832_v14  ;;  %v199_v14 = vld [vmem:[%s3409_s0 + $0x5c8] sm:$0xff]  ;;  %v494_v18 = vld [vmem:[%s3408_s1 + $0x700] sm:$0xff] }
 0x163   :  { %1455 = vmatpush.msrb.mxu2 %v494_v18 }
 0x164   :  { %1155 = vmatmul.f32.gmra.mxu1 %v151_v19 }
 0x165   :  { %1285 = vmatmul.f32.gmra.mxu3 %v153_v20  ;;  %v961_v24 = vpop.f32.mrf.mxu2  ;;  %v462_v20 = vld [vmem:[%s3408_s1 + $0x600] sm:$0xff] }
 0x166   :  { %v962_v55 = vadd.f32 %v961_v24, %v897_v44  ;;  %1325 = vmatpush.msrb.mxu0 %v462_v20  ;;  %v478_v24 = vld [vmem:[%s3408_s1 + $0x680] sm:$0xff] }
 0x167   :  { %v834_v30 = vpop.f32.mrf.mxu0  ;;  %1390 = vmatpush.msrb.mxu1 %v478_v24  ;;  %v26_v20 = vld [vmem:[%s3409_s0 + $0x60] sm:$0xff] }
 0x168   :  { %v835_v33 = vadd.f32 %v834_v30, %v2563_v62  ;;  %v1026_v34 = vpop.f32.mrf.mxu3 }
 0x169   :  { %v2968_v37 = vadd.f32 %v1026_v34, %v962_v55  ;;  %v899_v39 = vpop.f32.mrf.mxu1  ;;  %v216_v55 = vld [vmem:[%s3409_s0 + $0x650] sm:$0xff]  ;;  %v217_v34 = vld [vmem:[%s3409_s0 + $0x658] sm:$0xff] }
 0x16a   :  { %1093 = vmatmul.f32.gmra.mxu0 %v166_v32  ;;  %1223 = vmatmul.f32.gmra.mxu2 %v168_v4  ;;  %v900_v62 = vadd.f32 %v899_v39, %v835_v33  ;;  %v215_v33 = vld [vmem:[%s3409_s0 + $0x648] sm:$0xff] }
 0x16c   :  { %1158 = vmatmul.f32.gmra.mxu1 %v167_v13 }
 0x16d   :  { %1288 = vmatmul.f32.gmra.mxu3 %v169_v40  ;;  %v964_v43 = vpop.f32.mrf.mxu2 }
 0x16e   :  { %v965_v8 = vadd.f32 %v964_v43, %v900_v62  ;;  %v232_v62 = vld [vmem:[%s3409_s0 + $0x6d0] sm:$0xff] }
 0x16f   :  { %v837_v49 = vpop.f32.mrf.mxu0 }
 0x170   :  { %v838_v53 = vadd.f32 %v837_v49, %v2590_v17  ;;  %v1029_v54 = vpop.f32.mrf.mxu3  ;;  %v233_v49 = vld [vmem:[%s3409_s0 + $0x6d8] sm:$0xff] }
 0x171   :  { %v2995_v57 = vadd.f32 %v1029_v54, %v965_v8  ;;  %v902_v58 = vpop.f32.mrf.mxu1  ;;  %v246_v54 = vld [vmem:[%s3409_s0 + $0x740] sm:$0xff] }
 0x172   :  { %1096 = vmatmul.f32.gmra.mxu0 %v182_v51  ;;  %1226 = vmatmul.f32.gmra.mxu2 %v184_v21  ;;  %v903_v17 = vadd.f32 %v902_v58, %v838_v53  ;;  %v248_v58 = vld [vmem:[%s3409_s0 + $0x750] sm:$0xff] }
 0x174   :  { %1161 = vmatmul.f32.gmra.mxu1 %v183_v36 }
 0x175   :  { %1291 = vmatmul.f32.gmra.mxu3 %v185_v59  ;;  %v967_v63 = vpop.f32.mrf.mxu2 }
 0x176   :  { %v968_v26 = vadd.f32 %v967_v63, %v903_v17  ;;  %v247_v63 = vld [vmem:[%s3409_s0 + $0x748] sm:$0xff] }
 0x177   :  { %v840_v5 = vpop.f32.mrf.mxu0 }
 0x178   :  { %v841_v9 = vadd.f32 %v840_v5, %v2617_v35  ;;  %v1032_v10 = vpop.f32.mrf.mxu3  ;;  %v262_v5 = vld [vmem:[%s3409_s0 + $0x7c0] sm:$0xff] }
 0x179   :  { %v3022_v12 = vadd.f32 %v1032_v10, %v968_v26  ;;  %v905_v52 = vpop.f32.mrf.mxu1 }
 0x17a   :  { %1099 = vmatmul.f32.gmra.mxu0 %v198_v7  ;;  %1229 = vmatmul.f32.gmra.mxu2 %v200_v38  ;;  %v906_v35 = vadd.f32 %v905_v52, %v841_v9  ;;  %v264_v7 = vld [vmem:[%s3409_s0 + $0x7d0] sm:$0xff] }
 0x17c   :  { %1164 = vmatmul.f32.gmra.mxu1 %v199_v14  ;;  %v263_v14 = vld [vmem:[%s3409_s0 + $0x7c8] sm:$0xff] }
 0x17d   :  { %1294 = vmatmul.f32.gmra.mxu3 %v201_v15  ;;  %v970_v19 = vpop.f32.mrf.mxu2  ;;  %v265_v15 = vld [vmem:[%s3409_s0 + $0x7d8] sm:$0xff] }
 0x17e   :  { %v971_v44 = vadd.f32 %v970_v19, %v906_v35 }
 0x17f   :  { %v843_v25 = vpop.f32.mrf.mxu0 }
 0x180   :  { %v844_v29 = vadd.f32 %v843_v25, %v2644_v56  ;;  %v1035_v30 = vpop.f32.mrf.mxu3 }
 0x181   :  { %v3049_v32 = vadd.f32 %v1035_v30, %v971_v44  ;;  %v908_v4 = vpop.f32.mrf.mxu1 }
 0x182   :  { %1102 = vmatmul.f32.gmra.mxu0 %v214_v28  ;;  %1232 = vmatmul.f32.gmra.mxu2 %v216_v55  ;;  %v909_v39 = vadd.f32 %v908_v4, %v844_v29  ;;  %v27_v55 = vld [vmem:[%s3409_s0 + $0x68] sm:$0xff]  ;;  %v29_v29 = vld [vmem:[%s3409_s0 + $0x78] sm:$0xff] }
 0x184   :  { %1167 = vmatmul.f32.gmra.mxu1 %v215_v33 }
 0x185   :  { %1297 = vmatmul.f32.gmra.mxu3 %v217_v34  ;;  %v973_v13 = vpop.f32.mrf.mxu2 }
 0x186   :  { %v974_v40 = vadd.f32 %v973_v13, %v909_v39  ;;  %v44_v39 = vld [vmem:[%s3409_s0 + $0xf0] sm:$0xff] }
 0x187   :  { %v846_v56 = vpop.f32.mrf.mxu0 }
 0x188   :  { %v847_v43 = vadd.f32 %v846_v56, %v2671_v11  ;;  %v1038_v45 = vpop.f32.mrf.mxu3 }
 0x189   :  { %v3064_v47 = vadd.f32 %v1038_v45, %v974_v40  ;;  %v911_v8 = vpop.f32.mrf.mxu1 }
 0x18a   :  { %1105 = vmatmul.f32.gmra.mxu0 %v230_v42  ;;  %1235 = vmatmul.f32.gmra.mxu2 %v232_v62  ;;  %v912_v51 = vadd.f32 %v911_v8, %v847_v43  ;;  %v43_v62 = vld [vmem:[%s3409_s0 + $0xe8] sm:$0xff]  ;;  %v45_v43 = vld [vmem:[%s3409_s0 + $0xf8] sm:$0xff] }
 0x18c   :  { %1170 = vmatmul.f32.gmra.mxu1 %v231_v48 }
 0x18d   :  { %1300 = vmatmul.f32.gmra.mxu3 %v233_v49  ;;  %v976_v21 = vpop.f32.mrf.mxu2  ;;  %v58_v49 = vld [vmem:[%s3409_s0 + $0x160] sm:$0xff] }
 0x18e   :  { %v977_v53 = vadd.f32 %v976_v21, %v912_v51  ;;  %v60_v51 = vld [vmem:[%s3409_s0 + $0x170] sm:$0xff] }
 0x18f   :  { %v849_v11 = vpop.f32.mrf.mxu0 }
 0x190   :  { %v850_v36 = vadd.f32 %v849_v11, %v2698_v31  ;;  %v1041_v59 = vpop.f32.mrf.mxu3 }
 0x191   :  { %v3079_v61 = vadd.f32 %v1041_v59, %v977_v53  ;;  %v914_v17 = vpop.f32.mrf.mxu1 }
 0x192   :  { %1108 = vmatmul.f32.gmra.mxu0 %v246_v54  ;;  %1238 = vmatmul.f32.gmra.mxu2 %v248_v58  ;;  %v915_v2 = vadd.f32 %v914_v17, %v850_v36  ;;  %v59_v58 = vld [vmem:[%s3409_s0 + $0x168] sm:$0xff]  ;;  %v61_v36 = vld [vmem:[%s3409_s0 + $0x178] sm:$0xff] }
 0x194   :  { %1173 = vmatmul.f32.gmra.mxu1 %v247_v63 }
 0x195   :  { %1303 = vmatmul.f32.gmra.mxu3 %v249_v0  ;;  %v979_v26 = vpop.f32.mrf.mxu2  ;;  %v74_v0 = vld [vmem:[%s3409_s0 + $0x1e0] sm:$0xff] }
 0x196   :  { %v980_v3 = vadd.f32 %v979_v26, %v915_v2  ;;  %v76_v2 = vld [vmem:[%s3409_s0 + $0x1f0] sm:$0xff] }
 0x197   :  { %v852_v31 = vpop.f32.mrf.mxu0 }
 0x198   :  { %v853_v38 = vadd.f32 %v852_v31, %v2725_v50  ;;  %v1044_v9 = vpop.f32.mrf.mxu3 }
 0x199   :  { %v3094_v10 = vadd.f32 %v1044_v9, %v980_v3  ;;  %v917_v52 = vpop.f32.mrf.mxu1 }
 0x19a   :  { %1111 = vmatmul.f32.gmra.mxu0 %v262_v5  ;;  %1241 = vmatmul.f32.gmra.mxu2 %v264_v7  ;;  %v918_v18 = vadd.f32 %v917_v52, %v853_v38  ;;  %v75_v7 = vld [vmem:[%s3409_s0 + $0x1e8] sm:$0xff]  ;;  %v77_v38 = vld [vmem:[%s3409_s0 + $0x1f8] sm:$0xff] }
 0x19c   :  { %1176 = vmatmul.f32.gmra.mxu1 %v263_v14 }
 0x19d   :  { %1306 = vmatmul.f32.gmra.mxu3 %v265_v15  ;;  %v982_v35 = vpop.f32.mrf.mxu2  ;;  %v90_v15 = vld [vmem:[%s3409_s0 + $0x260] sm:$0xff] }
 0x19e   :  { %v983_v19 = vadd.f32 %v982_v35, %v918_v18  ;;  %v92_v18 = vld [vmem:[%s3409_s0 + $0x270] sm:$0xff] }
 0x19f   :  { %v1067_v50 = vpop.f32.mrf.mxu0 }
 0x1a0   :  { %v1047_v44 = vpop.f32.mrf.mxu3  ;;  %v1068_v24 = vadd.f32 %v1067_v50, %v2752_v6  ;;  %v42_v6 = vld [vmem:[%s3409_s0 + $0xe0] sm:$0xff] }
 0x1a1   :  { %v3109_v25 = vadd.f32 %v1047_v44, %v983_v19  ;;  %v1132_v28 = vpop.f32.mrf.mxu1  ;;  %v93_v44 = vld [vmem:[%s3409_s0 + $0x278] sm:$0xff] }
 0x1a2   :  { %1326 = vmatmul.f32.vlgmr.msrb.gmra.mxu0 %v26_v20  ;;  %1456 = vmatmul.f32.vlgmr.msrb.gmra.mxu2 %v28_v23  ;;  %v1133_v30 = vadd.f32 %v1132_v28, %v1068_v24  ;;  %v91_v23 = vld [vmem:[%s3409_s0 + $0x268] sm:$0xff] }
 0x1a4   :  { %1391 = vmatmul.f32.vlgmr.msrb.gmra.mxu1 %v27_v55 }
 0x1a5   :  { %1521 = vmatmul.f32.vlgmr.msrb.gmra.mxu3 %v29_v29  ;;  %v1197_v4 = vpop.f32.mrf.mxu2  ;;  %v106_v29 = vld [vmem:[%s3409_s0 + $0x2e0] sm:$0xff] }
 0x1a6   :  { %v1198_v33 = vadd.f32 %v1197_v4, %v1133_v30  ;;  %v108_v30 = vld [vmem:[%s3409_s0 + $0x2f0] sm:$0xff] }
 0x1a7   :  { %v1070_v34 = vpop.f32.mrf.mxu0 }
 0x1a8   :  { %v1071_v13 = vadd.f32 %v1070_v34, %v2779_v27  ;;  %v1262_v40 = vpop.f32.mrf.mxu3 }
 0x1a9   :  { %v3124_v56 = vadd.f32 %v1262_v40, %v1198_v33  ;;  %v1135_v42 = vpop.f32.mrf.mxu1 }
 0x1aa   :  { %1329 = vmatmul.f32.gmra.mxu0 %v42_v6  ;;  %1459 = vmatmul.f32.gmra.mxu2 %v44_v39  ;;  %v1136_v45 = vadd.f32 %v1135_v42, %v1071_v13  ;;  %v107_v39 = vld [vmem:[%s3409_s0 + $0x2e8] sm:$0xff]  ;;  %v109_v13 = vld [vmem:[%s3409_s0 + $0x2f8] sm:$0xff] }
 0x1ac   :  { %1394 = vmatmul.f32.gmra.mxu1 %v43_v62 }
 0x1ad   :  { %1524 = vmatmul.f32.gmra.mxu3 %v45_v43  ;;  %v1200_v8 = vpop.f32.mrf.mxu2  ;;  %v122_v43 = vld [vmem:[%s3409_s0 + $0x360] sm:$0xff] }
 0x1ae   :  { %v1201_v48 = vadd.f32 %v1200_v8, %v1136_v45  ;;  %v124_v45 = vld [vmem:[%s3409_s0 + $0x370] sm:$0xff] }
 0x1af   :  { %v1073_v27 = vpop.f32.mrf.mxu0 }
 0x1b0   :  { %v1074_v21 = vadd.f32 %v1073_v27, %v2806_v46  ;;  %v1265_v53 = vpop.f32.mrf.mxu3 }
 0x1b1   :  { %v3139_v11 = vadd.f32 %v1265_v53, %v1201_v48  ;;  %v1138_v54 = vpop.f32.mrf.mxu1 }
 0x1b2   :  { %1332 = vmatmul.f32.gmra.mxu0 %v58_v49  ;;  %1462 = vmatmul.f32.gmra.mxu2 %v60_v51  ;;  %v1139_v59 = vadd.f32 %v1138_v54, %v1074_v21  ;;  %v123_v51 = vld [vmem:[%s3409_s0 + $0x368] sm:$0xff]  ;;  %v125_v21 = vld [vmem:[%s3409_s0 + $0x378] sm:$0xff] }
 0x1b4   :  { %1397 = vmatmul.f32.gmra.mxu1 %v59_v58 }
 0x1b5   :  { %1527 = vmatmul.f32.gmra.mxu3 %v61_v36  ;;  %v1203_v17 = vpop.f32.mrf.mxu2  ;;  %v138_v36 = vld [vmem:[%s3409_s0 + $0x3e0] sm:$0xff] }
 0x1b6   :  { %v1204_v63 = vadd.f32 %v1203_v17, %v1139_v59  ;;  %v140_v59 = vld [vmem:[%s3409_s0 + $0x3f0] sm:$0xff] }
 0x1b7   :  { %v1076_v46 = vpop.f32.mrf.mxu0 }
 0x1b8   :  { %v1077_v26 = vadd.f32 %v1076_v46, %v2833_v1  ;;  %v1268_v3 = vpop.f32.mrf.mxu3 }
 0x1b9   :  { %v3154_v31 = vadd.f32 %v1268_v3, %v1204_v63  ;;  %v1141_v5 = vpop.f32.mrf.mxu1 }
 0x1ba   :  { %1335 = vmatmul.f32.gmra.mxu0 %v74_v0  ;;  %1465 = vmatmul.f32.gmra.mxu2 %v76_v2  ;;  %v1142_v9 = vadd.f32 %v1141_v5, %v1077_v26  ;;  %v139_v2 = vld [vmem:[%s3409_s0 + $0x3e8] sm:$0xff]  ;;  %v141_v26 = vld [vmem:[%s3409_s0 + $0x3f8] sm:$0xff] }
 0x1bc   :  { %1400 = vmatmul.f32.gmra.mxu1 %v75_v7 }
 0x1bd   :  { %1530 = vmatmul.f32.gmra.mxu3 %v77_v38  ;;  %v1206_v52 = vpop.f32.mrf.mxu2  ;;  %v154_v38 = vld [vmem:[%s3409_s0 + $0x460] sm:$0xff] }
 0x1be   :  { %v1207_v14 = vadd.f32 %v1206_v52, %v1142_v9  ;;  %v156_v9 = vld [vmem:[%s3409_s0 + $0x470] sm:$0xff] }
 0x1bf   :  { %v1079_v1 = vpop.f32.mrf.mxu0 }
 0x1c0   :  { %v1080_v35 = vadd.f32 %v1079_v1, %v2860_v22  ;;  %v1271_v19 = vpop.f32.mrf.mxu3 }
 0x1c1   :  { %v3169_v50 = vadd.f32 %v1271_v19, %v1207_v14  ;;  %v1144_v20 = vpop.f32.mrf.mxu1  ;;  %v157_v19 = vld [vmem:[%s3409_s0 + $0x478] sm:$0xff] }
 0x1c2   :  { %1338 = vmatmul.f32.gmra.mxu0 %v90_v15  ;;  %1468 = vmatmul.f32.gmra.mxu2 %v92_v18  ;;  %v1145_v24 = vadd.f32 %v1144_v20, %v1080_v35  ;;  %v155_v18 = vld [vmem:[%s3409_s0 + $0x468] sm:$0xff] }
 0x1c4   :  { %1403 = vmatmul.f32.gmra.mxu1 %v91_v23 }
 0x1c5   :  { %1533 = vmatmul.f32.gmra.mxu3 %v93_v44  ;;  %v1209_v28 = vpop.f32.mrf.mxu2  ;;  %v170_v44 = vld [vmem:[%s3409_s0 + $0x4e0] sm:$0xff] }
 0x1c6   :  { %v1210_v55 = vadd.f32 %v1209_v28, %v1145_v24  ;;  %v172_v24 = vld [vmem:[%s3409_s0 + $0x4f0] sm:$0xff] }
 0x1c7   :  { %v1082_v22 = vpop.f32.mrf.mxu0 }
 0x1c8   :  { %v1083_v4 = vadd.f32 %v1082_v22, %v2887_v41  ;;  %v1274_v33 = vpop.f32.mrf.mxu3 }
 0x1c9   :  { %v3184_v34 = vadd.f32 %v1274_v33, %v1210_v55  ;;  %v1147_v6 = vpop.f32.mrf.mxu1  ;;  %v173_v33 = vld [vmem:[%s3409_s0 + $0x4f8] sm:$0xff] }
 0x1ca   :  { %1341 = vmatmul.f32.gmra.mxu0 %v106_v29  ;;  %1471 = vmatmul.f32.gmra.mxu2 %v108_v30  ;;  %v1148_v40 = vadd.f32 %v1147_v6, %v1083_v4  ;;  %v171_v30 = vld [vmem:[%s3409_s0 + $0x4e8] sm:$0xff] }
 0x1cc   :  { %1406 = vmatmul.f32.gmra.mxu1 %v107_v39 }
 0x1cd   :  { %1536 = vmatmul.f32.gmra.mxu3 %v109_v13  ;;  %v1212_v42 = vpop.f32.mrf.mxu2  ;;  %v186_v13 = vld [vmem:[%s3409_s0 + $0x560] sm:$0xff] }
 0x1ce   :  { %v1213_v62 = vadd.f32 %v1212_v42, %v1148_v40  ;;  %v188_v40 = vld [vmem:[%s3409_s0 + $0x570] sm:$0xff] }
 0x1cf   :  { %v1085_v41 = vpop.f32.mrf.mxu0 }
 0x1d0   :  { %v1086_v8 = vadd.f32 %v1085_v41, %v2914_v60  ;;  %v1277_v48 = vpop.f32.mrf.mxu3 }
 0x1d1   :  { %v3199_v27 = vadd.f32 %v1277_v48, %v1213_v62  ;;  %v1150_v49 = vpop.f32.mrf.mxu1  ;;  %v189_v48 = vld [vmem:[%s3409_s0 + $0x578] sm:$0xff] }
 0x1d2   :  { %1344 = vmatmul.f32.gmra.mxu0 %v122_v43  ;;  %1474 = vmatmul.f32.gmra.mxu2 %v124_v45  ;;  %v1151_v53 = vadd.f32 %v1150_v49, %v1086_v8  ;;  %v187_v45 = vld [vmem:[%s3409_s0 + $0x568] sm:$0xff] }
 0x1d4   :  { %1409 = vmatmul.f32.gmra.mxu1 %v123_v51 }
 0x1d5   :  { %1539 = vmatmul.f32.gmra.mxu3 %v125_v21  ;;  %v1215_v54 = vpop.f32.mrf.mxu2  ;;  %v202_v21 = vld [vmem:[%s3409_s0 + $0x5e0] sm:$0xff] }
 0x1d6   :  { %v1216_v58 = vadd.f32 %v1215_v54, %v1151_v53  ;;  %v204_v53 = vld [vmem:[%s3409_s0 + $0x5f0] sm:$0xff] }
 0x1d7   :  { %v1088_v60 = vpop.f32.mrf.mxu0 }
 0x1d8   :  { %v1089_v17 = vadd.f32 %v1088_v60, %v2941_v16  ;;  %v1280_v63 = vpop.f32.mrf.mxu3 }
 0x1d9   :  { %v3214_v46 = vadd.f32 %v1280_v63, %v1216_v58  ;;  %v1153_v0 = vpop.f32.mrf.mxu1  ;;  %v205_v63 = vld [vmem:[%s3409_s0 + $0x5f8] sm:$0xff] }
 0x1da   :  { %1347 = vmatmul.f32.gmra.mxu0 %v138_v36  ;;  %1477 = vmatmul.f32.gmra.mxu2 %v140_v59  ;;  %v1154_v3 = vadd.f32 %v1153_v0, %v1089_v17  ;;  %v203_v59 = vld [vmem:[%s3409_s0 + $0x5e8] sm:$0xff] }
 0x1dc   :  { %1412 = vmatmul.f32.gmra.mxu1 %v139_v2 }
 0x1dd   :  { %1542 = vmatmul.f32.gmra.mxu3 %v141_v26  ;;  %v1218_v5 = vpop.f32.mrf.mxu2  ;;  %v218_v26 = vld [vmem:[%s3409_s0 + $0x660] sm:$0xff] }
 0x1de   :  { %v1219_v7 = vadd.f32 %v1218_v5, %v1154_v3  ;;  %v220_v3 = vld [vmem:[%s3409_s0 + $0x670] sm:$0xff] }
 0x1df   :  { %v1091_v16 = vpop.f32.mrf.mxu0 }
 0x1e0   :  { %v1092_v52 = vadd.f32 %v1091_v16, %v2968_v37  ;;  %v1283_v14 = vpop.f32.mrf.mxu3 }
 0x1e1   :  { %v3229_v1 = vadd.f32 %v1283_v14, %v1219_v7  ;;  %v1156_v15 = vpop.f32.mrf.mxu1  ;;  %v221_v14 = vld [vmem:[%s3409_s0 + $0x678] sm:$0xff] }
 0x1e2   :  { %v1157_v35 = vadd.f32 %v1156_v15, %v1092_v52  ;;  %1350 = vmatmul.f32.gmra.mxu0 %v154_v38  ;;  %1480 = vmatmul.f32.gmra.mxu2 %v156_v9  ;;  %v219_v9 = vld [vmem:[%s3409_s0 + $0x668] sm:$0xff] }
 0x1e4   :  { %1415 = vmatmul.f32.gmra.mxu1 %v155_v18 }
 0x1e5   :  { %1545 = vmatmul.f32.gmra.mxu3 %v157_v19  ;;  %v1221_v20 = vpop.f32.mrf.mxu2  ;;  %v236_v19 = vld [vmem:[%s3409_s0 + $0x6f0] sm:$0xff] }
 0x1e6   :  { %v1222_v23 = vadd.f32 %v1221_v20, %v1157_v35  ;;  %v234_v35 = vld [vmem:[%s3409_s0 + $0x6e0] sm:$0xff] }
 0x1e7   :  { %v1094_v37 = vpop.f32.mrf.mxu0 }
 0x1e8   :  { %v1095_v28 = vadd.f32 %v1094_v37, %v2995_v57  ;;  %v1286_v55 = vpop.f32.mrf.mxu3 }
 0x1e9   :  { %v3244_v22 = vadd.f32 %v1286_v55, %v1222_v23  ;;  %v1159_v29 = vpop.f32.mrf.mxu1  ;;  %v237_v55 = vld [vmem:[%s3409_s0 + $0x6f8] sm:$0xff] }
 0x1ea   :  { %v1160_v4 = vadd.f32 %v1159_v29, %v1095_v28  ;;  %1353 = vmatmul.f32.gmra.mxu0 %v170_v44  ;;  %1483 = vmatmul.f32.gmra.mxu2 %v172_v24  ;;  %v235_v24 = vld [vmem:[%s3409_s0 + $0x6e8] sm:$0xff] }
 0x1ec   :  { %1418 = vmatmul.f32.gmra.mxu1 %v171_v30 }
 0x1ed   :  { %1548 = vmatmul.f32.gmra.mxu3 %v173_v33  ;;  %v1224_v6 = vpop.f32.mrf.mxu2  ;;  %v252_v33 = vld [vmem:[%s3409_s0 + $0x770] sm:$0xff] }
 0x1ee   :  { %v1225_v39 = vadd.f32 %v1224_v6, %v1160_v4  ;;  %v250_v4 = vld [vmem:[%s3409_s0 + $0x760] sm:$0xff] }
 0x1ef   :  { %v1097_v57 = vpop.f32.mrf.mxu0 }
 0x1f0   :  { %v1098_v42 = vadd.f32 %v1097_v57, %v3022_v12  ;;  %v1289_v62 = vpop.f32.mrf.mxu3 }
 0x1f1   :  { %v3259_v41 = vadd.f32 %v1289_v62, %v1225_v39  ;;  %v1162_v43 = vpop.f32.mrf.mxu1  ;;  %v253_v62 = vld [vmem:[%s3409_s0 + $0x778] sm:$0xff] }
 0x1f2   :  { %v1163_v8 = vadd.f32 %v1162_v43, %v1098_v42  ;;  %1356 = vmatmul.f32.gmra.mxu0 %v186_v13  ;;  %1486 = vmatmul.f32.gmra.mxu2 %v188_v40  ;;  %v251_v40 = vld [vmem:[%s3409_s0 + $0x768] sm:$0xff] }
 0x1f4   :  { %1421 = vmatmul.f32.gmra.mxu1 %v187_v45 }
 0x1f5   :  { %1551 = vmatmul.f32.gmra.mxu3 %v189_v48  ;;  %v1227_v49 = vpop.f32.mrf.mxu2  ;;  %v268_v48 = vld [vmem:[%s3409_s0 + $0x7f0] sm:$0xff] }
 0x1f6   :  { %v1228_v51 = vadd.f32 %v1227_v49, %v1163_v8  ;;  %v266_v8 = vld [vmem:[%s3409_s0 + $0x7e0] sm:$0xff] }
 0x1f7   :  { %v1100_v12 = vpop.f32.mrf.mxu0 }
 0x1f8   :  { %v1101_v54 = vadd.f32 %v1100_v12, %v3049_v32  ;;  %v1292_v58 = vpop.f32.mrf.mxu3 }
 0x1f9   :  { %v3274_v60 = vadd.f32 %v1292_v58, %v1228_v51  ;;  %v1165_v36 = vpop.f32.mrf.mxu1  ;;  %v269_v58 = vld [vmem:[%s3409_s0 + $0x7f8] sm:$0xff] }
 0x1fa   :  { %v1166_v17 = vadd.f32 %v1165_v36, %v1101_v54  ;;  %1359 = vmatmul.f32.gmra.mxu0 %v202_v21  ;;  %1489 = vmatmul.f32.gmra.mxu2 %v204_v53  ;;  %v267_v53 = vld [vmem:[%s3409_s0 + $0x7e8] sm:$0xff] }
 0x1fc   :  { %1424 = vmatmul.f32.gmra.mxu1 %v203_v59 }
 0x1fd   :  { %1554 = vmatmul.f32.gmra.mxu3 %v205_v63  ;;  %v1230_v0 = vpop.f32.mrf.mxu2 }
 0x1fe   :  { %v1231_v2 = vadd.f32 %v1230_v0, %v1166_v17 }
 0x1ff   :  { %v1103_v32 = vpop.f32.mrf.mxu0 }
 0x200   :  { %v1104_v5 = vadd.f32 %v1103_v32, %v3064_v47  ;;  %v1295_v7 = vpop.f32.mrf.mxu3 }
 0x201   :  { %v3289_v16 = vadd.f32 %v1295_v7, %v1231_v2  ;;  %v1168_v38 = vpop.f32.mrf.mxu1 }
 0x202   :  { %v1169_v52 = vadd.f32 %v1168_v38, %v1104_v5  ;;  %1362 = vmatmul.f32.gmra.mxu0 %v218_v26  ;;  %1492 = vmatmul.f32.gmra.mxu2 %v220_v3 }
 0x204   :  { %1427 = vmatmul.f32.gmra.mxu1 %v219_v9 }
 0x205   :  { %1557 = vmatmul.f32.gmra.mxu3 %v221_v14  ;;  %v1233_v15 = vpop.f32.mrf.mxu2 }
 0x206   :  { %v1234_v18 = vadd.f32 %v1233_v15, %v1169_v52 }
 0x207   :  { %v1106_v47 = vpop.f32.mrf.mxu0 }
 0x208   :  { %v1107_v20 = vadd.f32 %v1106_v47, %v3079_v61  ;;  %v1298_v23 = vpop.f32.mrf.mxu3 }
 0x209   :  { %v3304_v37 = vadd.f32 %v1298_v23, %v1234_v18  ;;  %v1171_v44 = vpop.f32.mrf.mxu1 }
 0x20a   :  { %v1172_v28 = vadd.f32 %v1171_v44, %v1107_v20  ;;  %1365 = vmatmul.f32.gmra.mxu0 %v234_v35  ;;  %1495 = vmatmul.f32.gmra.mxu2 %v236_v19 }
 0x20c   :  { %1430 = vmatmul.f32.gmra.mxu1 %v235_v24 }
 0x20d   :  { %1560 = vmatmul.f32.gmra.mxu3 %v237_v55  ;;  %v1236_v29 = vpop.f32.mrf.mxu2 }
 0x20e   :  { %v1237_v30 = vadd.f32 %v1236_v29, %v1172_v28 }
 0x20f   :  { %v1109_v61 = vpop.f32.mrf.mxu0 }
 0x210   :  { %v1110_v6 = vadd.f32 %v1109_v61, %v3094_v10  ;;  %v1301_v39 = vpop.f32.mrf.mxu3 }
 0x211   :  { %v3319_v57 = vadd.f32 %v1301_v39, %v1237_v30  ;;  %v1174_v13 = vpop.f32.mrf.mxu1 }
 0x212   :  { %v1175_v42 = vadd.f32 %v1174_v13, %v1110_v6  ;;  %1368 = vmatmul.f32.gmra.mxu0 %v250_v4  ;;  %1498 = vmatmul.f32.gmra.mxu2 %v252_v33 }
 0x214   :  { %1433 = vmatmul.f32.gmra.mxu1 %v251_v40 }
 0x215   :  { %1563 = vmatmul.f32.gmra.mxu3 %v253_v62  ;;  %v1239_v43 = vpop.f32.mrf.mxu2 }
 0x216   :  { %v1240_v45 = vadd.f32 %v1239_v43, %v1175_v42 }
 0x217   :  { %v1112_v10 = vpop.f32.mrf.mxu0 }
 0x218   :  { %v1113_v49 = vadd.f32 %v1112_v10, %v3109_v25  ;;  %v1304_v51 = vpop.f32.mrf.mxu3 }
 0x219   :  { %v3334_v12 = vadd.f32 %v1304_v51, %v1240_v45  ;;  %v1177_v21 = vpop.f32.mrf.mxu1 }
 0x21a   :  { %v1178_v54 = vadd.f32 %v1177_v21, %v1113_v49  ;;  %1371 = vmatmul.f32.gmra.mxu0 %v266_v8  ;;  %1501 = vmatmul.f32.gmra.mxu2 %v268_v48 }
 0x21c   :  { %1436 = vmatmul.f32.gmra.mxu1 %v267_v53 }
 0x21d   :  { %1566 = vmatmul.f32.gmra.mxu3 %v269_v58  ;;  %v1242_v36 = vpop.f32.mrf.mxu2 }
 0x21e   :  { %v1243_v59 = vadd.f32 %v1242_v36, %v1178_v54 }
 0x21f   :  { %v1327_v25 = vpop.f32.mrf.mxu0 }
 0x220   :  { %v1307_v17 = vpop.f32.mrf.mxu3  ;;  %v1328_v63 = vadd.f32 %v1327_v25, %v3124_v56 }
 0x221   :  { %v3343_v0 = vadd.f32 %v1307_v17, %v1243_v59  ;;  %v1392_v2 = vpop.f32.mrf.mxu1 }
 0x222   :  { %v1393_v32 = vadd.f32 %v1392_v2, %v1328_v63 }
 0x225   :  { %v1457_v26 = vpop.f32.mrf.mxu2 }
 0x226   :  { %v1458_v3 = vadd.f32 %v1457_v26, %v1393_v32 }
 0x227   :  { %v1330_v5 = vpop.f32.mrf.mxu0 }
 0x228   :  { %v1331_v7 = vadd.f32 %v1330_v5, %v3139_v11  ;;  %v1522_v38 = vpop.f32.mrf.mxu3 }
 0x229   :  { %v1523_v9 = vadd.f32 %v1522_v38, %v1458_v3  ;;  %v1395_v52 = vpop.f32.mrf.mxu1 }
 0x22a   :  { %v1396_v15 = vadd.f32 %v1395_v52, %v1331_v7 }
 0x22b   :  { %vm1570_vm0 = vcmp.gt.f32.partialorder %v1523_v9, 0.0  ;;  %v1586_v14 = vmul.f32 0.2, %v1523_v9 }
 0x22d   :  { %v1602_v18 = vsel %vm1570_vm0, %v1523_v9, %v1586_v14  ;;  %v1460_v47 = vpop.f32.mrf.mxu2 }
 0x22e   :  { %1618 = vst [vmem:[%s3411_s3] sm:$0xff] %v1602_v18  ;;  %v1461_v56 = vadd.f32 %v1460_v47, %v1396_v15 }
 0x22f   :  { %v1333_v35 = vpop.f32.mrf.mxu0 }
 0x230   :  { %v1334_v19 = vadd.f32 %v1333_v35, %v3154_v31  ;;  %v1525_v20 = vpop.f32.mrf.mxu3 }
 0x231   :  { %v1526_v23 = vadd.f32 %v1525_v20, %v1461_v56  ;;  %v1398_v44 = vpop.f32.mrf.mxu1 }
 0x232   :  { %v1399_v24 = vadd.f32 %v1398_v44, %v1334_v19 }
 0x233   :  { %vm1571_vm1 = vcmp.gt.f32.partialorder %v1526_v23, 0.0  ;;  %v1587_v11 = vmul.f32 0.2, %v1526_v23 }
 0x235   :  { %v1603_v28 = vsel %vm1571_vm1, %v1526_v23, %v1587_v11  ;;  %v1463_v55 = vpop.f32.mrf.mxu2 }
 0x236   :  { %1619 = vst [vmem:[%s3411_s3 + $0x8] sm:$0xff] %v1603_v28  ;;  %v1464_v29 = vadd.f32 %v1463_v55, %v1399_v24 }
 0x237   :  { %v1336_v30 = vpop.f32.mrf.mxu0 }
 0x238   :  { %v1337_v61 = vadd.f32 %v1336_v30, %v3169_v50  ;;  %v1528_v4 = vpop.f32.mrf.mxu3 }
 0x239   :  { %v1529_v33 = vadd.f32 %v1528_v4, %v1464_v29  ;;  %v1401_v6 = vpop.f32.mrf.mxu1 }
 0x23a   :  { %v1402_v39 = vadd.f32 %v1401_v6, %v1337_v61 }
 0x23b   :  { %vm1572_vm2 = vcmp.gt.f32.partialorder %v1529_v33, 0.0  ;;  %v1588_v31 = vmul.f32 0.2, %v1529_v33 }
 0x23d   :  { %v1604_v13 = vsel %vm1572_vm2, %v1529_v33, %v1588_v31  ;;  %v1466_v40 = vpop.f32.mrf.mxu2 }
 0x23e   :  { %1620 = vst [vmem:[%s3411_s3 + $0x10] sm:$0xff] %v1604_v13  ;;  %v1467_v42 = vadd.f32 %v1466_v40, %v1402_v39 }
 0x23f   :  { %v1339_v62 = vpop.f32.mrf.mxu0 }
 0x240   :  { %v1340_v43 = vadd.f32 %v1339_v62, %v3184_v34  ;;  %v1531_v45 = vpop.f32.mrf.mxu3 }
 0x241   :  { %v1532_v10 = vadd.f32 %v1531_v45, %v1467_v42  ;;  %v1404_v8 = vpop.f32.mrf.mxu1 }
 0x242   :  { %v1405_v48 = vadd.f32 %v1404_v8, %v1340_v43 }
 0x243   :  { %vm1573_vm3 = vcmp.gt.f32.partialorder %v1532_v10, 0.0  ;;  %v1589_v50 = vmul.f32 0.2, %v1532_v10 }
 0x245   :  { %v1605_v49 = vsel %vm1573_vm3, %v1532_v10, %v1589_v50  ;;  %v1469_v51 = vpop.f32.mrf.mxu2 }
 0x246   :  { %1621 = vst [vmem:[%s3411_s3 + $0x18] sm:$0xff] %v1605_v49  ;;  %v1470_v21 = vadd.f32 %v1469_v51, %v1405_v48 }
 0x247   :  { %v1342_v53 = vpop.f32.mrf.mxu0 }
 0x248   :  { %v1343_v54 = vadd.f32 %v1342_v53, %v3199_v27  ;;  %v1534_v58 = vpop.f32.mrf.mxu3 }
 0x249   :  { %v1535_v36 = vadd.f32 %v1534_v58, %v1470_v21  ;;  %v1407_v59 = vpop.f32.mrf.mxu1 }
 0x24a   :  { %v1408_v25 = vadd.f32 %v1407_v59, %v1343_v54 }
 0x24b   :  { %vm1574_vm4 = vcmp.gt.f32.partialorder %v1535_v36, 0.0  ;;  %v1590_v34 = vmul.f32 0.2, %v1535_v36 }
 0x24d   :  { %v1606_v17 = vsel %vm1574_vm4, %v1535_v36, %v1590_v34  ;;  %v1472_v63 = vpop.f32.mrf.mxu2 }
 0x24e   :  { %1622 = vst [vmem:[%s3411_s3 + $0x20] sm:$0xff] %v1606_v17  ;;  %v1473_v2 = vadd.f32 %v1472_v63, %v1408_v25 }
 0x24f   :  { %v1345_v32 = vpop.f32.mrf.mxu0 }
 0x250   :  { %v1346_v26 = vadd.f32 %v1345_v32, %v3214_v46  ;;  %v1537_v3 = vpop.f32.mrf.mxu3 }
 0x251   :  { %v1538_v5 = vadd.f32 %v1537_v3, %v1473_v2  ;;  %v1410_v7 = vpop.f32.mrf.mxu1 }
 0x252   :  { %v1411_v38 = vadd.f32 %v1410_v7, %v1346_v26 }
 0x253   :  { %vm1575_vm5 = vcmp.gt.f32.partialorder %v1538_v5, 0.0  ;;  %v1591_v27 = vmul.f32 0.2, %v1538_v5 }
 0x255   :  { %v1607_v9 = vsel %vm1575_vm5, %v1538_v5, %v1591_v27  ;;  %v1475_v52 = vpop.f32.mrf.mxu2 }
 0x256   :  { %1623 = vst [vmem:[%s3411_s3 + $0x28] sm:$0xff] %v1607_v9  ;;  %v1476_v14 = vadd.f32 %v1475_v52, %v1411_v38 }
 0x257   :  { %v1348_v15 = vpop.f32.mrf.mxu0 }
 0x258   :  { %v1349_v18 = vadd.f32 %v1348_v15, %v3229_v1  ;;  %v1540_v47 = vpop.f32.mrf.mxu3 }
 0x259   :  { %v1541_v56 = vadd.f32 %v1540_v47, %v1476_v14  ;;  %v1413_v35 = vpop.f32.mrf.mxu1 }
 0x25a   :  { %v1414_v19 = vadd.f32 %v1413_v35, %v1349_v18 }
 0x25b   :  { %vm1576_vm6 = vcmp.gt.f32.partialorder %v1541_v56, 0.0  ;;  %v1592_v46 = vmul.f32 0.2, %v1541_v56 }
 0x25d   :  { %v1608_v20 = vsel %vm1576_vm6, %v1541_v56, %v1592_v46  ;;  %v1478_v23 = vpop.f32.mrf.mxu2 }
 0x25e   :  { %1624 = vst [vmem:[%s3411_s3 + $0x30] sm:$0xff] %v1608_v20  ;;  %v1479_v44 = vadd.f32 %v1478_v23, %v1414_v19 }
 0x25f   :  { %v1351_v11 = vpop.f32.mrf.mxu0 }
 0x260   :  { %v1352_v24 = vadd.f32 %v1351_v11, %v3244_v22  ;;  %v1543_v28 = vpop.f32.mrf.mxu3 }
 0x261   :  { %v1544_v55 = vadd.f32 %v1543_v28, %v1479_v44  ;;  %v1416_v29 = vpop.f32.mrf.mxu1 }
 0x262   :  { %v1417_v30 = vadd.f32 %v1416_v29, %v1352_v24 }
 0x263   :  { %vm1577_vm7 = vcmp.gt.f32.partialorder %v1544_v55, 0.0  ;;  %v1593_v1 = vmul.f32 0.2, %v1544_v55 }
 0x265   :  { %v1609_v61 = vsel %vm1577_vm7, %v1544_v55, %v1593_v1  ;;  %v1481_v4 = vpop.f32.mrf.mxu2 }
 0x266   :  { %1625 = vst [vmem:[%s3411_s3 + $0x38] sm:$0xff] %v1609_v61  ;;  %v1482_v33 = vadd.f32 %v1481_v4, %v1417_v30 }
 0x267   :  { %v1354_v6 = vpop.f32.mrf.mxu0 }
 0x268   :  { %v1355_v31 = vadd.f32 %v1354_v6, %v3259_v41  ;;  %v1546_v39 = vpop.f32.mrf.mxu3 }
 0x269   :  { %v1547_v13 = vadd.f32 %v1546_v39, %v1482_v33  ;;  %v1419_v40 = vpop.f32.mrf.mxu1 }
 0x26a   :  { %v1420_v42 = vadd.f32 %v1419_v40, %v1355_v31 }
 0x26b   :  { %vm1578_vm8 = vcmp.gt.f32.partialorder %v1547_v13, 0.0  ;;  %v1594_v22 = vmul.f32 0.2, %v1547_v13 }
 0x26d   :  { %v1610_v62 = vsel %vm1578_vm8, %v1547_v13, %v1594_v22  ;;  %v1484_v43 = vpop.f32.mrf.mxu2 }
 0x26e   :  { %1626 = vst [vmem:[%s3411_s3 + $0x40] sm:$0xff] %v1610_v62  ;;  %v1485_v45 = vadd.f32 %v1484_v43, %v1420_v42 }
 0x26f   :  { %v1357_v10 = vpop.f32.mrf.mxu0 }
 0x270   :  { %v1358_v8 = vadd.f32 %v1357_v10, %v3274_v60  ;;  %v1549_v50 = vpop.f32.mrf.mxu3 }
 0x271   :  { %v1550_v48 = vadd.f32 %v1549_v50, %v1485_v45  ;;  %v1422_v49 = vpop.f32.mrf.mxu1 }
 0x272   :  { %v1423_v51 = vadd.f32 %v1422_v49, %v1358_v8 }
 0x273   :  { %vm1579_vm9 = vcmp.gt.f32.partialorder %v1550_v48, 0.0  ;;  %v1595_v41 = vmul.f32 0.2, %v1550_v48 }
 0x275   :  { %v1611_v21 = vsel %vm1579_vm9, %v1550_v48, %v1595_v41  ;;  %v1487_v53 = vpop.f32.mrf.mxu2 }
 0x276   :  { %1627 = vst [vmem:[%s3411_s3 + $0x48] sm:$0xff] %v1611_v21  ;;  %v1488_v54 = vadd.f32 %v1487_v53, %v1423_v51 }
 0x277   :  { %v1360_v58 = vpop.f32.mrf.mxu0 }
 0x278   :  { %v1361_v36 = vadd.f32 %v1360_v58, %v3289_v16  ;;  %v1552_v59 = vpop.f32.mrf.mxu3 }
 0x279   :  { %v1553_v34 = vadd.f32 %v1552_v59, %v1488_v54  ;;  %v1425_v25 = vpop.f32.mrf.mxu1 }
 0x27a   :  { %v1426_v17 = vadd.f32 %v1425_v25, %v1361_v36 }
 0x27b   :  { %vm1580_vm10 = vcmp.gt.f32.partialorder %v1553_v34, 0.0  ;;  %v1596_v60 = vmul.f32 0.2, %v1553_v34 }
 0x27d   :  { %v1612_v63 = vsel %vm1580_vm10, %v1553_v34, %v1596_v60  ;;  %v1490_v2 = vpop.f32.mrf.mxu2 }
 0x27e   :  { %1628 = vst [vmem:[%s3411_s3 + $0x50] sm:$0xff] %v1612_v63  ;;  %v1491_v32 = vadd.f32 %v1490_v2, %v1426_v17 }
 0x27f   :  { %v1363_v26 = vpop.f32.mrf.mxu0 }
 0x280   :  { %v1364_v3 = vadd.f32 %v1363_v26, %v3304_v37  ;;  %v1555_v5 = vpop.f32.mrf.mxu3 }
 0x281   :  { %v1556_v7 = vadd.f32 %v1555_v5, %v1491_v32  ;;  %v1428_v27 = vpop.f32.mrf.mxu1 }
 0x282   :  { %v1429_v38 = vadd.f32 %v1428_v27, %v1364_v3 }
 0x283   :  { %vm1581_vm11 = vcmp.gt.f32.partialorder %v1556_v7, 0.0  ;;  %v1597_v16 = vmul.f32 0.2, %v1556_v7 }
 0x285   :  { %v1613_v9 = vsel %vm1581_vm11, %v1556_v7, %v1597_v16  ;;  %v1493_v52 = vpop.f32.mrf.mxu2 }
 0x286   :  { %1629 = vst [vmem:[%s3411_s3 + $0x58] sm:$0xff] %v1613_v9  ;;  %v1494_v14 = vadd.f32 %v1493_v52, %v1429_v38 }
 0x287   :  { %v1366_v15 = vpop.f32.mrf.mxu0 }
 0x288   :  { %v1367_v18 = vadd.f32 %v1366_v15, %v3319_v57  ;;  %v1558_v47 = vpop.f32.mrf.mxu3 }
 0x289   :  { %v1559_v56 = vadd.f32 %v1558_v47, %v1494_v14  ;;  %v1431_v35 = vpop.f32.mrf.mxu1 }
 0x28a   :  { %v1432_v46 = vadd.f32 %v1431_v35, %v1367_v18 }
 0x28b   :  { %vm1582_vm12 = vcmp.gt.f32.partialorder %v1559_v56, 0.0  ;;  %v1598_v37 = vmul.f32 0.2, %v1559_v56 }
 0x28d   :  { %v1614_v19 = vsel %vm1582_vm12, %v1559_v56, %v1598_v37  ;;  %v1496_v20 = vpop.f32.mrf.mxu2 }
 0x28e   :  { %1630 = vst [vmem:[%s3411_s3 + $0x60] sm:$0xff] %v1614_v19  ;;  %v1497_v23 = vadd.f32 %v1496_v20, %v1432_v46 }
 0x28f   :  { %v1369_v44 = vpop.f32.mrf.mxu0 }
 0x290   :  { %v1370_v11 = vadd.f32 %v1369_v44, %v3334_v12  ;;  %v1561_v24 = vpop.f32.mrf.mxu3 }
 0x291   :  { %v1562_v28 = vadd.f32 %v1561_v24, %v1497_v23  ;;  %v1434_v55 = vpop.f32.mrf.mxu1 }
 0x292   :  { %v1435_v29 = vadd.f32 %v1434_v55, %v1370_v11 }
 0x293   :  { %vm1583_vm13 = vcmp.gt.f32.partialorder %v1562_v28, 0.0  ;;  %v1599_v57 = vmul.f32 0.2, %v1562_v28 }
 0x295   :  { %v1615_v1 = vsel %vm1583_vm13, %v1562_v28, %v1599_v57  ;;  %v1499_v30 = vpop.f32.mrf.mxu2 }
 0x296   :  { %1631 = vst [vmem:[%s3411_s3 + $0x68] sm:$0xff] %v1615_v1  ;;  %v1500_v61 = vadd.f32 %v1499_v30, %v1435_v29 }
 0x297   :  { %v1372_v4 = vpop.f32.mrf.mxu0 }
 0x298   :  { %v1373_v33 = vadd.f32 %v1372_v4, %v3343_v0  ;;  %v1564_v6 = vpop.f32.mrf.mxu3 }
 0x299   :  { %v1565_v31 = vadd.f32 %v1564_v6, %v1500_v61  ;;  %v1437_v39 = vpop.f32.mrf.mxu1 }
 0x29a   :  { %v1438_v13 = vadd.f32 %v1437_v39, %v1373_v33 }
 0x29b   :  { %vm1584_vm14 = vcmp.gt.f32.partialorder %v1565_v31, 0.0  ;;  %v1600_v12 = vmul.f32 0.2, %v1565_v31 }
 0x29d   :  { %v1616_v40 = vsel %vm1584_vm14, %v1565_v31, %v1600_v12  ;;  %v1502_v22 = vpop.f32.mrf.mxu2 }
 0x29e   :  { %1632 = vst [vmem:[%s3411_s3 + $0x70] sm:$0xff] %v1616_v40  ;;  %v1503_v42 = vadd.f32 %v1502_v22, %v1438_v13 }
 0x2a0   :  { %v1567_v62 = vpop.f32.mrf.mxu3 }
 0x2a1   :  { %v1568_v43 = vadd.f32 %v1567_v62, %v1503_v42 }
 0x2a3   :  { %vm1585_vm15 = vcmp.gt.f32.partialorder %v1568_v43, 0.0  ;;  %v1601_v45 = vmul.f32 0.2, %v1568_v43 }
 0x2a5   :  { %v1617_v10 = vsel %vm1585_vm15, %v1568_v43, %v1601_v45 }
 0x2a6   :  { %1633 = vst [vmem:[%s3411_s3 + $0x78] sm:$0xff] %v1617_v10 }

// kernel: discriminator_forward.9
= control target key start
LH: loop header
LB: loop body
LE: loop exit
PB: predicated region body
PF: predicated region fallthrough
CT: control target
= control target key end

     0   :  { %s358_s6 = smov 0   ;;  %s360_s7 = smov 0   ;;  %s398_s0 = inlined_call_operand.vmem [shape: f32[2,16,128], index: 0, kind: input, shape index: {}]   ;;  %s399_s1 = inlined_call_operand.vmem [shape: f32[2,16,128], index: 1, kind: output, shape index: {}]  }
   0x1   :  { %s362_s8 = smov 0  }
   0x2 LB: > { %s23_s9 = sadd.s32 1, %s341_s7  ;;  %p285_p0 = scmp.ge.s32.totalorder %s345_s8, 1  ;;  %s345_s8 = sphi %s362_s8, %s11_s8   ;;  %s341_s7 = sphi %s360_s7, %s401_s7   ;;  %s337_s6 = sphi %s358_s6, %s400_s6  }
   0x3   : > { %p25_p1 = scmp.ge.s32.totalorder %s23_s9, 2  ;;  %p106_p2 = scmp.lt.s32.totalorder %s345_s8, 3 }
   0x5   : > { %s403_s9 = smov (%p25_p1, %s23_s9), 0  ;;  %p107_p3 = pnand %p285_p0, %p106_p2 }
   0x6   : > { %p132_p4 = scmp.lt.s32.totalorder (!%p107_p3), %s337_s6, 1 }
   0x7   : > { %110 = sbr.rel (%p107_p3) target bundleno = 79 (0x4f), region = 24 }
   0xc   : > { %v347_v0 = vmov 16.0   ;;  %s405_s6 = smov (!%p132_p4, %s337_s6), 1 }
   0xd   : > { %319 = vrcp.f32 %v347_v0  ;;  %s292_s10 = sshll.u32 %s405_s6, 4 }
   0xe   : > { %s139_s13 = scalar_lea.vmem %s398_s0, %s292_s10  ;;  %s147_s16 = scalar_lea.vmem %s399_s1, %s292_s10 }
   0xf   : > { %v148_v1 = vld [vmem:[%s139_s13] sm:$0xff]  ;;  %v149_v2 = vld [vmem:[%s139_s13 + $0x8] sm:$0xff] }
  0x10   : > { %v150_v4 = vadd.f32 %v149_v2, %v148_v1 }
  0x12   : > { %v151_v6 = vrot.slane %v150_v4, 4 }
  0x13   : > { %v320_v3 = vpop.eup %319 }
  0x14   : > { %v158_v5 = vmul.f32 16.0, %v320_v3  ;;  %v152_v8 = vadd.f32 %v151_v6, %v150_v4  ;;  %vm162_vm0 = vweird.f32 %v320_v3 }
  0x16   : > { %v159_v7 = vsub.f32 1.0, %v158_v5  ;;  %v153_v10 = vrot.slane %v152_v8, 2 }
  0x18   : > { %v160_v9 = vmul.f32 %v320_v3, %v159_v7  ;;  %v154_v12 = vadd.f32 %v153_v10, %v152_v8 }
  0x1a   : > { %v161_v11 = vadd.f32 %v320_v3, %v160_v9  ;;  %v155_v13 = vrot.slane %v154_v12, 1 }
  0x1c   : > { %v163_v14 = vsel %vm162_vm0, %v320_v3, %v161_v11  ;;  %v156_v15 = vadd.f32 %v155_v13, %v154_v12 }
  0x1e   : > { %v164_v16 = vmul.f32 %v163_v14, %v156_v15 }
  0x20   : > { %v165_v17 = vsub.f32 %v148_v1, %v164_v16  ;;  %v166_v18 = vsub.f32 %v149_v2, %v164_v16 }
  0x22   : > { %v167_v19 = vmul.f32 %v165_v17, %v165_v17  ;;  %v168_v20 = vmul.f32 %v166_v18, %v166_v18 }
  0x24   : > { %v169_v21 = vadd.f32 %v168_v20, %v167_v19 }
  0x26   : > { %v170_v22 = vrot.slane %v169_v21, 4 }
  0x28   : > { %v171_v23 = vadd.f32 %v170_v22, %v169_v21 }
  0x2a   : > { %v172_v24 = vrot.slane %v171_v23, 2 }
  0x2c   : > { %v173_v25 = vadd.f32 %v172_v24, %v171_v23 }
  0x2e   : > { %v174_v26 = vrot.slane %v173_v25, 1 }
  0x30   : > { %v175_v27 = vadd.f32 %v174_v26, %v173_v25 }
  0x32   : > { %v176_v28 = vmul.f32 %v175_v27, %v163_v14 }
  0x34   : > { %v177_v29 = vadd.f32 1e-05, %v176_v28 }
  0x36   : > { %321 = vrsqrt.f32 %v177_v29  ;;  %vm184_vm1 = vweird.f32 %v177_v29 }
  0x3c   : > { %v322_v30 = vpop.eup %321 }
  0x3d   : > { %v179_v31 = vmul.f32 %v322_v30, %v177_v29  ;;  %vm185_vm2 = vweird.f32 %v322_v30 }
  0x3e   : > { %vm186_vm3 = vmor %vm184_vm1, %vm185_vm2 }
  0x3f   : > { %v180_v32 = vmul.f32 %v322_v30, %v179_v31 }
  0x41   : > { %v181_v33 = vmul.f32 0.5, %v180_v32 }
  0x43   : > { %v182_v34 = vsub.f32 1.5, %v181_v33 }
  0x45   : > { %v183_v35 = vmul.f32 %v322_v30, %v182_v34 }
  0x47   : > { %v187_v36 = vsel %vm186_vm3, %v322_v30, %v183_v35 }
  0x48   : > { %v188_v37 = vmul.f32 %v187_v36, %v165_v17  ;;  %v189_v38 = vmul.f32 %v187_v36, %v166_v18 }
  0x4a   : > { %vm190_vm4 = vcmp.gt.f32.partialorder %v188_v37, 0.0  ;;  %v192_v39 = vmul.f32 0.2, %v188_v37  ;;  %vm191_vm5 = vcmp.gt.f32.partialorder %v189_v38, 0.0  ;;  %v193_v40 = vmul.f32 0.2, %v189_v38 }
  0x4c   : > { %v194_v41 = vsel %vm190_vm4, %v188_v37, %v192_v39  ;;  %v195_v42 = vsel %vm191_vm5, %v189_v38, %v193_v40 }
  0x4d   : > { %196 = vst [vmem:[%s147_s16] sm:$0xff] %v194_v41 }
  0x4e   : > { %197 = vst [vmem:[%s147_s16 + $0x8] sm:$0xff] %v195_v42 }
  0x4f PF: > { %s11_s8 = sadd.s32 1, %s345_s8   ;;  %s400_s6 = smov %s341_s7 }
  0x50   : > { %p8_p5 = scmp.ge.s32.totalorder %s11_s8, 4   ;;  %s401_s7 = smov %s403_s9 }
  0x52   :  { %10 = sbr.rel (!%p8_p5) target bundleno = 2 (0x2), region = 54 }

// kernel: discriminator_forward.8
= control target key start
LH: loop header
LB: loop body
LE: loop exit
PB: predicated region body
PF: predicated region fallthrough
CT: control target
= control target key end

     0   :  { %s1806_s1 = inlined_call_operand.vmem [shape: f32[2048,128], index: 1, kind: input, shape index: {}]   ;;  %s1807_s0 = inlined_call_operand.vmem [shape: f32[32,2048], index: 0, kind: input, shape index: {}]   ;;  %s1808_s2 = inlined_call_operand.vmem [shape: f32[1,128], index: 2, kind: input, shape index: {}]   ;;  %s1809_s3 = inlined_call_operand.vmem [shape: f32[32,128], index: 3, kind: output, shape index: {}]  }
   0x1   :  { %v93_v0 = vld [vmem:[%s1806_s1 + $0x78] sm:$0xff]  ;;  %v92_v2 = vld [vmem:[%s1806_s1 + $0x70] sm:$0xff]  ;;  %v91_v6 = vld [vmem:[%s1806_s1 + $0x68] sm:$0xff] }
   0x2   :  { %v125_v1 = vld [vmem:[%s1806_s1 + $0x178] sm:$0xff]  ;;  %338 = vmatpush.msra.mxu0 %v93_v0  ;;  %v124_v4 = vld [vmem:[%s1806_s1 + $0x170] sm:$0xff]  ;;  %v123_v8 = vld [vmem:[%s1806_s1 + $0x168] sm:$0xff] }
   0x3   :  { %396 = vmatpush.msra.mxu2 %v125_v1  ;;  %v109_v3 = vld [vmem:[%s1806_s1 + $0xf8] sm:$0xff]  ;;  %v108_v7 = vld [vmem:[%s1806_s1 + $0xf0] sm:$0xff]  ;;  %v107_v10 = vld [vmem:[%s1806_s1 + $0xe8] sm:$0xff] }
   0x4   :  { %v141_v5 = vld [vmem:[%s1806_s1 + $0x1f8] sm:$0xff]  ;;  %367 = vmatpush.msra.mxu1 %v109_v3  ;;  %339 = vmatpush.msra.mxu0 %v92_v2  ;;  %v140_v9 = vld [vmem:[%s1806_s1 + $0x1f0] sm:$0xff]  ;;  %v90_v11 = vld [vmem:[%s1806_s1 + $0x60] sm:$0xff] }
   0x5   :  { %425 = vmatpush.msra.mxu3 %v141_v5  ;;  %397 = vmatpush.msra.mxu2 %v124_v4  ;;  %v122_v12 = vld [vmem:[%s1806_s1 + $0x160] sm:$0xff]  ;;  %v139_v13 = vld [vmem:[%s1806_s1 + $0x1e8] sm:$0xff]  ;;  %v89_v16 = vld [vmem:[%s1806_s1 + $0x58] sm:$0xff] }
   0x6   :  { %368 = vmatpush.msra.mxu1 %v108_v7  ;;  %340 = vmatpush.msra.mxu0 %v91_v6  ;;  %v106_v14 = vld [vmem:[%s1806_s1 + $0xe0] sm:$0xff]  ;;  %v121_v17 = vld [vmem:[%s1806_s1 + $0x158] sm:$0xff]  ;;  %v88_v20 = vld [vmem:[%s1806_s1 + $0x50] sm:$0xff] }
   0x7   :  { %426 = vmatpush.msra.mxu3 %v140_v9  ;;  %398 = vmatpush.msra.mxu2 %v123_v8  ;;  %v138_v15 = vld [vmem:[%s1806_s1 + $0x1e0] sm:$0xff]  ;;  %v105_v18 = vld [vmem:[%s1806_s1 + $0xd8] sm:$0xff]  ;;  %v120_v21 = vld [vmem:[%s1806_s1 + $0x150] sm:$0xff] }
   0x8   :  { %369 = vmatpush.msra.mxu1 %v107_v10  ;;  %341 = vmatpush.msra.mxu0 %v90_v11  ;;  %v137_v19 = vld [vmem:[%s1806_s1 + $0x1d8] sm:$0xff]  ;;  %v104_v22 = vld [vmem:[%s1806_s1 + $0xd0] sm:$0xff]  ;;  %v87_v24 = vld [vmem:[%s1806_s1 + $0x48] sm:$0xff] }
   0x9   :  { %427 = vmatpush.msra.mxu3 %v139_v13  ;;  %399 = vmatpush.msra.mxu2 %v122_v12  ;;  %v136_v23 = vld [vmem:[%s1806_s1 + $0x1d0] sm:$0xff]  ;;  %v119_v25 = vld [vmem:[%s1806_s1 + $0x148] sm:$0xff]  ;;  %v86_v28 = vld [vmem:[%s1806_s1 + $0x40] sm:$0xff] }
   0xa   :  { %370 = vmatpush.msra.mxu1 %v106_v14  ;;  %342 = vmatpush.msra.mxu0 %v89_v16  ;;  %v103_v26 = vld [vmem:[%s1806_s1 + $0xc8] sm:$0xff]  ;;  %v118_v29 = vld [vmem:[%s1806_s1 + $0x140] sm:$0xff]  ;;  %v85_v32 = vld [vmem:[%s1806_s1 + $0x38] sm:$0xff] }
   0xb   :  { %428 = vmatpush.msra.mxu3 %v138_v15  ;;  %400 = vmatpush.msra.mxu2 %v121_v17  ;;  %v135_v27 = vld [vmem:[%s1806_s1 + $0x1c8] sm:$0xff]  ;;  %v102_v30 = vld [vmem:[%s1806_s1 + $0xc0] sm:$0xff]  ;;  %v117_v33 = vld [vmem:[%s1806_s1 + $0x138] sm:$0xff] }
   0xc   :  { %371 = vmatpush.msra.mxu1 %v105_v18  ;;  %343 = vmatpush.msra.mxu0 %v88_v20  ;;  %v134_v31 = vld [vmem:[%s1806_s1 + $0x1c0] sm:$0xff]  ;;  %v101_v34 = vld [vmem:[%s1806_s1 + $0xb8] sm:$0xff]  ;;  %v84_v36 = vld [vmem:[%s1806_s1 + $0x30] sm:$0xff] }
   0xd   :  { %429 = vmatpush.msra.mxu3 %v137_v19  ;;  %401 = vmatpush.msra.mxu2 %v120_v21  ;;  %v133_v35 = vld [vmem:[%s1806_s1 + $0x1b8] sm:$0xff]  ;;  %v116_v37 = vld [vmem:[%s1806_s1 + $0x130] sm:$0xff]  ;;  %v83_v40 = vld [vmem:[%s1806_s1 + $0x28] sm:$0xff] }
   0xe   :  { %372 = vmatpush.msra.mxu1 %v104_v22  ;;  %344 = vmatpush.msra.mxu0 %v87_v24  ;;  %v100_v38 = vld [vmem:[%s1806_s1 + $0xb0] sm:$0xff]  ;;  %v115_v41 = vld [vmem:[%s1806_s1 + $0x128] sm:$0xff]  ;;  %v82_v44 = vld [vmem:[%s1806_s1 + $0x20] sm:$0xff] }
   0xf   :  { %430 = vmatpush.msra.mxu3 %v136_v23  ;;  %402 = vmatpush.msra.mxu2 %v119_v25  ;;  %v132_v39 = vld [vmem:[%s1806_s1 + $0x1b0] sm:$0xff]  ;;  %v99_v42 = vld [vmem:[%s1806_s1 + $0xa8] sm:$0xff]  ;;  %v114_v45 = vld [vmem:[%s1806_s1 + $0x120] sm:$0xff] }
  0x10   :  { %373 = vmatpush.msra.mxu1 %v103_v26  ;;  %345 = vmatpush.msra.mxu0 %v86_v28  ;;  %v131_v43 = vld [vmem:[%s1806_s1 + $0x1a8] sm:$0xff]  ;;  %v98_v46 = vld [vmem:[%s1806_s1 + $0xa0] sm:$0xff]  ;;  %v81_v48 = vld [vmem:[%s1806_s1 + $0x18] sm:$0xff] }
  0x11   :  { %431 = vmatpush.msra.mxu3 %v135_v27  ;;  %403 = vmatpush.msra.mxu2 %v118_v29  ;;  %v130_v47 = vld [vmem:[%s1806_s1 + $0x1a0] sm:$0xff]  ;;  %v113_v49 = vld [vmem:[%s1806_s1 + $0x118] sm:$0xff]  ;;  %v80_v52 = vld [vmem:[%s1806_s1 + $0x10] sm:$0xff] }
  0x12   :  { %374 = vmatpush.msra.mxu1 %v102_v30  ;;  %346 = vmatpush.msra.mxu0 %v85_v32  ;;  %v97_v50 = vld [vmem:[%s1806_s1 + $0x98] sm:$0xff]  ;;  %v112_v53 = vld [vmem:[%s1806_s1 + $0x110] sm:$0xff]  ;;  %v79_v56 = vld [vmem:[%s1806_s1 + $0x8] sm:$0xff] }
  0x13   :  { %432 = vmatpush.msra.mxu3 %v134_v31  ;;  %404 = vmatpush.msra.mxu2 %v117_v33  ;;  %v129_v51 = vld [vmem:[%s1806_s1 + $0x198] sm:$0xff]  ;;  %v96_v54 = vld [vmem:[%s1806_s1 + $0x90] sm:$0xff]  ;;  %v111_v57 = vld [vmem:[%s1806_s1 + $0x108] sm:$0xff] }
  0x14   :  { %375 = vmatpush.msra.mxu1 %v101_v34  ;;  %347 = vmatpush.msra.mxu0 %v84_v36  ;;  %v128_v55 = vld [vmem:[%s1806_s1 + $0x190] sm:$0xff]  ;;  %v95_v58 = vld [vmem:[%s1806_s1 + $0x88] sm:$0xff]  ;;  %v78_v60 = vld [vmem:[%s1806_s1] sm:$0xff] }
  0x15   :  { %433 = vmatpush.msra.mxu3 %v133_v35  ;;  %405 = vmatpush.msra.mxu2 %v116_v37  ;;  %v127_v59 = vld [vmem:[%s1806_s1 + $0x188] sm:$0xff]  ;;  %v110_v61 = vld [vmem:[%s1806_s1 + $0x100] sm:$0xff]  ;;  %v16_v63 = vld [vmem:[%s1807_s0 + $0x10] sm:$0xff] }
  0x16   :  { %376 = vmatpush.msra.mxu1 %v100_v38  ;;  %348 = vmatpush.msra.mxu0 %v83_v40  ;;  %v14_v62 = vld [vmem:[%s1807_s0] sm:$0xff]  ;;  %v189_v0 = vld [vmem:[%s1806_s1 + $0x378] sm:$0xff]  ;;  %v15_v4 = vld [vmem:[%s1807_s0 + $0x8] sm:$0xff] }
  0x17   :  { %434 = vmatpush.msra.mxu3 %v132_v39  ;;  %406 = vmatpush.msra.mxu2 %v115_v41  ;;  %v94_v1 = vld [vmem:[%s1806_s1 + $0x80] sm:$0xff]  ;;  %v157_v3 = vld [vmem:[%s1806_s1 + $0x278] sm:$0xff]  ;;  %v188_v6 = vld [vmem:[%s1806_s1 + $0x370] sm:$0xff] }
  0x18   :  { %377 = vmatpush.msra.mxu1 %v99_v42  ;;  %349 = vmatpush.msra.mxu0 %v82_v44  ;;  %v126_v2 = vld [vmem:[%s1806_s1 + $0x180] sm:$0xff]  ;;  %v17_v5 = vld [vmem:[%s1807_s0 + $0x18] sm:$0xff]  ;;  %v156_v8 = vld [vmem:[%s1806_s1 + $0x270] sm:$0xff] }
  0x19   :  { %435 = vmatpush.msra.mxu3 %v131_v43  ;;  %407 = vmatpush.msra.mxu2 %v114_v45  ;;  %v205_v7 = vld [vmem:[%s1806_s1 + $0x3f8] sm:$0xff]  ;;  %v187_v10 = vld [vmem:[%s1806_s1 + $0x368] sm:$0xff]  ;;  %v204_v11 = vld [vmem:[%s1806_s1 + $0x3f0] sm:$0xff] }
  0x1a   :  { %378 = vmatpush.msra.mxu1 %v98_v46  ;;  %350 = vmatpush.msra.mxu0 %v81_v48  ;;  %v173_v9 = vld [vmem:[%s1806_s1 + $0x2f8] sm:$0xff]  ;;  %v155_v12 = vld [vmem:[%s1806_s1 + $0x268] sm:$0xff]  ;;  %v172_v13 = vld [vmem:[%s1806_s1 + $0x2f0] sm:$0xff] }
  0x1b   :  { %436 = vmatpush.msra.mxu3 %v130_v47  ;;  %408 = vmatpush.msra.mxu2 %v113_v49  ;;  %v186_v14 = vld [vmem:[%s1806_s1 + $0x360] sm:$0xff]  ;;  %v203_v15 = vld [vmem:[%s1806_s1 + $0x3e8] sm:$0xff]  ;;  %v32_v19 = vld [vmem:[%s1807_s0 + $0x90] sm:$0xff] }
  0x1c   :  { %379 = vmatpush.msra.mxu1 %v97_v50  ;;  %351 = vmatpush.msra.mxu0 %v80_v52  ;;  %v154_v16 = vld [vmem:[%s1806_s1 + $0x260] sm:$0xff]  ;;  %v171_v17 = vld [vmem:[%s1806_s1 + $0x2e8] sm:$0xff]  ;;  %v185_v20 = vld [vmem:[%s1806_s1 + $0x358] sm:$0xff] }
  0x1d   :  { %437 = vmatpush.msra.mxu3 %v129_v51  ;;  %409 = vmatpush.msra.mxu2 %v112_v53  ;;  %v30_v18 = vld [vmem:[%s1807_s0 + $0x80] sm:$0xff]  ;;  %v153_v22 = vld [vmem:[%s1806_s1 + $0x258] sm:$0xff]  ;;  %v31_v24 = vld [vmem:[%s1807_s0 + $0x88] sm:$0xff] }
  0x1e   :  { %380 = vmatpush.msra.mxu1 %v96_v54  ;;  %352 = vmatpush.msra.mxu0 %v79_v56  ;;  %v202_v21 = vld [vmem:[%s1806_s1 + $0x3e0] sm:$0xff]  ;;  %v33_v25 = vld [vmem:[%s1807_s0 + $0x98] sm:$0xff]  ;;  %v184_v26 = vld [vmem:[%s1806_s1 + $0x350] sm:$0xff] }
  0x1f   :  { %438 = vmatpush.msra.mxu3 %v128_v55  ;;  %410 = vmatpush.msra.mxu2 %v111_v57  ;;  %v170_v23 = vld [vmem:[%s1806_s1 + $0x2e0] sm:$0xff]  ;;  %v201_v27 = vld [vmem:[%s1806_s1 + $0x3d8] sm:$0xff]  ;;  %v152_v28 = vld [vmem:[%s1806_s1 + $0x250] sm:$0xff] }
  0x20   :  { %381 = vmatpush.msra.mxu1 %v95_v58  ;;  %353 = vmatpush.msra.mxu0 %v78_v60  ;;  %v169_v29 = vld [vmem:[%s1806_s1 + $0x2d8] sm:$0xff]  ;;  %v183_v30 = vld [vmem:[%s1806_s1 + $0x348] sm:$0xff]  ;;  %v200_v31 = vld [vmem:[%s1806_s1 + $0x3d0] sm:$0xff] }
  0x21   :  { %439 = vmatpush.msra.mxu3 %v127_v59  ;;  %411 = vmatpush.msra.mxu2 %v110_v61  ;;  %v151_v32 = vld [vmem:[%s1806_s1 + $0x248] sm:$0xff]  ;;  %v168_v33 = vld [vmem:[%s1806_s1 + $0x2d0] sm:$0xff]  ;;  %v182_v34 = vld [vmem:[%s1806_s1 + $0x340] sm:$0xff] }
  0x22   :  { %354 = vmatmul.f32.vlgmr.msra.gmra.mxu0 %v14_v62  ;;  %412 = vmatmul.f32.vlgmr.msra.gmra.mxu2 %v16_v63  ;;  %v199_v35 = vld [vmem:[%s1806_s1 + $0x3c8] sm:$0xff]  ;;  %v150_v36 = vld [vmem:[%s1806_s1 + $0x240] sm:$0xff]  ;;  %v48_v39 = vld [vmem:[%s1807_s0 + $0x110] sm:$0xff] }
  0x23   :  { %512 = vmatpush.msrb.mxu2 %v189_v0  ;;  %382 = vmatpush.msra.mxu1 %v94_v1  ;;  %v167_v37 = vld [vmem:[%s1806_s1 + $0x2c8] sm:$0xff]  ;;  %v46_v38 = vld [vmem:[%s1807_s0 + $0x100] sm:$0xff]  ;;  %v181_v40 = vld [vmem:[%s1806_s1 + $0x338] sm:$0xff] }
  0x24   :  { %440 = vmatpush.msra.mxu3 %v126_v2  ;;  %454 = vmatpush.msrb.mxu0 %v157_v3  ;;  %v198_v41 = vld [vmem:[%s1806_s1 + $0x3c0] sm:$0xff]  ;;  %v149_v42 = vld [vmem:[%s1806_s1 + $0x238] sm:$0xff]  ;;  %v47_v44 = vld [vmem:[%s1807_s0 + $0x108] sm:$0xff] }
  0x25   :  { %383 = vmatmul.f32.vlgmr.msra.gmra.mxu1 %v15_v4  ;;  %441 = vmatmul.f32.vlgmr.msra.gmra.mxu3 %v17_v5  ;;  %v166_v43 = vld [vmem:[%s1806_s1 + $0x2c0] sm:$0xff]  ;;  %v49_v45 = vld [vmem:[%s1807_s0 + $0x118] sm:$0xff]  ;;  %v180_v46 = vld [vmem:[%s1806_s1 + $0x330] sm:$0xff] }
  0x26   :  { %513 = vmatpush.msrb.mxu2 %v188_v6  ;;  %541 = vmatpush.msrb.mxu3 %v205_v7  ;;  %v197_v47 = vld [vmem:[%s1806_s1 + $0x3b8] sm:$0xff]  ;;  %v148_v48 = vld [vmem:[%s1806_s1 + $0x230] sm:$0xff]  ;;  %v179_v50 = vld [vmem:[%s1806_s1 + $0x328] sm:$0xff] }
  0x27   :  { %455 = vmatpush.msrb.mxu0 %v156_v8  ;;  %483 = vmatpush.msrb.mxu1 %v173_v9  ;;  %v165_v49 = vld [vmem:[%s1806_s1 + $0x2b8] sm:$0xff]  ;;  %v196_v51 = vld [vmem:[%s1806_s1 + $0x3b0] sm:$0xff]  ;;  %v147_v52 = vld [vmem:[%s1806_s1 + $0x228] sm:$0xff] }
  0x28   :  { %514 = vmatpush.msrb.mxu2 %v187_v10  ;;  %542 = vmatpush.msrb.mxu3 %v204_v11  ;;  %v164_v53 = vld [vmem:[%s1806_s1 + $0x2b0] sm:$0xff]  ;;  %v178_v54 = vld [vmem:[%s1806_s1 + $0x320] sm:$0xff]  ;;  %v195_v55 = vld [vmem:[%s1806_s1 + $0x3a8] sm:$0xff] }
  0x29   :  { %456 = vmatpush.msrb.mxu0 %v155_v12  ;;  %484 = vmatpush.msrb.mxu1 %v172_v13  ;;  %v146_v56 = vld [vmem:[%s1806_s1 + $0x220] sm:$0xff]  ;;  %v163_v57 = vld [vmem:[%s1806_s1 + $0x2a8] sm:$0xff]  ;;  %v64_v59 = vld [vmem:[%s1807_s0 + $0x190] sm:$0xff] }
  0x2a   :  { %515 = vmatpush.msrb.mxu2 %v186_v14  ;;  %543 = vmatpush.msrb.mxu3 %v203_v15  ;;  %v62_v58 = vld [vmem:[%s1807_s0 + $0x180] sm:$0xff]  ;;  %v177_v60 = vld [vmem:[%s1806_s1 + $0x318] sm:$0xff]  ;;  %v63_v0 = vld [vmem:[%s1807_s0 + $0x188] sm:$0xff] }
  0x2b   :  { %457 = vmatpush.msrb.mxu0 %v154_v16  ;;  %485 = vmatpush.msrb.mxu1 %v171_v17  ;;  %v194_v61 = vld [vmem:[%s1806_s1 + $0x3a0] sm:$0xff]  ;;  %v145_v62 = vld [vmem:[%s1806_s1 + $0x218] sm:$0xff]  ;;  %v176_v2 = vld [vmem:[%s1806_s1 + $0x310] sm:$0xff] }
  0x2c   :  { %357 = vmatmul.f32.gmra.mxu0 %v30_v18  ;;  %415 = vmatmul.f32.gmra.mxu2 %v32_v19  ;;  %v162_v63 = vld [vmem:[%s1806_s1 + $0x2a0] sm:$0xff]  ;;  %v65_v1 = vld [vmem:[%s1807_s0 + $0x198] sm:$0xff]  ;;  %v144_v4 = vld [vmem:[%s1806_s1 + $0x210] sm:$0xff] }
  0x2d   :  { %516 = vmatpush.msrb.mxu2 %v185_v20  ;;  %544 = vmatpush.msrb.mxu3 %v202_v21  ;;  %v193_v3 = vld [vmem:[%s1806_s1 + $0x398] sm:$0xff]  ;;  %v175_v6 = vld [vmem:[%s1806_s1 + $0x308] sm:$0xff]  ;;  %v192_v7 = vld [vmem:[%s1806_s1 + $0x390] sm:$0xff] }
  0x2e   :  { %458 = vmatpush.msrb.mxu0 %v153_v22  ;;  %486 = vmatpush.msrb.mxu1 %v170_v23  ;;  %v161_v5 = vld [vmem:[%s1806_s1 + $0x298] sm:$0xff]  ;;  %v143_v8 = vld [vmem:[%s1806_s1 + $0x208] sm:$0xff]  ;;  %v160_v9 = vld [vmem:[%s1806_s1 + $0x290] sm:$0xff] }
  0x2f   :  { %386 = vmatmul.f32.gmra.mxu1 %v31_v24  ;;  %444 = vmatmul.f32.gmra.mxu3 %v33_v25  ;;  %v174_v10 = vld [vmem:[%s1806_s1 + $0x300] sm:$0xff]  ;;  %v191_v11 = vld [vmem:[%s1806_s1 + $0x388] sm:$0xff]  ;;  %v20_v15 = vld [vmem:[%s1807_s0 + $0x30] sm:$0xff] }
  0x30   :  { %517 = vmatpush.msrb.mxu2 %v184_v26  ;;  %545 = vmatpush.msrb.mxu3 %v201_v27  ;;  %v142_v12 = vld [vmem:[%s1806_s1 + $0x200] sm:$0xff]  ;;  %v159_v13 = vld [vmem:[%s1806_s1 + $0x288] sm:$0xff]  ;;  %v253_v17 = vld [vmem:[%s1806_s1 + $0x578] sm:$0xff] }
  0x31   :  { %459 = vmatpush.msrb.mxu0 %v152_v28  ;;  %487 = vmatpush.msrb.mxu1 %v169_v29  ;;  %v18_v14 = vld [vmem:[%s1807_s0 + $0x20] sm:$0xff]  ;;  %v221_v19 = vld [vmem:[%s1806_s1 + $0x478] sm:$0xff]  ;;  %v19_v20 = vld [vmem:[%s1807_s0 + $0x28] sm:$0xff] }
  0x32   :  { %518 = vmatpush.msrb.mxu2 %v183_v30  ;;  %546 = vmatpush.msrb.mxu3 %v200_v31  ;;  %v190_v16 = vld [vmem:[%s1806_s1 + $0x380] sm:$0xff]  ;;  %v21_v21 = vld [vmem:[%s1807_s0 + $0x38] sm:$0xff]  ;;  %v252_v22 = vld [vmem:[%s1806_s1 + $0x570] sm:$0xff] }
  0x33   :  { %460 = vmatpush.msrb.mxu0 %v151_v32  ;;  %488 = vmatpush.msrb.mxu1 %v168_v33  ;;  %v158_v18 = vld [vmem:[%s1806_s1 + $0x280] sm:$0xff]  ;;  %v269_v23 = vld [vmem:[%s1806_s1 + $0x5f8] sm:$0xff]  ;;  %v220_v24 = vld [vmem:[%s1806_s1 + $0x470] sm:$0xff] }
  0x34   :  { %519 = vmatpush.msrb.mxu2 %v182_v34  ;;  %547 = vmatpush.msrb.mxu3 %v199_v35  ;;  %v237_v25 = vld [vmem:[%s1806_s1 + $0x4f8] sm:$0xff]  ;;  %v251_v26 = vld [vmem:[%s1806_s1 + $0x568] sm:$0xff]  ;;  %v268_v27 = vld [vmem:[%s1806_s1 + $0x5f0] sm:$0xff] }
  0x35   :  { %461 = vmatpush.msrb.mxu0 %v150_v36  ;;  %489 = vmatpush.msrb.mxu1 %v167_v37  ;;  %v219_v28 = vld [vmem:[%s1806_s1 + $0x468] sm:$0xff]  ;;  %v236_v29 = vld [vmem:[%s1806_s1 + $0x4f0] sm:$0xff]  ;;  %v250_v30 = vld [vmem:[%s1806_s1 + $0x560] sm:$0xff] }
  0x36   :  { %360 = vmatmul.f32.gmra.mxu0 %v46_v38  ;;  %418 = vmatmul.f32.gmra.mxu2 %v48_v39  ;;  %v267_v31 = vld [vmem:[%s1806_s1 + $0x5e8] sm:$0xff]  ;;  %v218_v32 = vld [vmem:[%s1806_s1 + $0x460] sm:$0xff]  ;;  %v36_v35 = vld [vmem:[%s1807_s0 + $0xb0] sm:$0xff] }
  0x37   :  { %520 = vmatpush.msrb.mxu2 %v181_v40  ;;  %548 = vmatpush.msrb.mxu3 %v198_v41  ;;  %v235_v33 = vld [vmem:[%s1806_s1 + $0x4e8] sm:$0xff]  ;;  %v34_v34 = vld [vmem:[%s1807_s0 + $0xa0] sm:$0xff]  ;;  %v249_v36 = vld [vmem:[%s1806_s1 + $0x558] sm:$0xff] }
  0x38   :  { %462 = vmatpush.msrb.mxu0 %v149_v42  ;;  %490 = vmatpush.msrb.mxu1 %v166_v43  ;;  %v266_v37 = vld [vmem:[%s1806_s1 + $0x5e0] sm:$0xff]  ;;  %v217_v38 = vld [vmem:[%s1806_s1 + $0x458] sm:$0xff]  ;;  %v35_v40 = vld [vmem:[%s1807_s0 + $0xa8] sm:$0xff] }
  0x39   :  { %389 = vmatmul.f32.gmra.mxu1 %v47_v44  ;;  %447 = vmatmul.f32.gmra.mxu3 %v49_v45  ;;  %v234_v39 = vld [vmem:[%s1806_s1 + $0x4e0] sm:$0xff]  ;;  %v37_v41 = vld [vmem:[%s1807_s0 + $0xb8] sm:$0xff]  ;;  %v248_v42 = vld [vmem:[%s1806_s1 + $0x550] sm:$0xff] }
  0x3a   :  { %521 = vmatpush.msrb.mxu2 %v180_v46  ;;  %549 = vmatpush.msrb.mxu3 %v197_v47  ;;  %v265_v43 = vld [vmem:[%s1806_s1 + $0x5d8] sm:$0xff]  ;;  %v216_v44 = vld [vmem:[%s1806_s1 + $0x450] sm:$0xff]  ;;  %v247_v46 = vld [vmem:[%s1806_s1 + $0x548] sm:$0xff] }
  0x3b   :  { %463 = vmatpush.msrb.mxu0 %v148_v48  ;;  %491 = vmatpush.msrb.mxu1 %v165_v49  ;;  %v233_v45 = vld [vmem:[%s1806_s1 + $0x4d8] sm:$0xff]  ;;  %v264_v47 = vld [vmem:[%s1806_s1 + $0x5d0] sm:$0xff]  ;;  %v215_v48 = vld [vmem:[%s1806_s1 + $0x448] sm:$0xff] }
  0x3c   :  { %522 = vmatpush.msrb.mxu2 %v179_v50  ;;  %550 = vmatpush.msrb.mxu3 %v196_v51  ;;  %v232_v49 = vld [vmem:[%s1806_s1 + $0x4d0] sm:$0xff]  ;;  %v246_v50 = vld [vmem:[%s1806_s1 + $0x540] sm:$0xff]  ;;  %v263_v51 = vld [vmem:[%s1806_s1 + $0x5c8] sm:$0xff] }
  0x3d   :  { %464 = vmatpush.msrb.mxu0 %v147_v52  ;;  %492 = vmatpush.msrb.mxu1 %v164_v53  ;;  %v214_v52 = vld [vmem:[%s1806_s1 + $0x440] sm:$0xff]  ;;  %v231_v53 = vld [vmem:[%s1806_s1 + $0x4c8] sm:$0xff] }
  0x3e   :  { %523 = vmatpush.msrb.mxu2 %v178_v54  ;;  %551 = vmatpush.msrb.mxu3 %v195_v55  ;;  %v50_v54 = vld [vmem:[%s1807_s0 + $0x120] sm:$0xff]  ;;  %v52_v55 = vld [vmem:[%s1807_s0 + $0x130] sm:$0xff] }
  0x3f   :  { %465 = vmatpush.msrb.mxu0 %v146_v56  ;;  %493 = vmatpush.msrb.mxu1 %v163_v57  ;;  %v245_v56 = vld [vmem:[%s1806_s1 + $0x538] sm:$0xff]  ;;  %v262_v57 = vld [vmem:[%s1806_s1 + $0x5c0] sm:$0xff] }
  0x40   :  { %363 = vmatmul.f32.gmra.mxu0 %v62_v58  ;;  %421 = vmatmul.f32.gmra.mxu2 %v64_v59  ;;  %v213_v58 = vld [vmem:[%s1806_s1 + $0x438] sm:$0xff]  ;;  %v230_v59 = vld [vmem:[%s1806_s1 + $0x4c0] sm:$0xff] }
  0x41   :  { %524 = vmatpush.msrb.mxu2 %v177_v60  ;;  %552 = vmatpush.msrb.mxu3 %v194_v61  ;;  %v51_v60 = vld [vmem:[%s1807_s0 + $0x128] sm:$0xff]  ;;  %v53_v61 = vld [vmem:[%s1807_s0 + $0x138] sm:$0xff] }
  0x42   :  { %466 = vmatpush.msrb.mxu0 %v145_v62  ;;  %494 = vmatpush.msrb.mxu1 %v162_v63  ;;  %v244_v62 = vld [vmem:[%s1806_s1 + $0x530] sm:$0xff]  ;;  %v261_v63 = vld [vmem:[%s1806_s1 + $0x5b8] sm:$0xff] }
  0x43   :  { %392 = vmatmul.f32.gmra.mxu1 %v63_v0  ;;  %450 = vmatmul.f32.gmra.mxu3 %v65_v1  ;;  %v212_v0 = vld [vmem:[%s1806_s1 + $0x430] sm:$0xff]  ;;  %v229_v1 = vld [vmem:[%s1806_s1 + $0x4b8] sm:$0xff] }
  0x44   :  { %525 = vmatpush.msrb.mxu2 %v176_v2  ;;  %553 = vmatpush.msrb.mxu3 %v193_v3  ;;  %v243_v2 = vld [vmem:[%s1806_s1 + $0x528] sm:$0xff]  ;;  %v260_v3 = vld [vmem:[%s1806_s1 + $0x5b0] sm:$0xff] }
  0x45   :  { %467 = vmatpush.msrb.mxu0 %v144_v4  ;;  %495 = vmatpush.msrb.mxu1 %v161_v5  ;;  %v211_v4 = vld [vmem:[%s1806_s1 + $0x428] sm:$0xff]  ;;  %v228_v5 = vld [vmem:[%s1806_s1 + $0x4b0] sm:$0xff] }
  0x46   :  { %526 = vmatpush.msrb.mxu2 %v175_v6  ;;  %554 = vmatpush.msrb.mxu3 %v192_v7  ;;  %v242_v6 = vld [vmem:[%s1806_s1 + $0x520] sm:$0xff]  ;;  %v259_v7 = vld [vmem:[%s1806_s1 + $0x5a8] sm:$0xff] }
  0x47   :  { %468 = vmatpush.msrb.mxu0 %v143_v8  ;;  %496 = vmatpush.msrb.mxu1 %v160_v9  ;;  %v210_v8 = vld [vmem:[%s1806_s1 + $0x420] sm:$0xff]  ;;  %v227_v9 = vld [vmem:[%s1806_s1 + $0x4a8] sm:$0xff] }
  0x48   :  { %527 = vmatpush.msrb.mxu2 %v174_v10  ;;  %555 = vmatpush.msrb.mxu3 %v191_v11  ;;  %v66_v10 = vld [vmem:[%s1807_s0 + $0x1a0] sm:$0xff]  ;;  %v68_v11 = vld [vmem:[%s1807_s0 + $0x1b0] sm:$0xff] }
  0x49   :  { %469 = vmatpush.msrb.mxu0 %v142_v12  ;;  %497 = vmatpush.msrb.mxu1 %v159_v13  ;;  %v241_v12 = vld [vmem:[%s1806_s1 + $0x518] sm:$0xff]  ;;  %v258_v13 = vld [vmem:[%s1806_s1 + $0x5a0] sm:$0xff] }
  0x4a   :  { %470 = vmatmul.f32.vlgmr.msrb.gmra.mxu0 %v18_v14  ;;  %528 = vmatmul.f32.vlgmr.msrb.gmra.mxu2 %v20_v15  ;;  %v209_v14 = vld [vmem:[%s1806_s1 + $0x418] sm:$0xff]  ;;  %v226_v15 = vld [vmem:[%s1806_s1 + $0x4a0] sm:$0xff] }
  0x4b   :  { %556 = vmatpush.msrb.mxu3 %v190_v16  ;;  %628 = vmatpush.msra.mxu2 %v253_v17  ;;  %v67_v16 = vld [vmem:[%s1807_s0 + $0x1a8] sm:$0xff]  ;;  %v69_v17 = vld [vmem:[%s1807_s0 + $0x1b8] sm:$0xff] }
  0x4c   :  { %498 = vmatpush.msrb.mxu1 %v158_v18  ;;  %570 = vmatpush.msra.mxu0 %v221_v19  ;;  %v240_v18 = vld [vmem:[%s1806_s1 + $0x510] sm:$0xff]  ;;  %v257_v19 = vld [vmem:[%s1806_s1 + $0x598] sm:$0xff] }
  0x4d   :  { %499 = vmatmul.f32.vlgmr.msrb.gmra.mxu1 %v19_v20  ;;  %557 = vmatmul.f32.vlgmr.msrb.gmra.mxu3 %v21_v21  ;;  %v208_v20 = vld [vmem:[%s1806_s1 + $0x410] sm:$0xff]  ;;  %v225_v21 = vld [vmem:[%s1806_s1 + $0x498] sm:$0xff] }
  0x4e   :  { %629 = vmatpush.msra.mxu2 %v252_v22  ;;  %657 = vmatpush.msra.mxu3 %v269_v23  ;;  %v239_v22 = vld [vmem:[%s1806_s1 + $0x508] sm:$0xff]  ;;  %v256_v23 = vld [vmem:[%s1806_s1 + $0x590] sm:$0xff] }
  0x4f   :  { %571 = vmatpush.msra.mxu0 %v220_v24  ;;  %599 = vmatpush.msra.mxu1 %v237_v25  ;;  %v207_v24 = vld [vmem:[%s1806_s1 + $0x408] sm:$0xff]  ;;  %v224_v25 = vld [vmem:[%s1806_s1 + $0x490] sm:$0xff] }
  0x50   :  { %630 = vmatpush.msra.mxu2 %v251_v26  ;;  %658 = vmatpush.msra.mxu3 %v268_v27  ;;  %v238_v26 = vld [vmem:[%s1806_s1 + $0x500] sm:$0xff]  ;;  %v255_v27 = vld [vmem:[%s1806_s1 + $0x588] sm:$0xff] }
  0x51   :  { %572 = vmatpush.msra.mxu0 %v219_v28  ;;  %600 = vmatpush.msra.mxu1 %v236_v29  ;;  %v206_v28 = vld [vmem:[%s1806_s1 + $0x400] sm:$0xff]  ;;  %v223_v29 = vld [vmem:[%s1806_s1 + $0x488] sm:$0xff] }
  0x52   :  { %631 = vmatpush.msra.mxu2 %v250_v30  ;;  %659 = vmatpush.msra.mxu3 %v267_v31  ;;  %v22_v30 = vld [vmem:[%s1807_s0 + $0x40] sm:$0xff]  ;;  %v24_v31 = vld [vmem:[%s1807_s0 + $0x50] sm:$0xff] }
  0x53   :  { %573 = vmatpush.msra.mxu0 %v218_v32  ;;  %601 = vmatpush.msra.mxu1 %v235_v33  ;;  %v254_v32 = vld [vmem:[%s1806_s1 + $0x580] sm:$0xff]  ;;  %v317_v33 = vld [vmem:[%s1806_s1 + $0x778] sm:$0xff] }
  0x54   :  { %473 = vmatmul.f32.gmra.mxu0 %v34_v34  ;;  %531 = vmatmul.f32.gmra.mxu2 %v36_v35  ;;  %v222_v34 = vld [vmem:[%s1806_s1 + $0x480] sm:$0xff]  ;;  %v285_v35 = vld [vmem:[%s1806_s1 + $0x678] sm:$0xff] }
  0x55   :  { %632 = vmatpush.msra.mxu2 %v249_v36  ;;  %660 = vmatpush.msra.mxu3 %v266_v37  ;;  %v23_v36 = vld [vmem:[%s1807_s0 + $0x48] sm:$0xff]  ;;  %v25_v37 = vld [vmem:[%s1807_s0 + $0x58] sm:$0xff] }
  0x56   :  { %574 = vmatpush.msra.mxu0 %v217_v38  ;;  %602 = vmatpush.msra.mxu1 %v234_v39  ;;  %v316_v38 = vld [vmem:[%s1806_s1 + $0x770] sm:$0xff]  ;;  %v333_v39 = vld [vmem:[%s1806_s1 + $0x7f8] sm:$0xff] }
  0x57   :  { %502 = vmatmul.f32.gmra.mxu1 %v35_v40  ;;  %560 = vmatmul.f32.gmra.mxu3 %v37_v41  ;;  %v284_v40 = vld [vmem:[%s1806_s1 + $0x670] sm:$0xff]  ;;  %v301_v41 = vld [vmem:[%s1806_s1 + $0x6f8] sm:$0xff] }
  0x58   :  { %633 = vmatpush.msra.mxu2 %v248_v42  ;;  %661 = vmatpush.msra.mxu3 %v265_v43  ;;  %v315_v42 = vld [vmem:[%s1806_s1 + $0x768] sm:$0xff]  ;;  %v332_v43 = vld [vmem:[%s1806_s1 + $0x7f0] sm:$0xff] }
  0x59   :  { %575 = vmatpush.msra.mxu0 %v216_v44  ;;  %603 = vmatpush.msra.mxu1 %v233_v45  ;;  %v283_v44 = vld [vmem:[%s1806_s1 + $0x668] sm:$0xff]  ;;  %v300_v45 = vld [vmem:[%s1806_s1 + $0x6f0] sm:$0xff] }
  0x5a   :  { %634 = vmatpush.msra.mxu2 %v247_v46  ;;  %662 = vmatpush.msra.mxu3 %v264_v47  ;;  %v314_v46 = vld [vmem:[%s1806_s1 + $0x760] sm:$0xff]  ;;  %v331_v47 = vld [vmem:[%s1806_s1 + $0x7e8] sm:$0xff] }
  0x5b   :  { %576 = vmatpush.msra.mxu0 %v215_v48  ;;  %604 = vmatpush.msra.mxu1 %v232_v49  ;;  %v282_v48 = vld [vmem:[%s1806_s1 + $0x660] sm:$0xff]  ;;  %v299_v49 = vld [vmem:[%s1806_s1 + $0x6e8] sm:$0xff] }
  0x5c   :  { %635 = vmatpush.msra.mxu2 %v246_v50  ;;  %663 = vmatpush.msra.mxu3 %v263_v51  ;;  %v38_v50 = vld [vmem:[%s1807_s0 + $0xc0] sm:$0xff]  ;;  %v40_v51 = vld [vmem:[%s1807_s0 + $0xd0] sm:$0xff] }
  0x5d   :  { %577 = vmatpush.msra.mxu0 %v214_v52  ;;  %605 = vmatpush.msra.mxu1 %v231_v53  ;;  %v313_v52 = vld [vmem:[%s1806_s1 + $0x758] sm:$0xff]  ;;  %v330_v53 = vld [vmem:[%s1806_s1 + $0x7e0] sm:$0xff] }
  0x5e   :  { %476 = vmatmul.f32.gmra.mxu0 %v50_v54  ;;  %534 = vmatmul.f32.gmra.mxu2 %v52_v55  ;;  %v281_v54 = vld [vmem:[%s1806_s1 + $0x658] sm:$0xff]  ;;  %v298_v55 = vld [vmem:[%s1806_s1 + $0x6e0] sm:$0xff] }
  0x5f   :  { %636 = vmatpush.msra.mxu2 %v245_v56  ;;  %664 = vmatpush.msra.mxu3 %v262_v57  ;;  %v39_v56 = vld [vmem:[%s1807_s0 + $0xc8] sm:$0xff]  ;;  %v41_v57 = vld [vmem:[%s1807_s0 + $0xd8] sm:$0xff] }
  0x60   :  { %578 = vmatpush.msra.mxu0 %v213_v58  ;;  %606 = vmatpush.msra.mxu1 %v230_v59  ;;  %v312_v58 = vld [vmem:[%s1806_s1 + $0x750] sm:$0xff]  ;;  %v329_v59 = vld [vmem:[%s1806_s1 + $0x7d8] sm:$0xff] }
  0x61   :  { %505 = vmatmul.f32.gmra.mxu1 %v51_v60  ;;  %563 = vmatmul.f32.gmra.mxu3 %v53_v61  ;;  %v280_v60 = vld [vmem:[%s1806_s1 + $0x650] sm:$0xff]  ;;  %v297_v61 = vld [vmem:[%s1806_s1 + $0x6d8] sm:$0xff] }
  0x62   :  { %637 = vmatpush.msra.mxu2 %v244_v62  ;;  %665 = vmatpush.msra.mxu3 %v261_v63  ;;  %v311_v62 = vld [vmem:[%s1806_s1 + $0x748] sm:$0xff]  ;;  %v328_v63 = vld [vmem:[%s1806_s1 + $0x7d0] sm:$0xff] }
  0x63   :  { %579 = vmatpush.msra.mxu0 %v212_v0  ;;  %607 = vmatpush.msra.mxu1 %v229_v1  ;;  %v279_v0 = vld [vmem:[%s1806_s1 + $0x648] sm:$0xff]  ;;  %v296_v1 = vld [vmem:[%s1806_s1 + $0x6d0] sm:$0xff] }
  0x64   :  { %638 = vmatpush.msra.mxu2 %v243_v2  ;;  %666 = vmatpush.msra.mxu3 %v260_v3  ;;  %v310_v2 = vld [vmem:[%s1806_s1 + $0x740] sm:$0xff]  ;;  %v327_v3 = vld [vmem:[%s1806_s1 + $0x7c8] sm:$0xff] }
  0x65   :  { %580 = vmatpush.msra.mxu0 %v211_v4  ;;  %608 = vmatpush.msra.mxu1 %v228_v5  ;;  %v278_v4 = vld [vmem:[%s1806_s1 + $0x640] sm:$0xff]  ;;  %v295_v5 = vld [vmem:[%s1806_s1 + $0x6c8] sm:$0xff] }
  0x66   :  { %639 = vmatpush.msra.mxu2 %v242_v6  ;;  %667 = vmatpush.msra.mxu3 %v259_v7  ;;  %v54_v6 = vld [vmem:[%s1807_s0 + $0x140] sm:$0xff]  ;;  %v56_v7 = vld [vmem:[%s1807_s0 + $0x150] sm:$0xff] }
  0x67   :  { %581 = vmatpush.msra.mxu0 %v210_v8  ;;  %609 = vmatpush.msra.mxu1 %v227_v9  ;;  %v309_v8 = vld [vmem:[%s1806_s1 + $0x738] sm:$0xff]  ;;  %v326_v9 = vld [vmem:[%s1806_s1 + $0x7c0] sm:$0xff] }
  0x68   :  { %479 = vmatmul.f32.gmra.mxu0 %v66_v10  ;;  %537 = vmatmul.f32.gmra.mxu2 %v68_v11  ;;  %v277_v10 = vld [vmem:[%s1806_s1 + $0x638] sm:$0xff]  ;;  %v294_v11 = vld [vmem:[%s1806_s1 + $0x6c0] sm:$0xff] }
  0x69   :  { %640 = vmatpush.msra.mxu2 %v241_v12  ;;  %668 = vmatpush.msra.mxu3 %v258_v13  ;;  %v55_v12 = vld [vmem:[%s1807_s0 + $0x148] sm:$0xff]  ;;  %v57_v13 = vld [vmem:[%s1807_s0 + $0x158] sm:$0xff] }
  0x6a   :  { %582 = vmatpush.msra.mxu0 %v209_v14  ;;  %610 = vmatpush.msra.mxu1 %v226_v15  ;;  %v308_v14 = vld [vmem:[%s1806_s1 + $0x730] sm:$0xff]  ;;  %v325_v15 = vld [vmem:[%s1806_s1 + $0x7b8] sm:$0xff] }
  0x6b   :  { %508 = vmatmul.f32.gmra.mxu1 %v67_v16  ;;  %566 = vmatmul.f32.gmra.mxu3 %v69_v17  ;;  %v276_v16 = vld [vmem:[%s1806_s1 + $0x630] sm:$0xff]  ;;  %v293_v17 = vld [vmem:[%s1806_s1 + $0x6b8] sm:$0xff] }
  0x6c   :  { %641 = vmatpush.msra.mxu2 %v240_v18  ;;  %669 = vmatpush.msra.mxu3 %v257_v19  ;;  %v307_v18 = vld [vmem:[%s1806_s1 + $0x728] sm:$0xff]  ;;  %v324_v19 = vld [vmem:[%s1806_s1 + $0x7b0] sm:$0xff] }
  0x6d   :  { %583 = vmatpush.msra.mxu0 %v208_v20  ;;  %611 = vmatpush.msra.mxu1 %v225_v21  ;;  %v275_v20 = vld [vmem:[%s1806_s1 + $0x628] sm:$0xff]  ;;  %v292_v21 = vld [vmem:[%s1806_s1 + $0x6b0] sm:$0xff] }
  0x6e   :  { %642 = vmatpush.msra.mxu2 %v239_v22  ;;  %670 = vmatpush.msra.mxu3 %v256_v23  ;;  %v306_v22 = vld [vmem:[%s1806_s1 + $0x720] sm:$0xff]  ;;  %v323_v23 = vld [vmem:[%s1806_s1 + $0x7a8] sm:$0xff] }
  0x6f   :  { %584 = vmatpush.msra.mxu0 %v207_v24  ;;  %612 = vmatpush.msra.mxu1 %v224_v25  ;;  %v274_v24 = vld [vmem:[%s1806_s1 + $0x620] sm:$0xff]  ;;  %v291_v25 = vld [vmem:[%s1806_s1 + $0x6a8] sm:$0xff] }
  0x70   :  { %643 = vmatpush.msra.mxu2 %v238_v26  ;;  %671 = vmatpush.msra.mxu3 %v255_v27  ;;  %v70_v26 = vld [vmem:[%s1807_s0 + $0x1c0] sm:$0xff]  ;;  %v72_v27 = vld [vmem:[%s1807_s0 + $0x1d0] sm:$0xff] }
  0x71   :  { %585 = vmatpush.msra.mxu0 %v206_v28  ;;  %613 = vmatpush.msra.mxu1 %v223_v29  ;;  %v305_v28 = vld [vmem:[%s1806_s1 + $0x718] sm:$0xff]  ;;  %v322_v29 = vld [vmem:[%s1806_s1 + $0x7a0] sm:$0xff] }
  0x72   :  { %586 = vmatmul.f32.vlgmr.msra.gmra.mxu0 %v22_v30  ;;  %644 = vmatmul.f32.vlgmr.msra.gmra.mxu2 %v24_v31  ;;  %v273_v30 = vld [vmem:[%s1806_s1 + $0x618] sm:$0xff]  ;;  %v290_v31 = vld [vmem:[%s1806_s1 + $0x6a0] sm:$0xff] }
  0x73   :  { %672 = vmatpush.msra.mxu3 %v254_v32  ;;  %744 = vmatpush.msrb.mxu2 %v317_v33  ;;  %v71_v32 = vld [vmem:[%s1807_s0 + $0x1c8] sm:$0xff]  ;;  %v73_v33 = vld [vmem:[%s1807_s0 + $0x1d8] sm:$0xff] }
  0x74   :  { %614 = vmatpush.msra.mxu1 %v222_v34  ;;  %686 = vmatpush.msrb.mxu0 %v285_v35  ;;  %v304_v34 = vld [vmem:[%s1806_s1 + $0x710] sm:$0xff]  ;;  %v321_v35 = vld [vmem:[%s1806_s1 + $0x798] sm:$0xff] }
  0x75   :  { %615 = vmatmul.f32.vlgmr.msra.gmra.mxu1 %v23_v36  ;;  %673 = vmatmul.f32.vlgmr.msra.gmra.mxu3 %v25_v37  ;;  %v272_v36 = vld [vmem:[%s1806_s1 + $0x610] sm:$0xff]  ;;  %v289_v37 = vld [vmem:[%s1806_s1 + $0x698] sm:$0xff] }
  0x76   :  { %745 = vmatpush.msrb.mxu2 %v316_v38  ;;  %773 = vmatpush.msrb.mxu3 %v333_v39  ;;  %v303_v38 = vld [vmem:[%s1806_s1 + $0x708] sm:$0xff]  ;;  %v320_v39 = vld [vmem:[%s1806_s1 + $0x790] sm:$0xff] }
  0x77   :  { %687 = vmatpush.msrb.mxu0 %v284_v40  ;;  %715 = vmatpush.msrb.mxu1 %v301_v41  ;;  %v271_v40 = vld [vmem:[%s1806_s1 + $0x608] sm:$0xff]  ;;  %v288_v41 = vld [vmem:[%s1806_s1 + $0x690] sm:$0xff] }
  0x78   :  { %746 = vmatpush.msrb.mxu2 %v315_v42  ;;  %774 = vmatpush.msrb.mxu3 %v332_v43  ;;  %v302_v42 = vld [vmem:[%s1806_s1 + $0x700] sm:$0xff]  ;;  %v319_v43 = vld [vmem:[%s1806_s1 + $0x788] sm:$0xff] }
  0x79   :  { %688 = vmatpush.msrb.mxu0 %v283_v44  ;;  %716 = vmatpush.msrb.mxu1 %v300_v45  ;;  %v270_v44 = vld [vmem:[%s1806_s1 + $0x600] sm:$0xff]  ;;  %v287_v45 = vld [vmem:[%s1806_s1 + $0x688] sm:$0xff] }
  0x7a   :  { %747 = vmatpush.msrb.mxu2 %v314_v46  ;;  %775 = vmatpush.msrb.mxu3 %v331_v47  ;;  %v26_v46 = vld [vmem:[%s1807_s0 + $0x60] sm:$0xff]  ;;  %v28_v47 = vld [vmem:[%s1807_s0 + $0x70] sm:$0xff] }
  0x7b   :  { %689 = vmatpush.msrb.mxu0 %v282_v48  ;;  %717 = vmatpush.msrb.mxu1 %v299_v49  ;;  %v318_v48 = vld [vmem:[%s1806_s1 + $0x780] sm:$0xff] }
  0x7c   :  { %589 = vmatmul.f32.gmra.mxu0 %v38_v50  ;;  %647 = vmatmul.f32.gmra.mxu2 %v40_v51  ;;  %v286_v49 = vld [vmem:[%s1806_s1 + $0x680] sm:$0xff]  ;;  %v27_v50 = vld [vmem:[%s1807_s0 + $0x68] sm:$0xff]  ;;  %v29_v51 = vld [vmem:[%s1807_s0 + $0x78] sm:$0xff] }
  0x7d   :  { %748 = vmatpush.msrb.mxu2 %v313_v52  ;;  %776 = vmatpush.msrb.mxu3 %v330_v53  ;;  %v810_v52 = vld [vmem:[%s1808_s2] ss:$0 sm:$0xff] }
  0x7e   :  { %690 = vmatpush.msrb.mxu0 %v281_v54  ;;  %718 = vmatpush.msrb.mxu1 %v298_v55  ;;  %v42_v53 = vld [vmem:[%s1807_s0 + $0xe0] sm:$0xff]  ;;  %v44_v54 = vld [vmem:[%s1807_s0 + $0xf0] sm:$0xff] }
  0x7f   :  { %618 = vmatmul.f32.gmra.mxu1 %v39_v56  ;;  %676 = vmatmul.f32.gmra.mxu3 %v41_v57  ;;  %v43_v57 = vld [vmem:[%s1807_s0 + $0xe8] sm:$0xff] }
  0x80   :  { %749 = vmatpush.msrb.mxu2 %v312_v58  ;;  %777 = vmatpush.msrb.mxu3 %v329_v59  ;;  %v45_v58 = vld [vmem:[%s1807_s0 + $0xf8] sm:$0xff] }
  0x81   :  { %691 = vmatpush.msrb.mxu0 %v280_v60  ;;  %719 = vmatpush.msrb.mxu1 %v297_v61 }
  0x82   :  { %750 = vmatpush.msrb.mxu2 %v311_v62  ;;  %778 = vmatpush.msrb.mxu3 %v328_v63  ;;  %v58_v63 = vld [vmem:[%s1807_s0 + $0x160] sm:$0xff] }
  0x83   :  { %692 = vmatpush.msrb.mxu0 %v279_v0  ;;  %720 = vmatpush.msrb.mxu1 %v296_v1  ;;  %v60_v0 = vld [vmem:[%s1807_s0 + $0x170] sm:$0xff] }
  0x84   :  { %751 = vmatpush.msrb.mxu2 %v310_v2  ;;  %779 = vmatpush.msrb.mxu3 %v327_v3  ;;  %v59_v2 = vld [vmem:[%s1807_s0 + $0x168] sm:$0xff]  ;;  %v61_v3 = vld [vmem:[%s1807_s0 + $0x178] sm:$0xff] }
  0x85   :  { %693 = vmatpush.msrb.mxu0 %v278_v4  ;;  %721 = vmatpush.msrb.mxu1 %v295_v5 }
  0x86   :  { %592 = vmatmul.f32.gmra.mxu0 %v54_v6  ;;  %650 = vmatmul.f32.gmra.mxu2 %v56_v7 }
  0x87   :  { %752 = vmatpush.msrb.mxu2 %v309_v8  ;;  %780 = vmatpush.msrb.mxu3 %v326_v9  ;;  %v74_v9 = vld [vmem:[%s1807_s0 + $0x1e0] sm:$0xff] }
  0x88   :  { %694 = vmatpush.msrb.mxu0 %v277_v10  ;;  %722 = vmatpush.msrb.mxu1 %v294_v11  ;;  %v76_v10 = vld [vmem:[%s1807_s0 + $0x1f0] sm:$0xff] }
  0x89   :  { %621 = vmatmul.f32.gmra.mxu1 %v55_v12  ;;  %679 = vmatmul.f32.gmra.mxu3 %v57_v13  ;;  %v75_v13 = vld [vmem:[%s1807_s0 + $0x1e8] sm:$0xff] }
  0x8a   :  { %753 = vmatpush.msrb.mxu2 %v308_v14  ;;  %781 = vmatpush.msrb.mxu3 %v325_v15  ;;  %v77_v14 = vld [vmem:[%s1807_s0 + $0x1f8] sm:$0xff] }
  0x8b   :  { %695 = vmatpush.msrb.mxu0 %v276_v16  ;;  %723 = vmatpush.msrb.mxu1 %v293_v17 }
  0x8c   :  { %754 = vmatpush.msrb.mxu2 %v307_v18  ;;  %782 = vmatpush.msrb.mxu3 %v324_v19 }
  0x8d   :  { %696 = vmatpush.msrb.mxu0 %v275_v20  ;;  %724 = vmatpush.msrb.mxu1 %v292_v21 }
  0x8e   :  { %755 = vmatpush.msrb.mxu2 %v306_v22  ;;  %783 = vmatpush.msrb.mxu3 %v323_v23 }
  0x8f   :  { %697 = vmatpush.msrb.mxu0 %v274_v24  ;;  %725 = vmatpush.msrb.mxu1 %v291_v25 }
  0x90   :  { %595 = vmatmul.f32.gmra.mxu0 %v70_v26  ;;  %653 = vmatmul.f32.gmra.mxu2 %v72_v27 }
  0x91   :  { %756 = vmatpush.msrb.mxu2 %v305_v28  ;;  %784 = vmatpush.msrb.mxu3 %v322_v29 }
  0x92   :  { %698 = vmatpush.msrb.mxu0 %v273_v30  ;;  %726 = vmatpush.msrb.mxu1 %v290_v31 }
  0x93   :  { %624 = vmatmul.f32.gmra.mxu1 %v71_v32  ;;  %682 = vmatmul.f32.gmra.mxu3 %v73_v33 }
  0x94   :  { %757 = vmatpush.msrb.mxu2 %v304_v34  ;;  %785 = vmatpush.msrb.mxu3 %v321_v35 }
  0x95   :  { %699 = vmatpush.msrb.mxu0 %v272_v36  ;;  %727 = vmatpush.msrb.mxu1 %v289_v37 }
  0x96   :  { %758 = vmatpush.msrb.mxu2 %v303_v38  ;;  %786 = vmatpush.msrb.mxu3 %v320_v39 }
  0x97   :  { %700 = vmatpush.msrb.mxu0 %v271_v40  ;;  %728 = vmatpush.msrb.mxu1 %v288_v41 }
  0x98   :  { %759 = vmatpush.msrb.mxu2 %v302_v42  ;;  %787 = vmatpush.msrb.mxu3 %v319_v43 }
  0x99   :  { %701 = vmatpush.msrb.mxu0 %v270_v44  ;;  %729 = vmatpush.msrb.mxu1 %v287_v45 }
  0x9a   :  { %702 = vmatmul.f32.vlgmr.msrb.gmra.mxu0 %v26_v46  ;;  %760 = vmatmul.f32.vlgmr.msrb.gmra.mxu2 %v28_v47 }
  0x9b   :  { %788 = vmatpush.msrb.mxu3 %v318_v48  ;;  %730 = vmatpush.msrb.mxu1 %v286_v49 }
  0x9c   :  { %731 = vmatmul.f32.vlgmr.msrb.gmra.mxu1 %v27_v50  ;;  %789 = vmatmul.f32.vlgmr.msrb.gmra.mxu3 %v29_v51 }
  0x9f   :  { %v355_v55 = vpop.f32.mrf.mxu0 }
  0xa0   :  { %v356_v56 = vadd.f32 %v810_v52, %v355_v55 }
  0xa2   :  { %705 = vmatmul.f32.gmra.mxu0 %v42_v53  ;;  %763 = vmatmul.f32.gmra.mxu2 %v44_v54  ;;  %v384_v59 = vpop.f32.mrf.mxu1 }
  0xa3   :  { %v385_v60 = vadd.f32 %v384_v59, %v356_v56 }
  0xa4   :  { %734 = vmatmul.f32.gmra.mxu1 %v43_v57  ;;  %792 = vmatmul.f32.gmra.mxu3 %v45_v58 }
  0xa5   :  { %v413_v61 = vpop.f32.mrf.mxu2 }
  0xa6   :  { %v414_v62 = vadd.f32 %v413_v61, %v385_v60 }
  0xa8   :  { %v442_v1 = vpop.f32.mrf.mxu3 }
  0xa9   :  { %v358_v4 = vpop.f32.mrf.mxu0  ;;  %v443_v5 = vadd.f32 %v442_v1, %v414_v62 }
  0xaa   :  { %708 = vmatmul.f32.gmra.mxu0 %v58_v63  ;;  %766 = vmatmul.f32.gmra.mxu2 %v60_v0  ;;  %v359_v6 = vadd.f32 %v810_v52, %v358_v4 }
  0xac   :  { %737 = vmatmul.f32.gmra.mxu1 %v59_v2  ;;  %795 = vmatmul.f32.gmra.mxu3 %v61_v3  ;;  %v387_v7 = vpop.f32.mrf.mxu1 }
  0xad   :  { %v388_v8 = vadd.f32 %v387_v7, %v359_v6 }
  0xaf   :  { %v416_v11 = vpop.f32.mrf.mxu2 }
  0xb0   :  { %v417_v12 = vadd.f32 %v416_v11, %v388_v8 }
  0xb2   :  { %711 = vmatmul.f32.gmra.mxu0 %v74_v9  ;;  %769 = vmatmul.f32.gmra.mxu2 %v76_v10  ;;  %v445_v15 = vpop.f32.mrf.mxu3 }
  0xb3   :  { %v361_v16 = vpop.f32.mrf.mxu0  ;;  %v446_v17 = vadd.f32 %v445_v15, %v417_v12 }
  0xb4   :  { %740 = vmatmul.f32.gmra.mxu1 %v75_v13  ;;  %798 = vmatmul.f32.gmra.mxu3 %v77_v14  ;;  %v362_v18 = vadd.f32 %v810_v52, %v361_v16 }
  0xb6   :  { %v390_v19 = vpop.f32.mrf.mxu1 }
  0xb7   :  { %v391_v20 = vadd.f32 %v390_v19, %v362_v18 }
  0xb9   :  { %v419_v21 = vpop.f32.mrf.mxu2 }
  0xba   :  { %v420_v22 = vadd.f32 %v419_v21, %v391_v20 }
  0xbc   :  { %v448_v23 = vpop.f32.mrf.mxu3 }
  0xbd   :  { %v364_v24 = vpop.f32.mrf.mxu0  ;;  %v449_v25 = vadd.f32 %v448_v23, %v420_v22 }
  0xbe   :  { %v365_v26 = vadd.f32 %v810_v52, %v364_v24 }
  0xc0   :  { %v393_v27 = vpop.f32.mrf.mxu1 }
  0xc1   :  { %v394_v28 = vadd.f32 %v393_v27, %v365_v26 }
  0xc3   :  { %v422_v29 = vpop.f32.mrf.mxu2 }
  0xc4   :  { %v423_v30 = vadd.f32 %v422_v29, %v394_v28 }
  0xc6   :  { %v451_v31 = vpop.f32.mrf.mxu3 }
  0xc7   :  { %v452_v32 = vadd.f32 %v451_v31, %v423_v30  ;;  %v471_v33 = vpop.f32.mrf.mxu0 }
  0xc8   :  { %v472_v56 = vadd.f32 %v471_v33, %v443_v5 }
  0xca   :  { %v500_v34 = vpop.f32.mrf.mxu1 }
  0xcb   :  { %v501_v59 = vadd.f32 %v500_v34, %v472_v56 }
  0xcd   :  { %v529_v35 = vpop.f32.mrf.mxu2 }
  0xce   :  { %v530_v60 = vadd.f32 %v529_v35, %v501_v59 }
  0xd0   :  { %v558_v36 = vpop.f32.mrf.mxu3 }
  0xd1   :  { %v474_v37 = vpop.f32.mrf.mxu0  ;;  %v559_v0 = vadd.f32 %v558_v36, %v530_v60 }
  0xd2   :  { %v475_v62 = vadd.f32 %v474_v37, %v446_v17 }
  0xd4   :  { %v503_v38 = vpop.f32.mrf.mxu1 }
  0xd5   :  { %v504_v1 = vadd.f32 %v503_v38, %v475_v62 }
  0xd7   :  { %v532_v39 = vpop.f32.mrf.mxu2 }
  0xd8   :  { %v533_v6 = vadd.f32 %v532_v39, %v504_v1 }
  0xda   :  { %v561_v40 = vpop.f32.mrf.mxu3 }
  0xdb   :  { %v477_v41 = vpop.f32.mrf.mxu0  ;;  %v562_v10 = vadd.f32 %v561_v40, %v533_v6 }
  0xdc   :  { %v478_v7 = vadd.f32 %v477_v41, %v449_v25 }
  0xde   :  { %v506_v42 = vpop.f32.mrf.mxu1 }
  0xdf   :  { %v507_v5 = vadd.f32 %v506_v42, %v478_v7 }
  0xe1   :  { %v535_v43 = vpop.f32.mrf.mxu2 }
  0xe2   :  { %v536_v14 = vadd.f32 %v535_v43, %v507_v5 }
  0xe4   :  { %v564_v44 = vpop.f32.mrf.mxu3 }
  0xe5   :  { %v480_v45 = vpop.f32.mrf.mxu0  ;;  %v565_v22 = vadd.f32 %v564_v44, %v536_v14 }
  0xe6   :  { %v481_v17 = vadd.f32 %v480_v45, %v452_v32 }
  0xe8   :  { %v509_v46 = vpop.f32.mrf.mxu1 }
  0xe9   :  { %v510_v24 = vadd.f32 %v509_v46, %v481_v17 }
  0xeb   :  { %v538_v47 = vpop.f32.mrf.mxu2 }
  0xec   :  { %v539_v28 = vadd.f32 %v538_v47, %v510_v24 }
  0xee   :  { %v567_v48 = vpop.f32.mrf.mxu3 }
  0xef   :  { %v587_v49 = vpop.f32.mrf.mxu0  ;;  %v568_v38 = vadd.f32 %v567_v48, %v539_v28 }
  0xf0   :  { %v588_v2 = vadd.f32 %v587_v49, %v559_v0 }
  0xf2   :  { %v616_v50 = vpop.f32.mrf.mxu1 }
  0xf3   :  { %v617_v8 = vadd.f32 %v616_v50, %v588_v2 }
  0xf5   :  { %v645_v51 = vpop.f32.mrf.mxu2 }
  0xf6   :  { %v646_v11 = vadd.f32 %v645_v51, %v617_v8 }
  0xf8   :  { %v674_v52 = vpop.f32.mrf.mxu3 }
  0xf9   :  { %v590_v53 = vpop.f32.mrf.mxu0  ;;  %v675_v15 = vadd.f32 %v674_v52, %v646_v11 }
  0xfa   :  { %v591_v13 = vadd.f32 %v590_v53, %v562_v10 }
  0xfc   :  { %v619_v54 = vpop.f32.mrf.mxu1 }
  0xfd   :  { %v620_v19 = vadd.f32 %v619_v54, %v591_v13 }
  0xff   :  { %v648_v55 = vpop.f32.mrf.mxu2 }
 0x100   :  { %v649_v23 = vadd.f32 %v648_v55, %v620_v19 }
 0x102   :  { %v677_v57 = vpop.f32.mrf.mxu3 }
 0x103   :  { %v593_v58 = vpop.f32.mrf.mxu0  ;;  %v678_v29 = vadd.f32 %v677_v57, %v649_v23 }
 0x104   :  { %v594_v26 = vadd.f32 %v593_v58, %v565_v22 }
 0x106   :  { %v622_v61 = vpop.f32.mrf.mxu1 }
 0x107   :  { %v623_v34 = vadd.f32 %v622_v61, %v594_v26 }
 0x109   :  { %v651_v63 = vpop.f32.mrf.mxu2 }
 0x10a   :  { %v652_v32 = vadd.f32 %v651_v63, %v623_v34 }
 0x10c   :  { %v680_v3 = vpop.f32.mrf.mxu3 }
 0x10d   :  { %v596_v4 = vpop.f32.mrf.mxu0  ;;  %v681_v42 = vadd.f32 %v680_v3, %v652_v32 }
 0x10e   :  { %v597_v39 = vadd.f32 %v596_v4, %v568_v38 }
 0x110   :  { %v625_v9 = vpop.f32.mrf.mxu1 }
 0x111   :  { %v626_v46 = vadd.f32 %v625_v9, %v597_v39 }
 0x113   :  { %v654_v12 = vpop.f32.mrf.mxu2 }
 0x114   :  { %v655_v51 = vadd.f32 %v654_v12, %v626_v46 }
 0x116   :  { %v683_v16 = vpop.f32.mrf.mxu3 }
 0x117   :  { %v703_v18 = vpop.f32.mrf.mxu0  ;;  %v684_v53 = vadd.f32 %v683_v16, %v655_v51 }
 0x118   :  { %v704_v20 = vadd.f32 %v703_v18, %v675_v15 }
 0x119   :  { %v732_v21 = vpop.f32.mrf.mxu1 }
 0x11a   :  { %v733_v25 = vadd.f32 %v732_v21, %v704_v20 }
 0x11d   :  { %v761_v27 = vpop.f32.mrf.mxu2 }
 0x11e   :  { %v762_v30 = vadd.f32 %v761_v27, %v733_v25 }
 0x11f   :  { %v706_v31 = vpop.f32.mrf.mxu0  ;;  %v790_v33 = vpop.f32.mrf.mxu3 }
 0x120   :  { %v707_v35 = vadd.f32 %v706_v31, %v678_v29  ;;  %v791_v36 = vadd.f32 %v790_v33, %v762_v30 }
 0x121   :  { %v735_v37 = vpop.f32.mrf.mxu1 }
 0x122   :  { %802 = vst [vmem:[%s1809_s3] sm:$0xff] %v791_v36  ;;  %v736_v40 = vadd.f32 %v735_v37, %v707_v35 }
 0x125   :  { %v764_v41 = vpop.f32.mrf.mxu2 }
 0x126   :  { %v765_v43 = vadd.f32 %v764_v41, %v736_v40 }
 0x127   :  { %v709_v44 = vpop.f32.mrf.mxu0  ;;  %v793_v45 = vpop.f32.mrf.mxu3 }
 0x128   :  { %v710_v47 = vadd.f32 %v709_v44, %v681_v42  ;;  %v794_v49 = vadd.f32 %v793_v45, %v765_v43 }
 0x129   :  { %v738_v50 = vpop.f32.mrf.mxu1 }
 0x12a   :  { %803 = vst [vmem:[%s1809_s3 + $0x8] sm:$0xff] %v794_v49  ;;  %v739_v48 = vadd.f32 %v738_v50, %v710_v47 }
 0x12d   :  { %v767_v52 = vpop.f32.mrf.mxu2 }
 0x12e   :  { %v768_v54 = vadd.f32 %v767_v52, %v739_v48 }
 0x12f   :  { %v712_v55 = vpop.f32.mrf.mxu0  ;;  %v796_v56 = vpop.f32.mrf.mxu3 }
 0x130   :  { %v713_v57 = vadd.f32 %v712_v55, %v684_v53  ;;  %v797_v58 = vadd.f32 %v796_v56, %v768_v54 }
 0x131   :  { %v741_v59 = vpop.f32.mrf.mxu1 }
 0x132   :  { %804 = vst [vmem:[%s1809_s3 + $0x10] sm:$0xff] %v797_v58  ;;  %v742_v60 = vadd.f32 %v741_v59, %v713_v57 }
 0x135   :  { %v770_v61 = vpop.f32.mrf.mxu2 }
 0x136   :  { %v771_v62 = vadd.f32 %v770_v61, %v742_v60 }
 0x137   :  { %v799_v63 = vpop.f32.mrf.mxu3 }
 0x138   :  { %v800_v0 = vadd.f32 %v799_v63, %v771_v62 }
 0x13a   :  { %805 = vst [vmem:[%s1809_s3 + $0x18] sm:$0xff] %v800_v0 }

// kernel: discriminator_forward.11
= control target key start
LH: loop header
LB: loop body
LE: loop exit
PB: predicated region body
PF: predicated region fallthrough
CT: control target
= control target key end

     0   :  { %s334_s14 = smov 0   ;;  %s364_s0 = inlined_call_operand.vmem [shape: f32[2,4,128], index: 0, kind: input, shape index: {}]   ;;  %s365_s1 = inlined_call_operand.vmem [shape: f32[1,128], index: 1, kind: input, shape index: {}]   ;;  %s366_s2 = inlined_call_operand.<no memory space> [shape: f32[1,1], index: 2, kind: input, shape index: {}]   ;;  %s367_s3 = inlined_call_operand.vmem [shape: f32[2,4,1], index: 3, kind: output, shape index: {}]  }
   0x1   :  { %v8_v0 = vstv %s366_s2 }
   0x2   :  { %9 = vst [vmem:[#allocation2] sm:$0x1] %v8_v0 }
   0x3 LB: > { %s278_s15 = sadd.s32 4294967295, %s308_s14   ;;  %p282_p0 = scmp.ge.s32.totalorder %s308_s14, 1  ;;  %s308_s14 = sphi %s334_s14, %s15_s14  }
   0x4   : > { %p138_p1 = scmp.lt.s32.totalorder %s308_s14, 3 }
   0x6   : > { %p139_p2 = pnand %p282_p0, %p138_p1 }
   0x7   : > { %p160_p3 = scmp.lt.s32.totalorder (!%p139_p2), %s278_s15, 1 }
   0x8   : > { %142 = sbr.rel (%p139_p2) target bundleno = 198 (0xc6), region = 32 }
   0xd   : > { %v310_v1 = vmov 4.0   ;;  %s369_s15 = smov (!%p160_p3, %s278_s15), 1  ;;  %vm169_vm0 = vcmask 1043456   ;;  %v296_v36 = vld [vmem:[%s365_s1] ss:$0 sm:$0xff]  ;;  %vm223_vm6 = vcmask 3072  }
   0xe   : > { %298 = vrcp.f32 %v310_v1  ;;  %s283_s2 = sshll.u32 %s369_s15, 2  ;;  %v297_v41 = vld [vmem:[#allocation2] ss:$0 sm:$0xff] }
   0xf   : > { %s163_s18 = scalar_lea.vmem %s364_s0, %s283_s2  ;;  %s167_s23 = scalar_lea.vmem %s367_s3, %s283_s2 }
  0x10   : > { %v168_v2 = vld [vmem:[%s163_s18] sm:$0xf] }
  0x11   : > { %v170_v4 = vsel %vm169_vm0, %v168_v2, 0.0 }
  0x12   : > { %v171_v5 = vrot.slane %v170_v4, 4 }
  0x14   : > { %v299_v3 = vpop.eup %298  ;;  %v172_v7 = vadd.f32 %v171_v5, %v170_v4 }
  0x15   : > { %v178_v6 = vmul.f32 4.0, %v299_v3  ;;  %vm182_vm1 = vweird.f32 %v299_v3 }
  0x16   : > { %v173_v9 = vrot.slane %v172_v7, 2 }
  0x17   : > { %v179_v8 = vsub.f32 1.0, %v178_v6 }
  0x18   : > { %v174_v11 = vadd.f32 %v173_v9, %v172_v7 }
  0x19   : > { %v180_v10 = vmul.f32 %v299_v3, %v179_v8 }
  0x1a   : > { %v175_v13 = vrot.slane %v174_v11, 1 }
  0x1b   : > { %v181_v12 = vadd.f32 %v299_v3, %v180_v10 }
  0x1c   : > { %v176_v15 = vadd.f32 %v175_v13, %v174_v11 }
  0x1d   : > { %v183_v14 = vsel %vm182_vm1, %v299_v3, %v181_v12 }
  0x1e   : > { %v184_v16 = vmul.f32 %v183_v14, %v176_v15 }
  0x20   : > { %v185_v17 = vsub.f32 %v168_v2, %v184_v16 }
  0x22   : > { %v186_v18 = vmul.f32 %v185_v17, %v185_v17 }
  0x24   : > { %v187_v19 = vsel %vm169_vm0, %v186_v18, 0.0 }
  0x25   : > { %v188_v20 = vrot.slane %v187_v19, 4 }
  0x27   : > { %v189_v21 = vadd.f32 %v188_v20, %v187_v19 }
  0x29   : > { %v190_v22 = vrot.slane %v189_v21, 2 }
  0x2b   : > { %v191_v23 = vadd.f32 %v190_v22, %v189_v21 }
  0x2d   : > { %v192_v24 = vrot.slane %v191_v23, 1 }
  0x2f   : > { %v193_v25 = vadd.f32 %v192_v24, %v191_v23 }
  0x31   : > { %v194_v26 = vmul.f32 %v193_v25, %v183_v14 }
  0x33   : > { %v195_v27 = vadd.f32 1e-05, %v194_v26 }
  0x35   : > { %300 = vrsqrt.f32 %v195_v27  ;;  %vm202_vm2 = vweird.f32 %v195_v27 }
  0x3b   : > { %v301_v28 = vpop.eup %300 }
  0x3c   : > { %v197_v29 = vmul.f32 %v301_v28, %v195_v27  ;;  %vm203_vm3 = vweird.f32 %v301_v28 }
  0x3d   : > { %vm204_vm4 = vmor %vm202_vm2, %vm203_vm3 }
  0x3e   : > { %v198_v30 = vmul.f32 %v301_v28, %v197_v29 }
  0x40   : > { %v199_v31 = vmul.f32 0.5, %v198_v30 }
  0x42   : > { %v200_v32 = vsub.f32 1.5, %v199_v31 }
  0x44   : > { %v201_v33 = vmul.f32 %v301_v28, %v200_v32 }
  0x46   : > { %v205_v34 = vsel %vm204_vm4, %v301_v28, %v201_v33 }
  0x47   : > { %v206_v35 = vmul.f32 %v205_v34, %v185_v17 }
  0x49   : > { %vm207_vm5 = vcmp.gt.f32.partialorder %v206_v35, 0.0  ;;  %v208_v37 = vmul.f32 0.2, %v206_v35 }
  0x4b   : > { %v209_v38 = vsel %vm207_vm5, %v206_v35, %v208_v37 }
  0x4c   : > { %v214_v39 = vmul.f32 %v296_v36, %v209_v38 }
  0x4e   : > { %v215_v40 = vsel %vm169_vm0, %v214_v39, 0.0 }
  0x4f   : > { %216 = vadd.xlane.f32.xlu0 %v215_v40 }
  0xc2   : > { %v217_v42 = vpop.xlane.xlu0 %216 }
  0xc3   : > { %v222_v43 = vadd.f32 %v297_v41, %v217_v42 }
  0xc5   : > { %224 = vst.msk [vmem:[%s167_s23] sm:$0xf] %vm223_vm6, %v222_v43 }
  0xc6 PF: > { %s15_s14 = sadd.s32 1, %s308_s14  }
  0xc7   : > { %p12_p4 = scmp.ge.s32.totalorder %s15_s14, 4  }
  0xc9   :  { %14 = sbr.rel (!%p12_p4) target bundleno = 3 (0x3), region = 62 }

// kernel: discriminator_forward.10
= control target key start
LH: loop header
LB: loop body
LE: loop exit
PB: predicated region body
PF: predicated region fallthrough
CT: control target
= control target key end

     0   :  { %s1458_s1 = inlined_call_operand.vmem [shape: f32[2048,128], index: 1, kind: input, shape index: {}]   ;;  %s1459_s0 = inlined_call_operand.vmem [shape: f32[8,2048], index: 0, kind: input, shape index: {}]   ;;  %s1460_s2 = inlined_call_operand.vmem [shape: f32[1,128], index: 2, kind: input, shape index: {}]   ;;  %s1461_s3 = inlined_call_operand.vmem [shape: f32[8,128], index: 3, kind: output, shape index: {}]  }
   0x1   :  { %v45_v0 = vld [vmem:[%s1458_s1 + $0x78] sm:$0xff]  ;;  %v44_v2 = vld [vmem:[%s1458_s1 + $0x70] sm:$0xff]  ;;  %v43_v6 = vld [vmem:[%s1458_s1 + $0x68] sm:$0xff] }
   0x2   :  { %v77_v1 = vld [vmem:[%s1458_s1 + $0x178] sm:$0xff]  ;;  %290 = vmatpush.msra.mxu0 %v45_v0  ;;  %v76_v4 = vld [vmem:[%s1458_s1 + $0x170] sm:$0xff]  ;;  %v75_v8 = vld [vmem:[%s1458_s1 + $0x168] sm:$0xff] }
   0x3   :  { %330 = vmatpush.msra.mxu2 %v77_v1  ;;  %v61_v3 = vld [vmem:[%s1458_s1 + $0xf8] sm:$0xff]  ;;  %v60_v7 = vld [vmem:[%s1458_s1 + $0xf0] sm:$0xff]  ;;  %v59_v10 = vld [vmem:[%s1458_s1 + $0xe8] sm:$0xff] }
   0x4   :  { %v93_v5 = vld [vmem:[%s1458_s1 + $0x1f8] sm:$0xff]  ;;  %310 = vmatpush.msra.mxu1 %v61_v3  ;;  %291 = vmatpush.msra.mxu0 %v44_v2  ;;  %v92_v9 = vld [vmem:[%s1458_s1 + $0x1f0] sm:$0xff]  ;;  %v42_v11 = vld [vmem:[%s1458_s1 + $0x60] sm:$0xff] }
   0x5   :  { %350 = vmatpush.msra.mxu3 %v93_v5  ;;  %331 = vmatpush.msra.mxu2 %v76_v4  ;;  %v74_v12 = vld [vmem:[%s1458_s1 + $0x160] sm:$0xff]  ;;  %v91_v13 = vld [vmem:[%s1458_s1 + $0x1e8] sm:$0xff]  ;;  %v41_v16 = vld [vmem:[%s1458_s1 + $0x58] sm:$0xff] }
   0x6   :  { %311 = vmatpush.msra.mxu1 %v60_v7  ;;  %292 = vmatpush.msra.mxu0 %v43_v6  ;;  %v58_v14 = vld [vmem:[%s1458_s1 + $0xe0] sm:$0xff]  ;;  %v73_v17 = vld [vmem:[%s1458_s1 + $0x158] sm:$0xff]  ;;  %v40_v20 = vld [vmem:[%s1458_s1 + $0x50] sm:$0xff] }
   0x7   :  { %351 = vmatpush.msra.mxu3 %v92_v9  ;;  %332 = vmatpush.msra.mxu2 %v75_v8  ;;  %v90_v15 = vld [vmem:[%s1458_s1 + $0x1e0] sm:$0xff]  ;;  %v57_v18 = vld [vmem:[%s1458_s1 + $0xd8] sm:$0xff]  ;;  %v72_v21 = vld [vmem:[%s1458_s1 + $0x150] sm:$0xff] }
   0x8   :  { %312 = vmatpush.msra.mxu1 %v59_v10  ;;  %293 = vmatpush.msra.mxu0 %v42_v11  ;;  %v89_v19 = vld [vmem:[%s1458_s1 + $0x1d8] sm:$0xff]  ;;  %v56_v22 = vld [vmem:[%s1458_s1 + $0xd0] sm:$0xff]  ;;  %v39_v24 = vld [vmem:[%s1458_s1 + $0x48] sm:$0xff] }
   0x9   :  { %352 = vmatpush.msra.mxu3 %v91_v13  ;;  %333 = vmatpush.msra.mxu2 %v74_v12  ;;  %v88_v23 = vld [vmem:[%s1458_s1 + $0x1d0] sm:$0xff]  ;;  %v71_v25 = vld [vmem:[%s1458_s1 + $0x148] sm:$0xff]  ;;  %v38_v28 = vld [vmem:[%s1458_s1 + $0x40] sm:$0xff] }
   0xa   :  { %313 = vmatpush.msra.mxu1 %v58_v14  ;;  %294 = vmatpush.msra.mxu0 %v41_v16  ;;  %v55_v26 = vld [vmem:[%s1458_s1 + $0xc8] sm:$0xff]  ;;  %v70_v29 = vld [vmem:[%s1458_s1 + $0x140] sm:$0xff]  ;;  %v37_v32 = vld [vmem:[%s1458_s1 + $0x38] sm:$0xff] }
   0xb   :  { %353 = vmatpush.msra.mxu3 %v90_v15  ;;  %334 = vmatpush.msra.mxu2 %v73_v17  ;;  %v87_v27 = vld [vmem:[%s1458_s1 + $0x1c8] sm:$0xff]  ;;  %v54_v30 = vld [vmem:[%s1458_s1 + $0xc0] sm:$0xff]  ;;  %v69_v33 = vld [vmem:[%s1458_s1 + $0x138] sm:$0xff] }
   0xc   :  { %314 = vmatpush.msra.mxu1 %v57_v18  ;;  %295 = vmatpush.msra.mxu0 %v40_v20  ;;  %v86_v31 = vld [vmem:[%s1458_s1 + $0x1c0] sm:$0xff]  ;;  %v53_v34 = vld [vmem:[%s1458_s1 + $0xb8] sm:$0xff]  ;;  %v36_v36 = vld [vmem:[%s1458_s1 + $0x30] sm:$0xff] }
   0xd   :  { %354 = vmatpush.msra.mxu3 %v89_v19  ;;  %335 = vmatpush.msra.mxu2 %v72_v21  ;;  %v85_v35 = vld [vmem:[%s1458_s1 + $0x1b8] sm:$0xff]  ;;  %v68_v37 = vld [vmem:[%s1458_s1 + $0x130] sm:$0xff]  ;;  %v35_v40 = vld [vmem:[%s1458_s1 + $0x28] sm:$0xff] }
   0xe   :  { %315 = vmatpush.msra.mxu1 %v56_v22  ;;  %296 = vmatpush.msra.mxu0 %v39_v24  ;;  %v52_v38 = vld [vmem:[%s1458_s1 + $0xb0] sm:$0xff]  ;;  %v67_v41 = vld [vmem:[%s1458_s1 + $0x128] sm:$0xff]  ;;  %v34_v44 = vld [vmem:[%s1458_s1 + $0x20] sm:$0xff] }
   0xf   :  { %355 = vmatpush.msra.mxu3 %v88_v23  ;;  %336 = vmatpush.msra.mxu2 %v71_v25  ;;  %v84_v39 = vld [vmem:[%s1458_s1 + $0x1b0] sm:$0xff]  ;;  %v51_v42 = vld [vmem:[%s1458_s1 + $0xa8] sm:$0xff]  ;;  %v66_v45 = vld [vmem:[%s1458_s1 + $0x120] sm:$0xff] }
  0x10   :  { %316 = vmatpush.msra.mxu1 %v55_v26  ;;  %297 = vmatpush.msra.mxu0 %v38_v28  ;;  %v83_v43 = vld [vmem:[%s1458_s1 + $0x1a8] sm:$0xff]  ;;  %v50_v46 = vld [vmem:[%s1458_s1 + $0xa0] sm:$0xff]  ;;  %v33_v48 = vld [vmem:[%s1458_s1 + $0x18] sm:$0xff] }
  0x11   :  { %356 = vmatpush.msra.mxu3 %v87_v27  ;;  %337 = vmatpush.msra.mxu2 %v70_v29  ;;  %v82_v47 = vld [vmem:[%s1458_s1 + $0x1a0] sm:$0xff]  ;;  %v65_v49 = vld [vmem:[%s1458_s1 + $0x118] sm:$0xff]  ;;  %v32_v52 = vld [vmem:[%s1458_s1 + $0x10] sm:$0xff] }
  0x12   :  { %317 = vmatpush.msra.mxu1 %v54_v30  ;;  %298 = vmatpush.msra.mxu0 %v37_v32  ;;  %v49_v50 = vld [vmem:[%s1458_s1 + $0x98] sm:$0xff]  ;;  %v64_v53 = vld [vmem:[%s1458_s1 + $0x110] sm:$0xff]  ;;  %v31_v56 = vld [vmem:[%s1458_s1 + $0x8] sm:$0xff] }
  0x13   :  { %357 = vmatpush.msra.mxu3 %v86_v31  ;;  %338 = vmatpush.msra.mxu2 %v69_v33  ;;  %v81_v51 = vld [vmem:[%s1458_s1 + $0x198] sm:$0xff]  ;;  %v48_v54 = vld [vmem:[%s1458_s1 + $0x90] sm:$0xff]  ;;  %v63_v57 = vld [vmem:[%s1458_s1 + $0x108] sm:$0xff] }
  0x14   :  { %318 = vmatpush.msra.mxu1 %v53_v34  ;;  %299 = vmatpush.msra.mxu0 %v36_v36  ;;  %v80_v55 = vld [vmem:[%s1458_s1 + $0x190] sm:$0xff]  ;;  %v47_v58 = vld [vmem:[%s1458_s1 + $0x88] sm:$0xff]  ;;  %v30_v60 = vld [vmem:[%s1458_s1] sm:$0xff] }
  0x15   :  { %358 = vmatpush.msra.mxu3 %v85_v35  ;;  %339 = vmatpush.msra.mxu2 %v68_v37  ;;  %v79_v59 = vld [vmem:[%s1458_s1 + $0x188] sm:$0xff]  ;;  %v62_v61 = vld [vmem:[%s1458_s1 + $0x100] sm:$0xff]  ;;  %v109_v62 = vld [vmem:[%s1458_s1 + $0x278] sm:$0xff] }
  0x16   :  { %319 = vmatpush.msra.mxu1 %v52_v38  ;;  %300 = vmatpush.msra.mxu0 %v35_v40  ;;  %v141_v63 = vld [vmem:[%s1458_s1 + $0x378] sm:$0xff]  ;;  %v46_v0 = vld [vmem:[%s1458_s1 + $0x80] sm:$0xff]  ;;  %v108_v2 = vld [vmem:[%s1458_s1 + $0x270] sm:$0xff] }
  0x17   :  { %359 = vmatpush.msra.mxu3 %v84_v39  ;;  %340 = vmatpush.msra.mxu2 %v67_v41  ;;  %v78_v1 = vld [vmem:[%s1458_s1 + $0x180] sm:$0xff]  ;;  %v125_v3 = vld [vmem:[%s1458_s1 + $0x2f8] sm:$0xff]  ;;  %v140_v4 = vld [vmem:[%s1458_s1 + $0x370] sm:$0xff] }
  0x18   :  { %320 = vmatpush.msra.mxu1 %v51_v42  ;;  %301 = vmatpush.msra.mxu0 %v34_v44  ;;  %v157_v5 = vld [vmem:[%s1458_s1 + $0x3f8] sm:$0xff]  ;;  %v107_v6 = vld [vmem:[%s1458_s1 + $0x268] sm:$0xff]  ;;  %v124_v7 = vld [vmem:[%s1458_s1 + $0x2f0] sm:$0xff] }
  0x19   :  { %360 = vmatpush.msra.mxu3 %v83_v43  ;;  %341 = vmatpush.msra.mxu2 %v66_v45  ;;  %v139_v8 = vld [vmem:[%s1458_s1 + $0x368] sm:$0xff]  ;;  %v156_v9 = vld [vmem:[%s1458_s1 + $0x3f0] sm:$0xff]  ;;  %v106_v10 = vld [vmem:[%s1458_s1 + $0x260] sm:$0xff] }
  0x1a   :  { %321 = vmatpush.msra.mxu1 %v50_v46  ;;  %302 = vmatpush.msra.mxu0 %v33_v48  ;;  %v123_v11 = vld [vmem:[%s1458_s1 + $0x2e8] sm:$0xff]  ;;  %v138_v12 = vld [vmem:[%s1458_s1 + $0x360] sm:$0xff]  ;;  %v105_v14 = vld [vmem:[%s1458_s1 + $0x258] sm:$0xff] }
  0x1b   :  { %361 = vmatpush.msra.mxu3 %v82_v47  ;;  %342 = vmatpush.msra.mxu2 %v65_v49  ;;  %v155_v13 = vld [vmem:[%s1458_s1 + $0x3e8] sm:$0xff]  ;;  %v122_v15 = vld [vmem:[%s1458_s1 + $0x2e0] sm:$0xff]  ;;  %v137_v16 = vld [vmem:[%s1458_s1 + $0x358] sm:$0xff] }
  0x1c   :  { %322 = vmatpush.msra.mxu1 %v49_v50  ;;  %303 = vmatpush.msra.mxu0 %v32_v52  ;;  %v154_v17 = vld [vmem:[%s1458_s1 + $0x3e0] sm:$0xff]  ;;  %v104_v18 = vld [vmem:[%s1458_s1 + $0x250] sm:$0xff]  ;;  %v121_v19 = vld [vmem:[%s1458_s1 + $0x2d8] sm:$0xff] }
  0x1d   :  { %362 = vmatpush.msra.mxu3 %v81_v51  ;;  %343 = vmatpush.msra.mxu2 %v64_v53  ;;  %v136_v20 = vld [vmem:[%s1458_s1 + $0x350] sm:$0xff]  ;;  %v153_v21 = vld [vmem:[%s1458_s1 + $0x3d8] sm:$0xff]  ;;  %v103_v22 = vld [vmem:[%s1458_s1 + $0x248] sm:$0xff] }
  0x1e   :  { %323 = vmatpush.msra.mxu1 %v48_v54  ;;  %304 = vmatpush.msra.mxu0 %v31_v56  ;;  %v120_v23 = vld [vmem:[%s1458_s1 + $0x2d0] sm:$0xff]  ;;  %v135_v24 = vld [vmem:[%s1458_s1 + $0x348] sm:$0xff]  ;;  %v102_v26 = vld [vmem:[%s1458_s1 + $0x240] sm:$0xff] }
  0x1f   :  { %363 = vmatpush.msra.mxu3 %v80_v55  ;;  %344 = vmatpush.msra.mxu2 %v63_v57  ;;  %v152_v25 = vld [vmem:[%s1458_s1 + $0x3d0] sm:$0xff]  ;;  %v119_v27 = vld [vmem:[%s1458_s1 + $0x2c8] sm:$0xff]  ;;  %v134_v28 = vld [vmem:[%s1458_s1 + $0x340] sm:$0xff] }
  0x20   :  { %324 = vmatpush.msra.mxu1 %v47_v58  ;;  %305 = vmatpush.msra.mxu0 %v30_v60  ;;  %v151_v29 = vld [vmem:[%s1458_s1 + $0x3c8] sm:$0xff]  ;;  %v101_v30 = vld [vmem:[%s1458_s1 + $0x238] sm:$0xff]  ;;  %v118_v31 = vld [vmem:[%s1458_s1 + $0x2c0] sm:$0xff] }
  0x21   :  { %364 = vmatpush.msra.mxu3 %v79_v59  ;;  %345 = vmatpush.msra.mxu2 %v62_v61  ;;  %v133_v32 = vld [vmem:[%s1458_s1 + $0x338] sm:$0xff]  ;;  %v150_v33 = vld [vmem:[%s1458_s1 + $0x3c0] sm:$0xff]  ;;  %v100_v34 = vld [vmem:[%s1458_s1 + $0x230] sm:$0xff] }
  0x22   :  { %370 = vmatpush.msrb.mxu0 %v109_v62  ;;  %325 = vmatpush.msra.mxu1 %v46_v0  ;;  %v117_v35 = vld [vmem:[%s1458_s1 + $0x2b8] sm:$0xff]  ;;  %v132_v36 = vld [vmem:[%s1458_s1 + $0x330] sm:$0xff]  ;;  %v99_v38 = vld [vmem:[%s1458_s1 + $0x228] sm:$0xff] }
  0x23   :  { %410 = vmatpush.msrb.mxu2 %v141_v63  ;;  %365 = vmatpush.msra.mxu3 %v78_v1  ;;  %v149_v37 = vld [vmem:[%s1458_s1 + $0x3b8] sm:$0xff]  ;;  %v116_v39 = vld [vmem:[%s1458_s1 + $0x2b0] sm:$0xff]  ;;  %v131_v40 = vld [vmem:[%s1458_s1 + $0x328] sm:$0xff] }
  0x24   :  { %371 = vmatpush.msrb.mxu0 %v108_v2  ;;  %390 = vmatpush.msrb.mxu1 %v125_v3  ;;  %v148_v41 = vld [vmem:[%s1458_s1 + $0x3b0] sm:$0xff]  ;;  %v98_v42 = vld [vmem:[%s1458_s1 + $0x220] sm:$0xff]  ;;  %v115_v43 = vld [vmem:[%s1458_s1 + $0x2a8] sm:$0xff] }
  0x25   :  { %411 = vmatpush.msrb.mxu2 %v140_v4  ;;  %430 = vmatpush.msrb.mxu3 %v157_v5  ;;  %v130_v44 = vld [vmem:[%s1458_s1 + $0x320] sm:$0xff]  ;;  %v147_v45 = vld [vmem:[%s1458_s1 + $0x3a8] sm:$0xff]  ;;  %v97_v46 = vld [vmem:[%s1458_s1 + $0x218] sm:$0xff] }
  0x26   :  { %372 = vmatpush.msrb.mxu0 %v107_v6  ;;  %391 = vmatpush.msrb.mxu1 %v124_v7  ;;  %v114_v47 = vld [vmem:[%s1458_s1 + $0x2a0] sm:$0xff]  ;;  %v129_v48 = vld [vmem:[%s1458_s1 + $0x318] sm:$0xff]  ;;  %v96_v50 = vld [vmem:[%s1458_s1 + $0x210] sm:$0xff] }
  0x27   :  { %412 = vmatpush.msrb.mxu2 %v139_v8  ;;  %431 = vmatpush.msrb.mxu3 %v156_v9  ;;  %v146_v49 = vld [vmem:[%s1458_s1 + $0x3a0] sm:$0xff]  ;;  %v113_v51 = vld [vmem:[%s1458_s1 + $0x298] sm:$0xff]  ;;  %v128_v52 = vld [vmem:[%s1458_s1 + $0x310] sm:$0xff] }
  0x28   :  { %373 = vmatpush.msrb.mxu0 %v106_v10  ;;  %392 = vmatpush.msrb.mxu1 %v123_v11  ;;  %v145_v53 = vld [vmem:[%s1458_s1 + $0x398] sm:$0xff]  ;;  %v95_v54 = vld [vmem:[%s1458_s1 + $0x208] sm:$0xff]  ;;  %v112_v55 = vld [vmem:[%s1458_s1 + $0x290] sm:$0xff] }
  0x29   :  { %413 = vmatpush.msrb.mxu2 %v138_v12  ;;  %432 = vmatpush.msrb.mxu3 %v155_v13  ;;  %v127_v56 = vld [vmem:[%s1458_s1 + $0x308] sm:$0xff]  ;;  %v144_v57 = vld [vmem:[%s1458_s1 + $0x390] sm:$0xff]  ;;  %v94_v58 = vld [vmem:[%s1458_s1 + $0x200] sm:$0xff] }
  0x2a   :  { %374 = vmatpush.msrb.mxu0 %v105_v14  ;;  %393 = vmatpush.msrb.mxu1 %v122_v15  ;;  %v111_v59 = vld [vmem:[%s1458_s1 + $0x288] sm:$0xff]  ;;  %v126_v60 = vld [vmem:[%s1458_s1 + $0x300] sm:$0xff]  ;;  %v16_v63 = vld [vmem:[%s1459_s0 + $0x10] sm:$0xff] }
  0x2b   :  { %414 = vmatpush.msrb.mxu2 %v137_v16  ;;  %433 = vmatpush.msrb.mxu3 %v154_v17  ;;  %v143_v61 = vld [vmem:[%s1458_s1 + $0x388] sm:$0xff]  ;;  %v14_v62 = vld [vmem:[%s1459_s0] sm:$0xff]  ;;  %v173_v0 = vld [vmem:[%s1458_s1 + $0x478] sm:$0xff] }
  0x2c   :  { %375 = vmatpush.msrb.mxu0 %v104_v18  ;;  %394 = vmatpush.msrb.mxu1 %v121_v19  ;;  %v205_v1 = vld [vmem:[%s1458_s1 + $0x578] sm:$0xff]  ;;  %v110_v2 = vld [vmem:[%s1458_s1 + $0x280] sm:$0xff]  ;;  %v15_v4 = vld [vmem:[%s1459_s0 + $0x8] sm:$0xff] }
  0x2d   :  { %415 = vmatpush.msrb.mxu2 %v136_v20  ;;  %434 = vmatpush.msrb.mxu3 %v153_v21  ;;  %v142_v3 = vld [vmem:[%s1458_s1 + $0x380] sm:$0xff]  ;;  %v17_v5 = vld [vmem:[%s1459_s0 + $0x18] sm:$0xff]  ;;  %v172_v6 = vld [vmem:[%s1458_s1 + $0x470] sm:$0xff] }
  0x2e   :  { %376 = vmatpush.msrb.mxu0 %v103_v22  ;;  %395 = vmatpush.msrb.mxu1 %v120_v23  ;;  %v189_v7 = vld [vmem:[%s1458_s1 + $0x4f8] sm:$0xff]  ;;  %v204_v8 = vld [vmem:[%s1458_s1 + $0x570] sm:$0xff]  ;;  %v171_v10 = vld [vmem:[%s1458_s1 + $0x468] sm:$0xff] }
  0x2f   :  { %416 = vmatpush.msrb.mxu2 %v135_v24  ;;  %435 = vmatpush.msrb.mxu3 %v152_v25  ;;  %v221_v9 = vld [vmem:[%s1458_s1 + $0x5f8] sm:$0xff]  ;;  %v188_v11 = vld [vmem:[%s1458_s1 + $0x4f0] sm:$0xff]  ;;  %v203_v12 = vld [vmem:[%s1458_s1 + $0x568] sm:$0xff] }
  0x30   :  { %377 = vmatpush.msrb.mxu0 %v102_v26  ;;  %396 = vmatpush.msrb.mxu1 %v119_v27  ;;  %v220_v13 = vld [vmem:[%s1458_s1 + $0x5f0] sm:$0xff]  ;;  %v170_v14 = vld [vmem:[%s1458_s1 + $0x460] sm:$0xff]  ;;  %v187_v15 = vld [vmem:[%s1458_s1 + $0x4e8] sm:$0xff] }
  0x31   :  { %417 = vmatpush.msrb.mxu2 %v134_v28  ;;  %436 = vmatpush.msrb.mxu3 %v151_v29  ;;  %v202_v16 = vld [vmem:[%s1458_s1 + $0x560] sm:$0xff]  ;;  %v219_v17 = vld [vmem:[%s1458_s1 + $0x5e8] sm:$0xff]  ;;  %v20_v18 = vld [vmem:[%s1459_s0 + $0x30] sm:$0xff] }
  0x32   :  { %378 = vmatpush.msrb.mxu0 %v101_v30  ;;  %397 = vmatpush.msrb.mxu1 %v118_v31  ;;  %v169_v19 = vld [vmem:[%s1458_s1 + $0x458] sm:$0xff]  ;;  %v186_v20 = vld [vmem:[%s1458_s1 + $0x4e0] sm:$0xff]  ;;  %v168_v25 = vld [vmem:[%s1458_s1 + $0x450] sm:$0xff] }
  0x33   :  { %418 = vmatpush.msrb.mxu2 %v133_v32  ;;  %437 = vmatpush.msrb.mxu3 %v150_v33  ;;  %v201_v21 = vld [vmem:[%s1458_s1 + $0x558] sm:$0xff]  ;;  %v218_v22 = vld [vmem:[%s1458_s1 + $0x5e0] sm:$0xff]  ;;  %v200_v27 = vld [vmem:[%s1458_s1 + $0x550] sm:$0xff] }
  0x34   :  { %379 = vmatpush.msrb.mxu0 %v100_v34  ;;  %398 = vmatpush.msrb.mxu1 %v117_v35  ;;  %v18_v23 = vld [vmem:[%s1459_s0 + $0x20] sm:$0xff]  ;;  %v21_v24 = vld [vmem:[%s1459_s0 + $0x38] sm:$0xff]  ;;  %v19_v29 = vld [vmem:[%s1459_s0 + $0x28] sm:$0xff] }
  0x35   :  { %419 = vmatpush.msrb.mxu2 %v132_v36  ;;  %438 = vmatpush.msrb.mxu3 %v149_v37  ;;  %v185_v26 = vld [vmem:[%s1458_s1 + $0x4d8] sm:$0xff]  ;;  %v167_v30 = vld [vmem:[%s1458_s1 + $0x448] sm:$0xff]  ;;  %v184_v31 = vld [vmem:[%s1458_s1 + $0x4d0] sm:$0xff] }
  0x36   :  { %380 = vmatpush.msrb.mxu0 %v99_v38  ;;  %399 = vmatpush.msrb.mxu1 %v116_v39  ;;  %v217_v28 = vld [vmem:[%s1458_s1 + $0x5d8] sm:$0xff]  ;;  %v199_v32 = vld [vmem:[%s1458_s1 + $0x548] sm:$0xff]  ;;  %v216_v33 = vld [vmem:[%s1458_s1 + $0x5d0] sm:$0xff] }
  0x37   :  { %420 = vmatpush.msrb.mxu2 %v131_v40  ;;  %439 = vmatpush.msrb.mxu3 %v148_v41  ;;  %v166_v34 = vld [vmem:[%s1458_s1 + $0x440] sm:$0xff]  ;;  %v183_v35 = vld [vmem:[%s1458_s1 + $0x4c8] sm:$0xff]  ;;  %v165_v38 = vld [vmem:[%s1458_s1 + $0x438] sm:$0xff] }
  0x38   :  { %381 = vmatpush.msrb.mxu0 %v98_v42  ;;  %400 = vmatpush.msrb.mxu1 %v115_v43  ;;  %v198_v36 = vld [vmem:[%s1458_s1 + $0x540] sm:$0xff]  ;;  %v215_v37 = vld [vmem:[%s1458_s1 + $0x5c8] sm:$0xff]  ;;  %v197_v40 = vld [vmem:[%s1458_s1 + $0x538] sm:$0xff] }
  0x39   :  { %421 = vmatpush.msrb.mxu2 %v130_v44  ;;  %440 = vmatpush.msrb.mxu3 %v147_v45  ;;  %v182_v39 = vld [vmem:[%s1458_s1 + $0x4c0] sm:$0xff]  ;;  %v164_v42 = vld [vmem:[%s1458_s1 + $0x430] sm:$0xff]  ;;  %v181_v43 = vld [vmem:[%s1458_s1 + $0x4b8] sm:$0xff] }
  0x3a   :  { %382 = vmatpush.msrb.mxu0 %v97_v46  ;;  %401 = vmatpush.msrb.mxu1 %v114_v47  ;;  %v214_v41 = vld [vmem:[%s1458_s1 + $0x5c0] sm:$0xff]  ;;  %v196_v44 = vld [vmem:[%s1458_s1 + $0x530] sm:$0xff]  ;;  %v213_v45 = vld [vmem:[%s1458_s1 + $0x5b8] sm:$0xff] }
  0x3b   :  { %422 = vmatpush.msrb.mxu2 %v129_v48  ;;  %441 = vmatpush.msrb.mxu3 %v146_v49  ;;  %v163_v46 = vld [vmem:[%s1458_s1 + $0x428] sm:$0xff]  ;;  %v180_v47 = vld [vmem:[%s1458_s1 + $0x4b0] sm:$0xff] }
  0x3c   :  { %383 = vmatpush.msrb.mxu0 %v96_v50  ;;  %402 = vmatpush.msrb.mxu1 %v113_v51  ;;  %v195_v48 = vld [vmem:[%s1458_s1 + $0x528] sm:$0xff]  ;;  %v212_v49 = vld [vmem:[%s1458_s1 + $0x5b0] sm:$0xff]  ;;  %v162_v50 = vld [vmem:[%s1458_s1 + $0x420] sm:$0xff] }
  0x3d   :  { %423 = vmatpush.msrb.mxu2 %v128_v52  ;;  %442 = vmatpush.msrb.mxu3 %v145_v53  ;;  %v179_v51 = vld [vmem:[%s1458_s1 + $0x4a8] sm:$0xff]  ;;  %v194_v52 = vld [vmem:[%s1458_s1 + $0x520] sm:$0xff] }
  0x3e   :  { %384 = vmatpush.msrb.mxu0 %v95_v54  ;;  %403 = vmatpush.msrb.mxu1 %v112_v55  ;;  %v211_v53 = vld [vmem:[%s1458_s1 + $0x5a8] sm:$0xff]  ;;  %v161_v54 = vld [vmem:[%s1458_s1 + $0x418] sm:$0xff]  ;;  %v178_v55 = vld [vmem:[%s1458_s1 + $0x4a0] sm:$0xff] }
  0x3f   :  { %424 = vmatpush.msrb.mxu2 %v127_v56  ;;  %443 = vmatpush.msrb.mxu3 %v144_v57  ;;  %v193_v56 = vld [vmem:[%s1458_s1 + $0x518] sm:$0xff]  ;;  %v210_v57 = vld [vmem:[%s1458_s1 + $0x5a0] sm:$0xff] }
  0x40   :  { %385 = vmatpush.msrb.mxu0 %v94_v58  ;;  %404 = vmatpush.msrb.mxu1 %v111_v59  ;;  %v160_v58 = vld [vmem:[%s1458_s1 + $0x410] sm:$0xff]  ;;  %v177_v59 = vld [vmem:[%s1458_s1 + $0x498] sm:$0xff] }
  0x41   :  { %425 = vmatpush.msrb.mxu2 %v126_v60  ;;  %444 = vmatpush.msrb.mxu3 %v143_v61  ;;  %v192_v60 = vld [vmem:[%s1458_s1 + $0x510] sm:$0xff]  ;;  %v209_v61 = vld [vmem:[%s1458_s1 + $0x598] sm:$0xff] }
  0x42   :  { %306 = vmatmul.f32.vlgmr.msra.gmra.mxu0 %v14_v62  ;;  %346 = vmatmul.f32.vlgmr.msra.gmra.mxu2 %v16_v63  ;;  %v159_v62 = vld [vmem:[%s1458_s1 + $0x408] sm:$0xff]  ;;  %v176_v63 = vld [vmem:[%s1458_s1 + $0x490] sm:$0xff] }
  0x43   :  { %450 = vmatpush.msra.mxu0 %v173_v0  ;;  %490 = vmatpush.msra.mxu2 %v205_v1  ;;  %v191_v0 = vld [vmem:[%s1458_s1 + $0x508] sm:$0xff]  ;;  %v208_v1 = vld [vmem:[%s1458_s1 + $0x590] sm:$0xff] }
  0x44   :  { %405 = vmatpush.msrb.mxu1 %v110_v2  ;;  %445 = vmatpush.msrb.mxu3 %v142_v3  ;;  %v158_v2 = vld [vmem:[%s1458_s1 + $0x400] sm:$0xff]  ;;  %v175_v3 = vld [vmem:[%s1458_s1 + $0x488] sm:$0xff] }
  0x45   :  { %326 = vmatmul.f32.vlgmr.msra.gmra.mxu1 %v15_v4  ;;  %366 = vmatmul.f32.vlgmr.msra.gmra.mxu3 %v17_v5  ;;  %v190_v4 = vld [vmem:[%s1458_s1 + $0x500] sm:$0xff]  ;;  %v207_v5 = vld [vmem:[%s1458_s1 + $0x588] sm:$0xff] }
  0x46   :  { %451 = vmatpush.msra.mxu0 %v172_v6  ;;  %470 = vmatpush.msra.mxu1 %v189_v7  ;;  %v22_v6 = vld [vmem:[%s1459_s0 + $0x40] sm:$0xff]  ;;  %v24_v7 = vld [vmem:[%s1459_s0 + $0x50] sm:$0xff] }
  0x47   :  { %491 = vmatpush.msra.mxu2 %v204_v8  ;;  %510 = vmatpush.msra.mxu3 %v221_v9  ;;  %v237_v8 = vld [vmem:[%s1458_s1 + $0x678] sm:$0xff] }
  0x48   :  { %452 = vmatpush.msra.mxu0 %v171_v10  ;;  %471 = vmatpush.msra.mxu1 %v188_v11  ;;  %v269_v9 = vld [vmem:[%s1458_s1 + $0x778] sm:$0xff]  ;;  %v174_v10 = vld [vmem:[%s1458_s1 + $0x480] sm:$0xff] }
  0x49   :  { %492 = vmatpush.msra.mxu2 %v203_v12  ;;  %511 = vmatpush.msra.mxu3 %v220_v13  ;;  %v206_v11 = vld [vmem:[%s1458_s1 + $0x580] sm:$0xff]  ;;  %v23_v12 = vld [vmem:[%s1459_s0 + $0x48] sm:$0xff]  ;;  %v25_v13 = vld [vmem:[%s1459_s0 + $0x58] sm:$0xff] }
  0x4a   :  { %453 = vmatpush.msra.mxu0 %v170_v14  ;;  %472 = vmatpush.msra.mxu1 %v187_v15  ;;  %v236_v14 = vld [vmem:[%s1458_s1 + $0x670] sm:$0xff]  ;;  %v253_v15 = vld [vmem:[%s1458_s1 + $0x6f8] sm:$0xff] }
  0x4b   :  { %493 = vmatpush.msra.mxu2 %v202_v16  ;;  %512 = vmatpush.msra.mxu3 %v219_v17  ;;  %v268_v16 = vld [vmem:[%s1458_s1 + $0x770] sm:$0xff]  ;;  %v285_v17 = vld [vmem:[%s1458_s1 + $0x7f8] sm:$0xff] }
  0x4c   :  { %426 = vmatmul.f32.vlgmr.msrb.gmra.mxu2 %v20_v18  ;;  %454 = vmatpush.msra.mxu0 %v169_v19  ;;  %v235_v18 = vld [vmem:[%s1458_s1 + $0x668] sm:$0xff]  ;;  %v252_v19 = vld [vmem:[%s1458_s1 + $0x6f0] sm:$0xff] }
  0x4d   :  { %473 = vmatpush.msra.mxu1 %v186_v20  ;;  %494 = vmatpush.msra.mxu2 %v201_v21  ;;  %v267_v20 = vld [vmem:[%s1458_s1 + $0x768] sm:$0xff]  ;;  %v284_v21 = vld [vmem:[%s1458_s1 + $0x7f0] sm:$0xff] }
  0x4e   :  { %513 = vmatpush.msra.mxu3 %v218_v22  ;;  %386 = vmatmul.f32.vlgmr.msrb.gmra.mxu0 %v18_v23  ;;  %v234_v22 = vld [vmem:[%s1458_s1 + $0x660] sm:$0xff]  ;;  %v251_v23 = vld [vmem:[%s1458_s1 + $0x6e8] sm:$0xff] }
  0x4f   :  { %446 = vmatmul.f32.vlgmr.msrb.gmra.mxu3 %v21_v24  ;;  %455 = vmatpush.msra.mxu0 %v168_v25  ;;  %v266_v24 = vld [vmem:[%s1458_s1 + $0x760] sm:$0xff]  ;;  %v283_v25 = vld [vmem:[%s1458_s1 + $0x7e8] sm:$0xff] }
  0x50   :  { %474 = vmatpush.msra.mxu1 %v185_v26  ;;  %495 = vmatpush.msra.mxu2 %v200_v27  ;;  %v233_v26 = vld [vmem:[%s1458_s1 + $0x658] sm:$0xff]  ;;  %v250_v27 = vld [vmem:[%s1458_s1 + $0x6e0] sm:$0xff] }
  0x51   :  { %514 = vmatpush.msra.mxu3 %v217_v28  ;;  %406 = vmatmul.f32.vlgmr.msrb.gmra.mxu1 %v19_v29  ;;  %v265_v28 = vld [vmem:[%s1458_s1 + $0x758] sm:$0xff]  ;;  %v282_v29 = vld [vmem:[%s1458_s1 + $0x7e0] sm:$0xff] }
  0x52   :  { %456 = vmatpush.msra.mxu0 %v167_v30  ;;  %475 = vmatpush.msra.mxu1 %v184_v31  ;;  %v232_v30 = vld [vmem:[%s1458_s1 + $0x650] sm:$0xff]  ;;  %v249_v31 = vld [vmem:[%s1458_s1 + $0x6d8] sm:$0xff] }
  0x53   :  { %496 = vmatpush.msra.mxu2 %v199_v32  ;;  %515 = vmatpush.msra.mxu3 %v216_v33  ;;  %v264_v32 = vld [vmem:[%s1458_s1 + $0x750] sm:$0xff]  ;;  %v281_v33 = vld [vmem:[%s1458_s1 + $0x7d8] sm:$0xff] }
  0x54   :  { %457 = vmatpush.msra.mxu0 %v166_v34  ;;  %476 = vmatpush.msra.mxu1 %v183_v35  ;;  %v231_v34 = vld [vmem:[%s1458_s1 + $0x648] sm:$0xff]  ;;  %v248_v35 = vld [vmem:[%s1458_s1 + $0x6d0] sm:$0xff] }
  0x55   :  { %497 = vmatpush.msra.mxu2 %v198_v36  ;;  %516 = vmatpush.msra.mxu3 %v215_v37  ;;  %v263_v36 = vld [vmem:[%s1458_s1 + $0x748] sm:$0xff]  ;;  %v280_v37 = vld [vmem:[%s1458_s1 + $0x7d0] sm:$0xff] }
  0x56   :  { %458 = vmatpush.msra.mxu0 %v165_v38  ;;  %477 = vmatpush.msra.mxu1 %v182_v39  ;;  %v230_v38 = vld [vmem:[%s1458_s1 + $0x640] sm:$0xff]  ;;  %v247_v39 = vld [vmem:[%s1458_s1 + $0x6c8] sm:$0xff] }
  0x57   :  { %498 = vmatpush.msra.mxu2 %v197_v40  ;;  %517 = vmatpush.msra.mxu3 %v214_v41  ;;  %v262_v40 = vld [vmem:[%s1458_s1 + $0x740] sm:$0xff]  ;;  %v279_v41 = vld [vmem:[%s1458_s1 + $0x7c8] sm:$0xff] }
  0x58   :  { %459 = vmatpush.msra.mxu0 %v164_v42  ;;  %478 = vmatpush.msra.mxu1 %v181_v43  ;;  %v229_v42 = vld [vmem:[%s1458_s1 + $0x638] sm:$0xff]  ;;  %v246_v43 = vld [vmem:[%s1458_s1 + $0x6c0] sm:$0xff] }
  0x59   :  { %499 = vmatpush.msra.mxu2 %v196_v44  ;;  %518 = vmatpush.msra.mxu3 %v213_v45  ;;  %v261_v44 = vld [vmem:[%s1458_s1 + $0x738] sm:$0xff]  ;;  %v278_v45 = vld [vmem:[%s1458_s1 + $0x7c0] sm:$0xff] }
  0x5a   :  { %460 = vmatpush.msra.mxu0 %v163_v46  ;;  %479 = vmatpush.msra.mxu1 %v180_v47  ;;  %v228_v46 = vld [vmem:[%s1458_s1 + $0x630] sm:$0xff]  ;;  %v245_v47 = vld [vmem:[%s1458_s1 + $0x6b8] sm:$0xff] }
  0x5b   :  { %500 = vmatpush.msra.mxu2 %v195_v48  ;;  %519 = vmatpush.msra.mxu3 %v212_v49  ;;  %v260_v48 = vld [vmem:[%s1458_s1 + $0x730] sm:$0xff]  ;;  %v277_v49 = vld [vmem:[%s1458_s1 + $0x7b8] sm:$0xff] }
  0x5c   :  { %461 = vmatpush.msra.mxu0 %v162_v50  ;;  %480 = vmatpush.msra.mxu1 %v179_v51  ;;  %v227_v50 = vld [vmem:[%s1458_s1 + $0x628] sm:$0xff]  ;;  %v244_v51 = vld [vmem:[%s1458_s1 + $0x6b0] sm:$0xff] }
  0x5d   :  { %501 = vmatpush.msra.mxu2 %v194_v52  ;;  %520 = vmatpush.msra.mxu3 %v211_v53  ;;  %v259_v52 = vld [vmem:[%s1458_s1 + $0x728] sm:$0xff]  ;;  %v276_v53 = vld [vmem:[%s1458_s1 + $0x7b0] sm:$0xff] }
  0x5e   :  { %462 = vmatpush.msra.mxu0 %v161_v54  ;;  %481 = vmatpush.msra.mxu1 %v178_v55  ;;  %v226_v54 = vld [vmem:[%s1458_s1 + $0x620] sm:$0xff]  ;;  %v243_v55 = vld [vmem:[%s1458_s1 + $0x6a8] sm:$0xff] }
  0x5f   :  { %502 = vmatpush.msra.mxu2 %v193_v56  ;;  %521 = vmatpush.msra.mxu3 %v210_v57  ;;  %v258_v56 = vld [vmem:[%s1458_s1 + $0x720] sm:$0xff]  ;;  %v275_v57 = vld [vmem:[%s1458_s1 + $0x7a8] sm:$0xff] }
  0x60   :  { %463 = vmatpush.msra.mxu0 %v160_v58  ;;  %482 = vmatpush.msra.mxu1 %v177_v59  ;;  %v225_v58 = vld [vmem:[%s1458_s1 + $0x618] sm:$0xff]  ;;  %v242_v59 = vld [vmem:[%s1458_s1 + $0x6a0] sm:$0xff] }
  0x61   :  { %503 = vmatpush.msra.mxu2 %v192_v60  ;;  %522 = vmatpush.msra.mxu3 %v209_v61  ;;  %v257_v60 = vld [vmem:[%s1458_s1 + $0x718] sm:$0xff]  ;;  %v274_v61 = vld [vmem:[%s1458_s1 + $0x7a0] sm:$0xff] }
  0x62   :  { %464 = vmatpush.msra.mxu0 %v159_v62  ;;  %483 = vmatpush.msra.mxu1 %v176_v63  ;;  %v224_v62 = vld [vmem:[%s1458_s1 + $0x610] sm:$0xff]  ;;  %v241_v63 = vld [vmem:[%s1458_s1 + $0x698] sm:$0xff] }
  0x63   :  { %504 = vmatpush.msra.mxu2 %v191_v0  ;;  %523 = vmatpush.msra.mxu3 %v208_v1  ;;  %v256_v0 = vld [vmem:[%s1458_s1 + $0x710] sm:$0xff]  ;;  %v273_v1 = vld [vmem:[%s1458_s1 + $0x798] sm:$0xff] }
  0x64   :  { %465 = vmatpush.msra.mxu0 %v158_v2  ;;  %484 = vmatpush.msra.mxu1 %v175_v3  ;;  %v223_v2 = vld [vmem:[%s1458_s1 + $0x608] sm:$0xff]  ;;  %v240_v3 = vld [vmem:[%s1458_s1 + $0x690] sm:$0xff] }
  0x65   :  { %505 = vmatpush.msra.mxu2 %v190_v4  ;;  %524 = vmatpush.msra.mxu3 %v207_v5  ;;  %v255_v4 = vld [vmem:[%s1458_s1 + $0x708] sm:$0xff]  ;;  %v272_v5 = vld [vmem:[%s1458_s1 + $0x790] sm:$0xff] }
  0x66   :  { %466 = vmatmul.f32.vlgmr.msra.gmra.mxu0 %v22_v6  ;;  %506 = vmatmul.f32.vlgmr.msra.gmra.mxu2 %v24_v7  ;;  %v222_v6 = vld [vmem:[%s1458_s1 + $0x600] sm:$0xff]  ;;  %v239_v7 = vld [vmem:[%s1458_s1 + $0x688] sm:$0xff] }
  0x67   :  { %530 = vmatpush.msrb.mxu0 %v237_v8  ;;  %570 = vmatpush.msrb.mxu2 %v269_v9  ;;  %v254_v8 = vld [vmem:[%s1458_s1 + $0x700] sm:$0xff]  ;;  %v271_v9 = vld [vmem:[%s1458_s1 + $0x788] sm:$0xff] }
  0x68   :  { %485 = vmatpush.msra.mxu1 %v174_v10  ;;  %525 = vmatpush.msra.mxu3 %v206_v11  ;;  %v26_v10 = vld [vmem:[%s1459_s0 + $0x60] sm:$0xff]  ;;  %v28_v11 = vld [vmem:[%s1459_s0 + $0x70] sm:$0xff] }
  0x69   :  { %486 = vmatmul.f32.vlgmr.msra.gmra.mxu1 %v23_v12  ;;  %526 = vmatmul.f32.vlgmr.msra.gmra.mxu3 %v25_v13  ;;  %v238_v12 = vld [vmem:[%s1458_s1 + $0x680] sm:$0xff] }
  0x6a   :  { %531 = vmatpush.msrb.mxu0 %v236_v14  ;;  %550 = vmatpush.msrb.mxu1 %v253_v15  ;;  %v270_v13 = vld [vmem:[%s1458_s1 + $0x780] sm:$0xff]  ;;  %v27_v14 = vld [vmem:[%s1459_s0 + $0x68] sm:$0xff]  ;;  %v29_v15 = vld [vmem:[%s1459_s0 + $0x78] sm:$0xff] }
  0x6b   :  { %571 = vmatpush.msrb.mxu2 %v268_v16  ;;  %590 = vmatpush.msrb.mxu3 %v285_v17  ;;  %v615_v16 = vld [vmem:[%s1460_s2] ss:$0 sm:$0xff] }
  0x6c   :  { %532 = vmatpush.msrb.mxu0 %v235_v18  ;;  %551 = vmatpush.msrb.mxu1 %v252_v19 }
  0x6d   :  { %572 = vmatpush.msrb.mxu2 %v267_v20  ;;  %591 = vmatpush.msrb.mxu3 %v284_v21 }
  0x6e   :  { %533 = vmatpush.msrb.mxu0 %v234_v22  ;;  %552 = vmatpush.msrb.mxu1 %v251_v23 }
  0x6f   :  { %573 = vmatpush.msrb.mxu2 %v266_v24  ;;  %592 = vmatpush.msrb.mxu3 %v283_v25 }
  0x70   :  { %534 = vmatpush.msrb.mxu0 %v233_v26  ;;  %553 = vmatpush.msrb.mxu1 %v250_v27 }
  0x71   :  { %574 = vmatpush.msrb.mxu2 %v265_v28  ;;  %593 = vmatpush.msrb.mxu3 %v282_v29 }
  0x72   :  { %535 = vmatpush.msrb.mxu0 %v232_v30  ;;  %554 = vmatpush.msrb.mxu1 %v249_v31 }
  0x73   :  { %575 = vmatpush.msrb.mxu2 %v264_v32  ;;  %594 = vmatpush.msrb.mxu3 %v281_v33 }
  0x74   :  { %536 = vmatpush.msrb.mxu0 %v231_v34  ;;  %555 = vmatpush.msrb.mxu1 %v248_v35 }
  0x75   :  { %576 = vmatpush.msrb.mxu2 %v263_v36  ;;  %595 = vmatpush.msrb.mxu3 %v280_v37 }
  0x76   :  { %537 = vmatpush.msrb.mxu0 %v230_v38  ;;  %556 = vmatpush.msrb.mxu1 %v247_v39 }
  0x77   :  { %577 = vmatpush.msrb.mxu2 %v262_v40  ;;  %596 = vmatpush.msrb.mxu3 %v279_v41 }
  0x78   :  { %538 = vmatpush.msrb.mxu0 %v229_v42  ;;  %557 = vmatpush.msrb.mxu1 %v246_v43 }
  0x79   :  { %578 = vmatpush.msrb.mxu2 %v261_v44  ;;  %597 = vmatpush.msrb.mxu3 %v278_v45 }
  0x7a   :  { %539 = vmatpush.msrb.mxu0 %v228_v46  ;;  %558 = vmatpush.msrb.mxu1 %v245_v47 }
  0x7b   :  { %579 = vmatpush.msrb.mxu2 %v260_v48  ;;  %598 = vmatpush.msrb.mxu3 %v277_v49 }
  0x7c   :  { %540 = vmatpush.msrb.mxu0 %v227_v50  ;;  %559 = vmatpush.msrb.mxu1 %v244_v51 }
  0x7d   :  { %580 = vmatpush.msrb.mxu2 %v259_v52  ;;  %599 = vmatpush.msrb.mxu3 %v276_v53 }
  0x7e   :  { %541 = vmatpush.msrb.mxu0 %v226_v54  ;;  %560 = vmatpush.msrb.mxu1 %v243_v55 }
  0x7f   :  { %581 = vmatpush.msrb.mxu2 %v258_v56  ;;  %600 = vmatpush.msrb.mxu3 %v275_v57 }
  0x80   :  { %542 = vmatpush.msrb.mxu0 %v225_v58  ;;  %561 = vmatpush.msrb.mxu1 %v242_v59 }
  0x81   :  { %582 = vmatpush.msrb.mxu2 %v257_v60  ;;  %601 = vmatpush.msrb.mxu3 %v274_v61 }
  0x82   :  { %543 = vmatpush.msrb.mxu0 %v224_v62  ;;  %562 = vmatpush.msrb.mxu1 %v241_v63 }
  0x83   :  { %583 = vmatpush.msrb.mxu2 %v256_v0  ;;  %602 = vmatpush.msrb.mxu3 %v273_v1 }
  0x84   :  { %544 = vmatpush.msrb.mxu0 %v223_v2  ;;  %563 = vmatpush.msrb.mxu1 %v240_v3 }
  0x85   :  { %584 = vmatpush.msrb.mxu2 %v255_v4  ;;  %603 = vmatpush.msrb.mxu3 %v272_v5 }
  0x86   :  { %545 = vmatpush.msrb.mxu0 %v222_v6  ;;  %564 = vmatpush.msrb.mxu1 %v239_v7 }
  0x87   :  { %585 = vmatpush.msrb.mxu2 %v254_v8  ;;  %604 = vmatpush.msrb.mxu3 %v271_v9 }
  0x88   :  { %546 = vmatmul.f32.vlgmr.msrb.gmra.mxu0 %v26_v10  ;;  %586 = vmatmul.f32.vlgmr.msrb.gmra.mxu2 %v28_v11 }
  0x89   :  { %565 = vmatpush.msrb.mxu1 %v238_v12  ;;  %605 = vmatpush.msrb.mxu3 %v270_v13 }
  0x8a   :  { %566 = vmatmul.f32.vlgmr.msrb.gmra.mxu1 %v27_v14  ;;  %606 = vmatmul.f32.vlgmr.msrb.gmra.mxu3 %v29_v15 }
  0xbf   :  { %v307_v17 = vpop.f32.mrf.mxu0 }
  0xc0   :  { %v308_v18 = vadd.f32 %v615_v16, %v307_v17 }
  0xc2   :  { %v327_v19 = vpop.f32.mrf.mxu1 }
  0xc3   :  { %v328_v20 = vadd.f32 %v327_v19, %v308_v18 }
  0xc5   :  { %v347_v21 = vpop.f32.mrf.mxu2 }
  0xc6   :  { %v348_v22 = vadd.f32 %v347_v21, %v328_v20 }
  0xc8   :  { %v367_v23 = vpop.f32.mrf.mxu3 }
  0xc9   :  { %v368_v24 = vadd.f32 %v367_v23, %v348_v22 }
  0xcb   :  { %v387_v25 = vpop.f32.mrf.mxu0 }
  0xcc   :  { %v388_v26 = vadd.f32 %v387_v25, %v368_v24 }
  0xce   :  { %v407_v27 = vpop.f32.mrf.mxu1 }
  0xcf   :  { %v408_v28 = vadd.f32 %v407_v27, %v388_v26  ;;  %v427_v29 = vpop.f32.mrf.mxu2 }
  0xd1   :  { %v428_v30 = vadd.f32 %v427_v29, %v408_v28 }
  0xd2   :  { %v447_v31 = vpop.f32.mrf.mxu3 }
  0xd3   :  { %v448_v33 = vadd.f32 %v447_v31, %v428_v30 }
  0xe3   :  { %v467_v32 = vpop.f32.mrf.mxu0 }
  0xe4   :  { %v468_v34 = vadd.f32 %v467_v32, %v448_v33 }
  0xe6   :  { %v487_v35 = vpop.f32.mrf.mxu1 }
  0xe7   :  { %v488_v37 = vadd.f32 %v487_v35, %v468_v34 }
  0xe9   :  { %v507_v36 = vpop.f32.mrf.mxu2 }
  0xea   :  { %v508_v38 = vadd.f32 %v507_v36, %v488_v37 }
  0xec   :  { %v527_v39 = vpop.f32.mrf.mxu3 }
  0xed   :  { %v528_v40 = vadd.f32 %v527_v39, %v508_v38 }
 0x105   :  { %v547_v41 = vpop.f32.mrf.mxu0 }
 0x106   :  { %v548_v42 = vadd.f32 %v547_v41, %v528_v40 }
 0x107   :  { %v567_v43 = vpop.f32.mrf.mxu1 }
 0x108   :  { %v568_v44 = vadd.f32 %v567_v43, %v548_v42 }
 0x10b   :  { %v587_v45 = vpop.f32.mrf.mxu2 }
 0x10c   :  { %v588_v46 = vadd.f32 %v587_v45, %v568_v44 }
 0x10d   :  { %v607_v47 = vpop.f32.mrf.mxu3 }
 0x10e   :  { %v608_v48 = vadd.f32 %v607_v47, %v588_v46 }
 0x110   :  { %610 = vst [vmem:[%s1461_s3] sm:$0xff] %v608_v48 }

</bundles_post_ra>
